<compile_context>
chip_gen: v7x
topology: tpu7x:2x2x1
jax: 0.10.0
libtpu: 0.0.40
codegen_flags: <defaults>
</compile_context>

<pallas_src>
import functools
import math

import jax
import jax.numpy as jnp
import numpy as np
from jax.experimental import pallas as pl
from jax.experimental.pallas import tpu as pltpu


def _round_up(n, m):
    return ((n + m - 1) // m) * m


# ---------------------------------------------------------------------------
# Fused Pallas kernel: one grid step == Bt batch elements.
# ---------------------------------------------------------------------------
def _sse_cross_kernel(
    xtxt_ref,       # (Bt, St, Dt)   bf16
    xaud_ref,       # (Bt, Sa, E)    bf16
    dr_wt_ref,      # (Dt, E)        bf16  dim_reduction, pre-transposed
    w_e_ref,        # (E, 8E)        bf16  [txt-proj 3E | aud-proj 3E | ta_Wo | at_Wo]
    cl_wt_ref,      # (2E, W)        bf16  concat_linear^T, zero-padded cols >= H2
    cls_wt_ref,     # (W, W)         bf16  classifier^T shifted into lanes [H2:H2+C]
    bias_ref,       # (1, Btot)      f32   all biases, 128-aligned segments
    out_ref,        # (1, Bt, W)     f32   lanes [0:H2]=x_ta, [H2:H2+C]=y
    *, ta_H, at_H, b_off,
):
    f32, bf16 = jnp.float32, jnp.bfloat16
    Bt, St, Dt = xtxt_ref.shape
    Sa, E = xaud_ref.shape[1], xaud_ref.shape[2]
    W = out_ref.shape[2]

    # Static bias slices from the single packed bias operand (all lane-aligned).
    o_dr, o_txt, o_aud, o_tao, o_ato, o_cl, o_cls = b_off
    dr_b = bias_ref[:, o_dr:o_dr + E]
    txt_pb = bias_ref[:, o_txt:o_txt + 3 * E]
    aud_pb = bias_ref[:, o_aud:o_aud + 3 * E]
    ta_ob = bias_ref[:, o_tao:o_tao + E]
    at_ob = bias_ref[:, o_ato:o_ato + E]
    cl_b = bias_ref[:, o_cl:o_cl + W]
    cls_b = bias_ref[:, o_cls:o_cls + W]

    # ---- dim_reduction + fused per-input in-projections (batch folded into M) ----
    x_txt = xtxt_ref[...].reshape(Bt * St, Dt)                          # bf16
    x_aud = xaud_ref[...].reshape(Bt * Sa, E)                           # bf16

    xt = jnp.dot(x_txt, dr_wt_ref[...], preferred_element_type=f32) + dr_b
    xt_b = xt.astype(bf16)                                              # (Bt*St, E)

    # xt feeds ta-Q and at-K/V; x_aud feeds at-Q and ta-K/V (2 matmuls, not 4/6).
    p_txt = jnp.dot(xt_b, w_e_ref[:, 0:3 * E], preferred_element_type=f32) + txt_pb
    p_aud = jnp.dot(x_aud, w_e_ref[:, 3 * E:6 * E], preferred_element_type=f32) + aud_pb

    def as3d(x2d, S):
        return x2d.astype(bf16).reshape(Bt, S, E)

    ta_q = as3d(p_txt[:, 0:E], St)            # 1/sqrt(hd) pre-folded into weights
    at_k = as3d(p_txt[:, E:2 * E], St)
    at_v = as3d(p_txt[:, 2 * E:3 * E], St)
    at_q = as3d(p_aud[:, 0:E], Sa)
    ta_k = as3d(p_aud[:, E:2 * E], Sa)
    ta_v = as3d(p_aud[:, 2 * E:3 * E], Sa)

    lane = jax.lax.broadcasted_iota(jnp.int32, (1, 1, E), 2)

    def attention(q, k, v, H):
        # Block-diagonal head-masked attention: everything stays lane-dense (S, E),
        # no reshape-to-heads / transposes (XLU relayouts eliminated).
        Sq = q.shape[1]
        hd = E // H
        o = jnp.zeros((Bt, Sq, E), f32)
        for h in range(H):                    # static unroll over heads
            m = jnp.logical_and(lane >= h * hd, lane < (h + 1) * hd)
            qh = jnp.where(m, q, 0.0)         # zero non-head lanes -> q_h . k_h
            s = jnp.einsum("bqe,bke->bqk", qh, k, preferred_element_type=f32)
            s = s - jnp.max(s, axis=-1, keepdims=True)
            pr = jnp.exp(s)
            pr = pr * pl.reciprocal(jnp.sum(pr, axis=-1, keepdims=True), approx=True)
            vh = jnp.where(m, v, 0.0)         # output lands in head-h lanes only
            o = o + jnp.einsum("bqk,bke->bqe", pr.astype(bf16), vh,
                               preferred_element_type=f32)
        return o                              # (Bt, Sq, E) f32, natural layout

    o_ta = attention(ta_q, ta_k, ta_v, ta_H)  # (Bt, St, E)
    o_at = attention(at_q, at_k, at_v, at_H)  # (Bt, Sa, E)

    # ---- output projections (batch folded into M) ----
    x_t2a = jnp.dot(o_ta.reshape(Bt * St, E).astype(bf16), w_e_ref[:, 6 * E:7 * E],
                    preferred_element_type=f32) + ta_ob
    x_a2t = jnp.dot(o_at.reshape(Bt * Sa, E).astype(bf16), w_e_ref[:, 7 * E:8 * E],
                    preferred_element_type=f32) + at_ob

    # ---- fusion head: mean over seq, std_mean (unbiased, n=2), 2 linears ----
    m1 = jnp.mean(x_t2a.reshape(Bt, St, E), axis=1)                     # (Bt, E)
    m2 = jnp.mean(x_a2t.reshape(Bt, Sa, E), axis=1)                     # (Bt, E)
    mean = 0.5 * (m1 + m2)
    std = jnp.abs(m1 - m2) * np.float32(1.0 / math.sqrt(2.0))
    xcat = jnp.concatenate([mean, std], axis=-1)                        # (Bt, 2E)

    # Lane-dense slab output: cl weights are column-padded so lanes >= H2 are zero;
    # cls weights are row-truncated and column-shifted so y lands in lanes
    # [H2:H2+C].  slab = xta_pad + y_pad needs no in-kernel concat and stores as a
    # single unmasked 128-lane write.
    xta_p = jnp.dot(xcat.astype(bf16), cl_wt_ref[...],
                    preferred_element_type=f32) + cl_b                  # (Bt, W)
    y_p = jnp.dot(xta_p.astype(bf16), cls_wt_ref[...],
                  preferred_element_type=f32) + cls_b                   # (Bt, W)
    out_ref[0] = xta_p + y_p


# ---------------------------------------------------------------------------
# Host-side weight packing (pre-transpose, scale fold, bf16 cast, bias concat).
# ---------------------------------------------------------------------------
def _pack_params(p, E, H2, C, W):
    f32, bf16 = jnp.float32, jnp.bfloat16

    def qkv(in_w, in_b, H):
        hd = E // H
        s = 1.0 / math.sqrt(hd)               # fold 1/sqrt(hd) into Q weights/bias
        return (in_w[:E].T * s, in_w[E:2 * E].T, in_w[2 * E:3 * E].T,
                in_b[:E] * s, in_b[E:2 * E], in_b[2 * E:3 * E])

    ta_wq, ta_wk, ta_wv, ta_bq, ta_bk, ta_bv = qkv(p["ta_in_w"], p["ta_in_b"], p["ta_H"])
    at_wq, at_wk, at_wv, at_bq, at_bk, at_bv = qkv(p["at_in_w"], p["at_in_b"], p["at_H"])

    # One (E, 8E) matrix for every E-row weight.
    w_e = jnp.concatenate(
        [ta_wq, at_wk, at_wv,                 # applied to reduced text
         at_wq, ta_wk, ta_wv,                 # applied to audio
         p["ta_out_w"].T, p["at_out_w"].T], axis=1).astype(bf16)

    dr_wt = p["dr_w"].T.astype(bf16)          # (Dt, E)

    # concat_linear: transpose + zero-pad columns to the output slab width.
    cl_wt = jnp.zeros((2 * E, W), f32).at[:, :H2].set(p["cl_w"].T).astype(bf16)
    cl_b_pad = jnp.zeros((W,), f32).at[:H2].set(p["cl_b"])
    # classifier: transpose + shift output into lanes [H2:H2+C] of the slab.
    cls_wt = jnp.zeros((W, W), f32).at[:H2, H2:H2 + C].set(p["cls_w"].T).astype(bf16)
    cls_b_pad = jnp.zeros((W,), f32).at[H2:H2 + C].set(p["cls_b"])

    txt_pb = jnp.concatenate([ta_bq, at_bk, at_bv])
    aud_pb = jnp.concatenate([at_bq, ta_bk, ta_bv])

    # Pack every bias into one vector with 128-lane-aligned segments.
    segs = [p["dr_b"], txt_pb, aud_pb, p["ta_out_b"], p["at_out_b"], cl_b_pad, cls_b_pad]
    offs, pieces, off = [], [], 0
    for seg in segs:
        n = seg.shape[0]
        padded = _round_up(n, 128)
        offs.append(off)
        pieces.append(jnp.pad(seg.astype(f32), (0, padded - n)))
        off += padded
    biases = jnp.concatenate(pieces).reshape(1, off)

    return dr_wt, w_e, cl_wt, cls_wt, biases, tuple(offs)


# ---------------------------------------------------------------------------
# Wrapper: single pallas_call, grid over batch tiles.
# ---------------------------------------------------------------------------
def sse_cross_forward(p, x_txt, x_aud):
    f32, bf16 = jnp.float32, jnp.bfloat16
    B, St, Dt = x_txt.shape
    _, Sa, E = x_aud.shape
    H2 = p["cl_w"].shape[0]                   # 0.5 * embed_size
    C = p["cls_w"].shape[0]                   # output_dim
    W = _round_up(H2 + C, 128)                # lane-dense output slab width

    # Batch-tile selection: fold several batch elements per grid step (big M),
    # but keep grid >= 2 when possible so megacore / v7x dual-TC stays busy.
    divisors = [d for d in range(1, B + 1) if B % d == 0]
    cands = [d for d in divisors if B // d >= 2] or divisors
    fitting = [d for d in cands if d * max(St, Sa) <= 512]
    Bt = max(fitting) if fitting else min(cands)
    G = B // Bt

    dr_wt, w_e, cl_wt, cls_wt, biases, b_off = _pack_params(p, E, H2, C, W)

    # Constant weights: whole-array, single-buffered VMEM residents (no 2x
    # double-buffer reservation, no per-step DMA bookkeeping).
    weight_spec = pl.BlockSpec(memory_space=pltpu.MemorySpace.VMEM)

    kern = functools.partial(_sse_cross_kernel, ta_H=p["ta_H"], at_H=p["at_H"],
                             b_off=b_off)

    out = pl.pallas_call(
        kern,
        grid=(G,),
        out_shape=jax.ShapeDtypeStruct((G, Bt, W), f32),
        in_specs=[
            pl.BlockSpec((Bt, St, Dt), lambda g: (g, 0, 0)),
            pl.BlockSpec((Bt, Sa, E), lambda g: (g, 0, 0)),
            weight_spec, weight_spec, weight_spec, weight_spec, weight_spec,
        ],
        out_specs=pl.BlockSpec((1, Bt, W), lambda g: (g, 0, 0)),
        compiler_params=pltpu.CompilerParams(
            dimension_semantics=("parallel",),      # megacore-shardable batch axis
            vmem_limit_bytes=32 * 1024 * 1024,      # explicit; safe on v5e/v6e/v7x
        ),
    )(x_txt.astype(bf16), x_aud.astype(bf16), dr_wt, w_e, cl_wt, cls_wt, biases)

    out = out.reshape(B, W)
    x_ta = out[:, :H2].astype(x_txt.dtype)
    y = out[:, H2:H2 + C].astype(x_txt.dtype)
    return y, x_ta


# ---------------------------------------------------------------------------
# Pure-JAX f32 reference (for correctness check)
# ---------------------------------------------------------------------------
def _ref_mha(q, kv, in_w, in_b, out_w, out_b, H):
    B, Sq, E = q.shape
    Sk = kv.shape[1]
    hd = E // H
    wq, wk, wv = in_w[:E], in_w[E:2 * E], in_w[2 * E:]
    bq, bk, bv = in_b[:E], in_b[E:2 * E], in_b[2 * E:]
    Q = (q @ wq.T + bq).reshape(B, Sq, H, hd).transpose(0, 2, 1, 3)
    K = (kv @ wk.T + bk).reshape(B, Sk, H, hd).transpose(0, 2, 1, 3)
    V = (kv @ wv.T + bv).reshape(B, Sk, H, hd).transpose(0, 2, 1, 3)
    s = jnp.einsum("bhqd,bhkd->bhqk", Q, K) / jnp.sqrt(jnp.float32(hd))
    p = jax.nn.softmax(s, axis=-1)
    o = jnp.einsum("bhqk,bhkd->bhqd", p, V).transpose(0, 2, 1, 3).reshape(B, Sq, E)
    return o @ out_w.T + out_b


def ref_forward(p, x_txt, x_aud):
    xt = x_txt @ p["dr_w"].T + p["dr_b"]
    x_t2a = _ref_mha(xt, x_aud, p["ta_in_w"], p["ta_in_b"], p["ta_out_w"], p["ta_out_b"], p["ta_H"])
    x_a2t = _ref_mha(x_aud, xt, p["at_in_w"], p["at_in_b"], p["at_out_w"], p["at_out_b"], p["at_H"])
    m1, m2 = jnp.mean(x_t2a, axis=1), jnp.mean(x_a2t, axis=1)
    mean = 0.5 * (m1 + m2)
    std = jnp.abs(m1 - m2) / jnp.sqrt(jnp.float32(2.0))
    x_ta = jnp.concatenate([mean, std], axis=-1) @ p["cl_w"].T + p["cl_b"]
    y = x_ta @ p["cls_w"].T + p["cls_b"]
    return y, x_ta


# ---------------------------------------------------------------------------
# Main
# ---------------------------------------------------------------------------
if __name__ == "__main__":
    # Small, consistent shapes (scaled-down RoBERTa/Wav2Vec2 dims).
    B, S_txt, S_aud = 8, 8, 8
    txt_embed_size, embed_size = 256, 128     # torch defaults: 1024 / 768
    ta_H = at_H = 4
    output_dim = 8
    half = embed_size // 2

    key = jax.random.PRNGKey(0)
    ks = jax.random.split(key, 14)

    def init_w(k, shape):                     # fan-in scaled so activations stay O(1)
        return (jax.random.normal(k, shape) / np.sqrt(shape[-1])).astype(jnp.float32)

    def init_b(k, shape):
        return (0.05 * jax.random.normal(k, shape)).astype(jnp.float32)

    params = {
        "dr_w": init_w(ks[0], (embed_size, txt_embed_size)),
        "dr_b": init_b(ks[1], (embed_size,)),
        "ta_in_w": init_w(ks[2], (3 * embed_size, embed_size)),
        "ta_in_b": init_b(ks[3], (3 * embed_size,)),
        "ta_out_w": init_w(ks[4], (embed_size, embed_size)),
        "ta_out_b": init_b(ks[5], (embed_size,)),
        "at_in_w": init_w(ks[6], (3 * embed_size, embed_size)),
        "at_in_b": init_b(ks[7], (3 * embed_size,)),
        "at_out_w": init_w(ks[8], (embed_size, embed_size)),
        "at_out_b": init_b(ks[9], (embed_size,)),
        "cl_w": init_w(ks[10], (half, 2 * embed_size)),
        "cl_b": init_b(ks[11], (half,)),
        "cls_w": init_w(ks[12], (output_dim, half)),
        "cls_b": init_b(ks[13], (output_dim,)),
        "ta_H": ta_H,
        "at_H": at_H,
    }

    kx1, kx2 = jax.random.split(jax.random.PRNGKey(42))
    x_txt = jax.random.normal(kx1, (B, S_txt, txt_embed_size), jnp.float32)
    x_aud = jax.random.normal(kx2, (B, S_aud, embed_size), jnp.float32)

    y, x_ta = sse_cross_forward(params, x_txt, x_aud)
    y, x_ta = jax.block_until_ready(y), jax.block_until_ready(x_ta)

    y_ref, x_ta_ref = ref_forward(params, x_txt, x_aud)
    # bf16 matmul path + approx reciprocal -> relaxed tolerances vs the f32 reference.
    np.testing.assert_allclose(np.asarray(y), np.asarray(y_ref), rtol=5e-2, atol=3e-2)
    np.testing.assert_allclose(np.asarray(x_ta), np.asarray(x_ta_ref), rtol=5e-2, atol=3e-2)

    assert y.shape == (B, output_dim) and x_ta.shape == (B, half)
    print("KERNEL_OK")
</pallas_src>

<mosaic_0001>
module attributes {stable_mosaic.version = 11 : i64} {
  func.func @_sse_cross_kernel(%arg0: i32, %arg1: memref<4x8x256xbf16, #tpu.memory_space<vmem>>, %arg2: memref<4x8x128xbf16, #tpu.memory_space<vmem>>, %arg3: memref<256x128xbf16, #tpu.memory_space<vmem>>, %arg4: memref<128x1024xbf16, #tpu.memory_space<vmem>>, %arg5: memref<256x128xbf16, #tpu.memory_space<vmem>>, %arg6: memref<128x128xbf16, #tpu.memory_space<vmem>>, %arg7: memref<1x1408xf32, #tpu.memory_space<vmem>>, %arg8: memref<1x4x128xf32, #tpu.memory_space<vmem>>) attributes {dimension_semantics = [#tpu.dimension_semantics<parallel>], iteration_bounds = array<i64: 2>, scalar_prefetch = 0 : i64, scratch_operands = 0 : i64, tpu.core_type = #tpu.core_type<tc>, window_params = [{transform_indices = @transform_0, window_bounds = array<i64: 4, 8, 256>}, {transform_indices = @transform_1, window_bounds = array<i64: 4, 8, 128>}, {pipeline_mode = #tpu.pipeline_mode<synchronous>, transform_indices = @transform_2, window_bounds = array<i64: 256, 128>}, {pipeline_mode = #tpu.pipeline_mode<synchronous>, transform_indices = @transform_3, window_bounds = array<i64: 128, 1024>}, {pipeline_mode = #tpu.pipeline_mode<synchronous>, transform_indices = @transform_4, window_bounds = array<i64: 256, 128>}, {pipeline_mode = #tpu.pipeline_mode<synchronous>, transform_indices = @transform_5, window_bounds = array<i64: 128, 128>}, {pipeline_mode = #tpu.pipeline_mode<synchronous>, transform_indices = @transform_6, window_bounds = array<i64: 1, 1408>}, {transform_indices = @transform_7, window_bounds = array<i64: 1, 4, 128>}]} {
    %c0 = arith.constant 0 : index
    %c0_0 = arith.constant 0 : index
    %0 = vector.load %arg7[%c0, %c0_0] : memref<1x1408xf32, #tpu.memory_space<vmem>>, vector<1x128xf32>
    %c0_1 = arith.constant 0 : index
    %c128 = arith.constant 128 : index
    %1 = vector.load %arg7[%c0_1, %c128] : memref<1x1408xf32, #tpu.memory_space<vmem>>, vector<1x384xf32>
    %c0_2 = arith.constant 0 : index
    %c512 = arith.constant 512 : index
    %2 = vector.load %arg7[%c0_2, %c512] : memref<1x1408xf32, #tpu.memory_space<vmem>>, vector<1x384xf32>
    %c0_3 = arith.constant 0 : index
    %c896 = arith.constant 896 : index
    %3 = vector.load %arg7[%c0_3, %c896] : memref<1x1408xf32, #tpu.memory_space<vmem>>, vector<1x128xf32>
    %c0_4 = arith.constant 0 : index
    %c1024 = arith.constant 1024 : index
    %4 = vector.load %arg7[%c0_4, %c1024] : memref<1x1408xf32, #tpu.memory_space<vmem>>, vector<1x128xf32>
    %c0_5 = arith.constant 0 : index
    %c1152 = arith.constant 1152 : index
    %5 = vector.load %arg7[%c0_5, %c1152] : memref<1x1408xf32, #tpu.memory_space<vmem>>, vector<1x128xf32>
    %c0_6 = arith.constant 0 : index
    %c1280 = arith.constant 1280 : index
    %6 = vector.load %arg7[%c0_6, %c1280] : memref<1x1408xf32, #tpu.memory_space<vmem>>, vector<1x128xf32>
    %c0_7 = arith.constant 0 : index
    %c0_8 = arith.constant 0 : index
    %c0_9 = arith.constant 0 : index
    %7 = vector.load %arg1[%c0_7, %c0_8, %c0_9] : memref<4x8x256xbf16, #tpu.memory_space<vmem>>, vector<4x8x256xbf16>
    %8 = vector.shape_cast %7 : vector<4x8x256xbf16> to vector<32x256xbf16>
    %c0_10 = arith.constant 0 : index
    %c0_11 = arith.constant 0 : index
    %c0_12 = arith.constant 0 : index
    %9 = vector.load %arg2[%c0_10, %c0_11, %c0_12] : memref<4x8x128xbf16, #tpu.memory_space<vmem>>, vector<4x8x128xbf16>
    %10 = vector.shape_cast %9 : vector<4x8x128xbf16> to vector<32x128xbf16>
    %c0_13 = arith.constant 0 : index
    %c0_14 = arith.constant 0 : index
    %11 = vector.load %arg3[%c0_13, %c0_14] : memref<256x128xbf16, #tpu.memory_space<vmem>>, vector<256x128xbf16>
    %cst = arith.constant dense<0.000000e+00> : vector<32x128xf32>
    %12 = tpu.matmul %8, %11, %cst {dimension_numbers = #tpu.dot_dimension_numbers<[1], [0], [0], [1], [0, 0, 1, 1], [], []>} : vector<32x256xbf16>, vector<256x128xbf16>, vector<32x128xf32> -> vector<32x128xf32>
    %13 = vector.broadcast %0 : vector<1x128xf32> to vector<32x128xf32>
    %14 = arith.addf %12, %13 : vector<32x128xf32>
    %15 = arith.truncf %14 : vector<32x128xf32> to vector<32x128xbf16>
    %c0_15 = arith.constant 0 : index
    %c0_16 = arith.constant 0 : index
    %16 = vector.load %arg4[%c0_15, %c0_16] : memref<128x1024xbf16, #tpu.memory_space<vmem>>, vector<128x384xbf16>
    %cst_17 = arith.constant dense<0.000000e+00> : vector<32x384xf32>
    %17 = tpu.matmul %15, %16, %cst_17 {dimension_numbers = #tpu.dot_dimension_numbers<[1], [0], [0], [1], [0, 0, 1, 1], [], []>} : vector<32x128xbf16>, vector<128x384xbf16>, vector<32x384xf32> -> vector<32x384xf32>
    %18 = vector.broadcast %1 : vector<1x384xf32> to vector<32x384xf32>
    %19 = arith.addf %17, %18 : vector<32x384xf32>
    %c0_18 = arith.constant 0 : index
    %c384 = arith.constant 384 : index
    %20 = vector.load %arg4[%c0_18, %c384] : memref<128x1024xbf16, #tpu.memory_space<vmem>>, vector<128x384xbf16>
    %cst_19 = arith.constant dense<0.000000e+00> : vector<32x384xf32>
    %21 = tpu.matmul %10, %20, %cst_19 {dimension_numbers = #tpu.dot_dimension_numbers<[1], [0], [0], [1], [0, 0, 1, 1], [], []>} : vector<32x128xbf16>, vector<128x384xbf16>, vector<32x384xf32> -> vector<32x384xf32>
    %22 = vector.broadcast %2 : vector<1x384xf32> to vector<32x384xf32>
    %23 = arith.addf %21, %22 : vector<32x384xf32>
    %24 = vector.extract_strided_slice %19 {offsets = [0, 0], sizes = [32, 128], strides = [1, 1]} : vector<32x384xf32> to vector<32x128xf32>
    %25 = arith.truncf %24 : vector<32x128xf32> to vector<32x128xbf16>
    %26 = vector.shape_cast %25 : vector<32x128xbf16> to vector<4x8x128xbf16>
    %27 = vector.extract_strided_slice %19 {offsets = [0, 128], sizes = [32, 128], strides = [1, 1]} : vector<32x384xf32> to vector<32x128xf32>
    %28 = arith.truncf %27 : vector<32x128xf32> to vector<32x128xbf16>
    %29 = vector.shape_cast %28 : vector<32x128xbf16> to vector<4x8x128xbf16>
    %30 = vector.extract_strided_slice %19 {offsets = [0, 256], sizes = [32, 128], strides = [1, 1]} : vector<32x384xf32> to vector<32x128xf32>
    %31 = arith.truncf %30 : vector<32x128xf32> to vector<32x128xbf16>
    %32 = vector.shape_cast %31 : vector<32x128xbf16> to vector<4x8x128xbf16>
    %33 = vector.extract_strided_slice %23 {offsets = [0, 0], sizes = [32, 128], strides = [1, 1]} : vector<32x384xf32> to vector<32x128xf32>
    %34 = arith.truncf %33 : vector<32x128xf32> to vector<32x128xbf16>
    %35 = vector.shape_cast %34 : vector<32x128xbf16> to vector<4x8x128xbf16>
    %36 = vector.extract_strided_slice %23 {offsets = [0, 128], sizes = [32, 128], strides = [1, 1]} : vector<32x384xf32> to vector<32x128xf32>
    %37 = arith.truncf %36 : vector<32x128xf32> to vector<32x128xbf16>
    %38 = vector.shape_cast %37 : vector<32x128xbf16> to vector<4x8x128xbf16>
    %39 = vector.extract_strided_slice %23 {offsets = [0, 256], sizes = [32, 128], strides = [1, 1]} : vector<32x384xf32> to vector<32x128xf32>
    %40 = arith.truncf %39 : vector<32x128xf32> to vector<32x128xbf16>
    %41 = vector.shape_cast %40 : vector<32x128xbf16> to vector<4x8x128xbf16>
    %42 = tpu.iota {dimensions = array<i32: 2>} : vector<1x1x128xi32>
    %cst_20 = arith.constant 0.000000e+00 : f32
    %43 = vector.broadcast %cst_20 : f32 to vector<4x8x128xf32>
    %c0_i32 = arith.constant 0 : i32
    %44 = vector.broadcast %c0_i32 : i32 to vector<1x1x128xi32>
    %45 = arith.cmpi sge, %42, %44 : vector<1x1x128xi32>
    %c32_i32 = arith.constant 32 : i32
    %46 = vector.broadcast %c32_i32 : i32 to vector<1x1x128xi32>
    %47 = arith.cmpi slt, %42, %46 : vector<1x1x128xi32>
    %48 = arith.andi %45, %47 : vector<1x1x128xi1>
    %cst_21 = arith.constant 0.000000e+00 : f32
    %49 = arith.truncf %cst_21 : f32 to bf16
    %50 = vector.shape_cast %48 : vector<1x1x128xi1> to vector<1x1x128xi1>
    %51 = vector.broadcast %50 : vector<1x1x128xi1> to vector<4x8x128xi1>
    %52 = vector.broadcast %49 : bf16 to vector<4x8x128xbf16>
    %53 = arith.select %51, %26, %52 : vector<4x8x128xi1>, vector<4x8x128xbf16>
    "tpu.trace_start"() <{level = 10 : i32, message = "bqe,bke->bqk"}> : () -> ()
    %cst_22 = arith.constant dense<0.000000e+00> : vector<4x8x8xf32>
    %54 = tpu.matmul %53, %38, %cst_22 {dimension_numbers = #tpu.dot_dimension_numbers<[2], [2], [1], [1], [0, 0, 0, 1, 1, 1], [0], [0]>} : vector<4x8x128xbf16>, vector<4x8x128xbf16>, vector<4x8x8xf32> -> vector<4x8x8xf32>
    "tpu.trace_stop"() : () -> ()
    %cst_23 = arith.constant dense<0xFF800000> : vector<4x8xf32>
    %55 = vector.multi_reduction <maximumf>, %54, %cst_23 [2] : vector<4x8x8xf32> to vector<4x8xf32>
    %56 = vector.shape_cast %55 : vector<4x8xf32> to vector<4x8x1xf32>
    %57 = vector.broadcast %56 : vector<4x8x1xf32> to vector<4x8x8xf32>
    %58 = arith.subf %54, %57 : vector<4x8x8xf32>
    %59 = math.exp %58 : vector<4x8x8xf32>
    %cst_24 = arith.constant dense<0.000000e+00> : vector<4x8xf32>
    %60 = vector.multi_reduction <add>, %59, %cst_24 [2] : vector<4x8x8xf32> to vector<4x8xf32>
    %61 = vector.shape_cast %60 : vector<4x8xf32> to vector<4x8x1xf32>
    %62 = tpu.reciprocal %61 {approx = true} : vector<4x8x1xf32> -> vector<4x8x1xf32>
    %63 = vector.broadcast %62 : vector<4x8x1xf32> to vector<4x8x8xf32>
    %64 = arith.mulf %59, %63 : vector<4x8x8xf32>
    %cst_25 = arith.constant 0.000000e+00 : f32
    %65 = arith.truncf %cst_25 : f32 to bf16
    %66 = vector.shape_cast %48 : vector<1x1x128xi1> to vector<1x1x128xi1>
    %67 = vector.broadcast %66 : vector<1x1x128xi1> to vector<4x8x128xi1>
    %68 = vector.broadcast %65 : bf16 to vector<4x8x128xbf16>
    %69 = arith.select %67, %41, %68 : vector<4x8x128xi1>, vector<4x8x128xbf16>
    %70 = arith.truncf %64 : vector<4x8x8xf32> to vector<4x8x8xbf16>
    "tpu.trace_start"() <{level = 10 : i32, message = "bqk,bke->bqe"}> : () -> ()
    %cst_26 = arith.constant dense<0.000000e+00> : vector<4x8x128xf32>
    %71 = tpu.matmul %70, %69, %cst_26 {dimension_numbers = #tpu.dot_dimension_numbers<[2], [1], [1], [2], [0, 0, 0, 1, 1, 2], [0], [0]>} : vector<4x8x8xbf16>, vector<4x8x128xbf16>, vector<4x8x128xf32> -> vector<4x8x128xf32>
    "tpu.trace_stop"() : () -> ()
    %72 = arith.addf %43, %71 : vector<4x8x128xf32>
    %c32_i32_27 = arith.constant 32 : i32
    %73 = vector.broadcast %c32_i32_27 : i32 to vector<1x1x128xi32>
    %74 = arith.cmpi sge, %42, %73 : vector<1x1x128xi32>
    %c64_i32 = arith.constant 64 : i32
    %75 = vector.broadcast %c64_i32 : i32 to vector<1x1x128xi32>
    %76 = arith.cmpi slt, %42, %75 : vector<1x1x128xi32>
    %77 = arith.andi %74, %76 : vector<1x1x128xi1>
    %cst_28 = arith.constant 0.000000e+00 : f32
    %78 = arith.truncf %cst_28 : f32 to bf16
    %79 = vector.shape_cast %77 : vector<1x1x128xi1> to vector<1x1x128xi1>
    %80 = vector.broadcast %79 : vector<1x1x128xi1> to vector<4x8x128xi1>
    %81 = vector.broadcast %78 : bf16 to vector<4x8x128xbf16>
    %82 = arith.select %80, %26, %81 : vector<4x8x128xi1>, vector<4x8x128xbf16>
    "tpu.trace_start"() <{level = 10 : i32, message = "bqe,bke->bqk"}> : () -> ()
    %cst_29 = arith.constant dense<0.000000e+00> : vector<4x8x8xf32>
    %83 = tpu.matmul %82, %38, %cst_29 {dimension_numbers = #tpu.dot_dimension_numbers<[2], [2], [1], [1], [0, 0, 0, 1, 1, 1], [0], [0]>} : vector<4x8x128xbf16>, vector<4x8x128xbf16>, vector<4x8x8xf32> -> vector<4x8x8xf32>
    "tpu.trace_stop"() : () -> ()
    %cst_30 = arith.constant dense<0xFF800000> : vector<4x8xf32>
    %84 = vector.multi_reduction <maximumf>, %83, %cst_30 [2] : vector<4x8x8xf32> to vector<4x8xf32>
    %85 = vector.shape_cast %84 : vector<4x8xf32> to vector<4x8x1xf32>
    %86 = vector.broadcast %85 : vector<4x8x1xf32> to vector<4x8x8xf32>
    %87 = arith.subf %83, %86 : vector<4x8x8xf32>
    %88 = math.exp %87 : vector<4x8x8xf32>
    %cst_31 = arith.constant dense<0.000000e+00> : vector<4x8xf32>
    %89 = vector.multi_reduction <add>, %88, %cst_31 [2] : vector<4x8x8xf32> to vector<4x8xf32>
    %90 = vector.shape_cast %89 : vector<4x8xf32> to vector<4x8x1xf32>
    %91 = tpu.reciprocal %90 {approx = true} : vector<4x8x1xf32> -> vector<4x8x1xf32>
    %92 = vector.broadcast %91 : vector<4x8x1xf32> to vector<4x8x8xf32>
    %93 = arith.mulf %88, %92 : vector<4x8x8xf32>
    %cst_32 = arith.constant 0.000000e+00 : f32
    %94 = arith.truncf %cst_32 : f32 to bf16
    %95 = vector.shape_cast %77 : vector<1x1x128xi1> to vector<1x1x128xi1>
    %96 = vector.broadcast %95 : vector<1x1x128xi1> to vector<4x8x128xi1>
    %97 = vector.broadcast %94 : bf16 to vector<4x8x128xbf16>
    %98 = arith.select %96, %41, %97 : vector<4x8x128xi1>, vector<4x8x128xbf16>
    %99 = arith.truncf %93 : vector<4x8x8xf32> to vector<4x8x8xbf16>
    "tpu.trace_start"() <{level = 10 : i32, message = "bqk,bke->bqe"}> : () -> ()
    %cst_33 = arith.constant dense<0.000000e+00> : vector<4x8x128xf32>
    %100 = tpu.matmul %99, %98, %cst_33 {dimension_numbers = #tpu.dot_dimension_numbers<[2], [1], [1], [2], [0, 0, 0, 1, 1, 2], [0], [0]>} : vector<4x8x8xbf16>, vector<4x8x128xbf16>, vector<4x8x128xf32> -> vector<4x8x128xf32>
    "tpu.trace_stop"() : () -> ()
    %101 = arith.addf %72, %100 : vector<4x8x128xf32>
    %c64_i32_34 = arith.constant 64 : i32
    %102 = vector.broadcast %c64_i32_34 : i32 to vector<1x1x128xi32>
    %103 = arith.cmpi sge, %42, %102 : vector<1x1x128xi32>
    %c96_i32 = arith.constant 96 : i32
    %104 = vector.broadcast %c96_i32 : i32 to vector<1x1x128xi32>
    %105 = arith.cmpi slt, %42, %104 : vector<1x1x128xi32>
    %106 = arith.andi %103, %105 : vector<1x1x128xi1>
    %cst_35 = arith.constant 0.000000e+00 : f32
    %107 = arith.truncf %cst_35 : f32 to bf16
    %108 = vector.shape_cast %106 : vector<1x1x128xi1> to vector<1x1x128xi1>
    %109 = vector.broadcast %108 : vector<1x1x128xi1> to vector<4x8x128xi1>
    %110 = vector.broadcast %107 : bf16 to vector<4x8x128xbf16>
    %111 = arith.select %109, %26, %110 : vector<4x8x128xi1>, vector<4x8x128xbf16>
    "tpu.trace_start"() <{level = 10 : i32, message = "bqe,bke->bqk"}> : () -> ()
    %cst_36 = arith.constant dense<0.000000e+00> : vector<4x8x8xf32>
    %112 = tpu.matmul %111, %38, %cst_36 {dimension_numbers = #tpu.dot_dimension_numbers<[2], [2], [1], [1], [0, 0, 0, 1, 1, 1], [0], [0]>} : vector<4x8x128xbf16>, vector<4x8x128xbf16>, vector<4x8x8xf32> -> vector<4x8x8xf32>
    "tpu.trace_stop"() : () -> ()
    %cst_37 = arith.constant dense<0xFF800000> : vector<4x8xf32>
    %113 = vector.multi_reduction <maximumf>, %112, %cst_37 [2] : vector<4x8x8xf32> to vector<4x8xf32>
    %114 = vector.shape_cast %113 : vector<4x8xf32> to vector<4x8x1xf32>
    %115 = vector.broadcast %114 : vector<4x8x1xf32> to vector<4x8x8xf32>
    %116 = arith.subf %112, %115 : vector<4x8x8xf32>
    %117 = math.exp %116 : vector<4x8x8xf32>
    %cst_38 = arith.constant dense<0.000000e+00> : vector<4x8xf32>
    %118 = vector.multi_reduction <add>, %117, %cst_38 [2] : vector<4x8x8xf32> to vector<4x8xf32>
    %119 = vector.shape_cast %118 : vector<4x8xf32> to vector<4x8x1xf32>
    %120 = tpu.reciprocal %119 {approx = true} : vector<4x8x1xf32> -> vector<4x8x1xf32>
    %121 = vector.broadcast %120 : vector<4x8x1xf32> to vector<4x8x8xf32>
    %122 = arith.mulf %117, %121 : vector<4x8x8xf32>
    %cst_39 = arith.constant 0.000000e+00 : f32
    %123 = arith.truncf %cst_39 : f32 to bf16
    %124 = vector.shape_cast %106 : vector<1x1x128xi1> to vector<1x1x128xi1>
    %125 = vector.broadcast %124 : vector<1x1x128xi1> to vector<4x8x128xi1>
    %126 = vector.broadcast %123 : bf16 to vector<4x8x128xbf16>
    %127 = arith.select %125, %41, %126 : vector<4x8x128xi1>, vector<4x8x128xbf16>
    %128 = arith.truncf %122 : vector<4x8x8xf32> to vector<4x8x8xbf16>
    "tpu.trace_start"() <{level = 10 : i32, message = "bqk,bke->bqe"}> : () -> ()
    %cst_40 = arith.constant dense<0.000000e+00> : vector<4x8x128xf32>
    %129 = tpu.matmul %128, %127, %cst_40 {dimension_numbers = #tpu.dot_dimension_numbers<[2], [1], [1], [2], [0, 0, 0, 1, 1, 2], [0], [0]>} : vector<4x8x8xbf16>, vector<4x8x128xbf16>, vector<4x8x128xf32> -> vector<4x8x128xf32>
    "tpu.trace_stop"() : () -> ()
    %130 = arith.addf %101, %129 : vector<4x8x128xf32>
    %c96_i32_41 = arith.constant 96 : i32
    %131 = vector.broadcast %c96_i32_41 : i32 to vector<1x1x128xi32>
    %132 = arith.cmpi sge, %42, %131 : vector<1x1x128xi32>
    %c128_i32 = arith.constant 128 : i32
    %133 = vector.broadcast %c128_i32 : i32 to vector<1x1x128xi32>
    %134 = arith.cmpi slt, %42, %133 : vector<1x1x128xi32>
    %135 = arith.andi %132, %134 : vector<1x1x128xi1>
    %cst_42 = arith.constant 0.000000e+00 : f32
    %136 = arith.truncf %cst_42 : f32 to bf16
    %137 = vector.shape_cast %135 : vector<1x1x128xi1> to vector<1x1x128xi1>
    %138 = vector.broadcast %137 : vector<1x1x128xi1> to vector<4x8x128xi1>
    %139 = vector.broadcast %136 : bf16 to vector<4x8x128xbf16>
    %140 = arith.select %138, %26, %139 : vector<4x8x128xi1>, vector<4x8x128xbf16>
    "tpu.trace_start"() <{level = 10 : i32, message = "bqe,bke->bqk"}> : () -> ()
    %cst_43 = arith.constant dense<0.000000e+00> : vector<4x8x8xf32>
    %141 = tpu.matmul %140, %38, %cst_43 {dimension_numbers = #tpu.dot_dimension_numbers<[2], [2], [1], [1], [0, 0, 0, 1, 1, 1], [0], [0]>} : vector<4x8x128xbf16>, vector<4x8x128xbf16>, vector<4x8x8xf32> -> vector<4x8x8xf32>
    "tpu.trace_stop"() : () -> ()
    %cst_44 = arith.constant dense<0xFF800000> : vector<4x8xf32>
    %142 = vector.multi_reduction <maximumf>, %141, %cst_44 [2] : vector<4x8x8xf32> to vector<4x8xf32>
    %143 = vector.shape_cast %142 : vector<4x8xf32> to vector<4x8x1xf32>
    %144 = vector.broadcast %143 : vector<4x8x1xf32> to vector<4x8x8xf32>
    %145 = arith.subf %141, %144 : vector<4x8x8xf32>
    %146 = math.exp %145 : vector<4x8x8xf32>
    %cst_45 = arith.constant dense<0.000000e+00> : vector<4x8xf32>
    %147 = vector.multi_reduction <add>, %146, %cst_45 [2] : vector<4x8x8xf32> to vector<4x8xf32>
    %148 = vector.shape_cast %147 : vector<4x8xf32> to vector<4x8x1xf32>
    %149 = tpu.reciprocal %148 {approx = true} : vector<4x8x1xf32> -> vector<4x8x1xf32>
    %150 = vector.broadcast %149 : vector<4x8x1xf32> to vector<4x8x8xf32>
    %151 = arith.mulf %146, %150 : vector<4x8x8xf32>
    %cst_46 = arith.constant 0.000000e+00 : f32
    %152 = arith.truncf %cst_46 : f32 to bf16
    %153 = vector.shape_cast %135 : vector<1x1x128xi1> to vector<1x1x128xi1>
    %154 = vector.broadcast %153 : vector<1x1x128xi1> to vector<4x8x128xi1>
    %155 = vector.broadcast %152 : bf16 to vector<4x8x128xbf16>
    %156 = arith.select %154, %41, %155 : vector<4x8x128xi1>, vector<4x8x128xbf16>
    %157 = arith.truncf %151 : vector<4x8x8xf32> to vector<4x8x8xbf16>
    "tpu.trace_start"() <{level = 10 : i32, message = "bqk,bke->bqe"}> : () -> ()
    %cst_47 = arith.constant dense<0.000000e+00> : vector<4x8x128xf32>
    %158 = tpu.matmul %157, %156, %cst_47 {dimension_numbers = #tpu.dot_dimension_numbers<[2], [1], [1], [2], [0, 0, 0, 1, 1, 2], [0], [0]>} : vector<4x8x8xbf16>, vector<4x8x128xbf16>, vector<4x8x128xf32> -> vector<4x8x128xf32>
    "tpu.trace_stop"() : () -> ()
    %159 = arith.addf %130, %158 : vector<4x8x128xf32>
    %cst_48 = arith.constant 0.000000e+00 : f32
    %160 = vector.broadcast %cst_48 : f32 to vector<4x8x128xf32>
    %c0_i32_49 = arith.constant 0 : i32
    %161 = vector.broadcast %c0_i32_49 : i32 to vector<1x1x128xi32>
    %162 = arith.cmpi sge, %42, %161 : vector<1x1x128xi32>
    %c32_i32_50 = arith.constant 32 : i32
    %163 = vector.broadcast %c32_i32_50 : i32 to vector<1x1x128xi32>
    %164 = arith.cmpi slt, %42, %163 : vector<1x1x128xi32>
    %165 = arith.andi %162, %164 : vector<1x1x128xi1>
    %cst_51 = arith.constant 0.000000e+00 : f32
    %166 = arith.truncf %cst_51 : f32 to bf16
    %167 = vector.shape_cast %165 : vector<1x1x128xi1> to vector<1x1x128xi1>
    %168 = vector.broadcast %167 : vector<1x1x128xi1> to vector<4x8x128xi1>
    %169 = vector.broadcast %166 : bf16 to vector<4x8x128xbf16>
    %170 = arith.select %168, %35, %169 : vector<4x8x128xi1>, vector<4x8x128xbf16>
    "tpu.trace_start"() <{level = 10 : i32, message = "bqe,bke->bqk"}> : () -> ()
    %cst_52 = arith.constant dense<0.000000e+00> : vector<4x8x8xf32>
    %171 = tpu.matmul %170, %29, %cst_52 {dimension_numbers = #tpu.dot_dimension_numbers<[2], [2], [1], [1], [0, 0, 0, 1, 1, 1], [0], [0]>} : vector<4x8x128xbf16>, vector<4x8x128xbf16>, vector<4x8x8xf32> -> vector<4x8x8xf32>
    "tpu.trace_stop"() : () -> ()
    %cst_53 = arith.constant dense<0xFF800000> : vector<4x8xf32>
    %172 = vector.multi_reduction <maximumf>, %171, %cst_53 [2] : vector<4x8x8xf32> to vector<4x8xf32>
    %173 = vector.shape_cast %172 : vector<4x8xf32> to vector<4x8x1xf32>
    %174 = vector.broadcast %173 : vector<4x8x1xf32> to vector<4x8x8xf32>
    %175 = arith.subf %171, %174 : vector<4x8x8xf32>
    %176 = math.exp %175 : vector<4x8x8xf32>
    %cst_54 = arith.constant dense<0.000000e+00> : vector<4x8xf32>
    %177 = vector.multi_reduction <add>, %176, %cst_54 [2] : vector<4x8x8xf32> to vector<4x8xf32>
    %178 = vector.shape_cast %177 : vector<4x8xf32> to vector<4x8x1xf32>
    %179 = tpu.reciprocal %178 {approx = true} : vector<4x8x1xf32> -> vector<4x8x1xf32>
    %180 = vector.broadcast %179 : vector<4x8x1xf32> to vector<4x8x8xf32>
    %181 = arith.mulf %176, %180 : vector<4x8x8xf32>
    %cst_55 = arith.constant 0.000000e+00 : f32
    %182 = arith.truncf %cst_55 : f32 to bf16
    %183 = vector.shape_cast %165 : vector<1x1x128xi1> to vector<1x1x128xi1>
    %184 = vector.broadcast %183 : vector<1x1x128xi1> to vector<4x8x128xi1>
    %185 = vector.broadcast %182 : bf16 to vector<4x8x128xbf16>
    %186 = arith.select %184, %32, %185 : vector<4x8x128xi1>, vector<4x8x128xbf16>
    %187 = arith.truncf %181 : vector<4x8x8xf32> to vector<4x8x8xbf16>
    "tpu.trace_start"() <{level = 10 : i32, message = "bqk,bke->bqe"}> : () -> ()
    %cst_56 = arith.constant dense<0.000000e+00> : vector<4x8x128xf32>
    %188 = tpu.matmul %187, %186, %cst_56 {dimension_numbers = #tpu.dot_dimension_numbers<[2], [1], [1], [2], [0, 0, 0, 1, 1, 2], [0], [0]>} : vector<4x8x8xbf16>, vector<4x8x128xbf16>, vector<4x8x128xf32> -> vector<4x8x128xf32>
    "tpu.trace_stop"() : () -> ()
    %189 = arith.addf %160, %188 : vector<4x8x128xf32>
    %c32_i32_57 = arith.constant 32 : i32
    %190 = vector.broadcast %c32_i32_57 : i32 to vector<1x1x128xi32>
    %191 = arith.cmpi sge, %42, %190 : vector<1x1x128xi32>
    %c64_i32_58 = arith.constant 64 : i32
    %192 = vector.broadcast %c64_i32_58 : i32 to vector<1x1x128xi32>
    %193 = arith.cmpi slt, %42, %192 : vector<1x1x128xi32>
    %194 = arith.andi %191, %193 : vector<1x1x128xi1>
    %cst_59 = arith.constant 0.000000e+00 : f32
    %195 = arith.truncf %cst_59 : f32 to bf16
    %196 = vector.shape_cast %194 : vector<1x1x128xi1> to vector<1x1x128xi1>
    %197 = vector.broadcast %196 : vector<1x1x128xi1> to vector<4x8x128xi1>
    %198 = vector.broadcast %195 : bf16 to vector<4x8x128xbf16>
    %199 = arith.select %197, %35, %198 : vector<4x8x128xi1>, vector<4x8x128xbf16>
    "tpu.trace_start"() <{level = 10 : i32, message = "bqe,bke->bqk"}> : () -> ()
    %cst_60 = arith.constant dense<0.000000e+00> : vector<4x8x8xf32>
    %200 = tpu.matmul %199, %29, %cst_60 {dimension_numbers = #tpu.dot_dimension_numbers<[2], [2], [1], [1], [0, 0, 0, 1, 1, 1], [0], [0]>} : vector<4x8x128xbf16>, vector<4x8x128xbf16>, vector<4x8x8xf32> -> vector<4x8x8xf32>
    "tpu.trace_stop"() : () -> ()
    %cst_61 = arith.constant dense<0xFF800000> : vector<4x8xf32>
    %201 = vector.multi_reduction <maximumf>, %200, %cst_61 [2] : vector<4x8x8xf32> to vector<4x8xf32>
    %202 = vector.shape_cast %201 : vector<4x8xf32> to vector<4x8x1xf32>
    %203 = vector.broadcast %202 : vector<4x8x1xf32> to vector<4x8x8xf32>
    %204 = arith.subf %200, %203 : vector<4x8x8xf32>
    %205 = math.exp %204 : vector<4x8x8xf32>
    %cst_62 = arith.constant dense<0.000000e+00> : vector<4x8xf32>
    %206 = vector.multi_reduction <add>, %205, %cst_62 [2] : vector<4x8x8xf32> to vector<4x8xf32>
    %207 = vector.shape_cast %206 : vector<4x8xf32> to vector<4x8x1xf32>
    %208 = tpu.reciprocal %207 {approx = true} : vector<4x8x1xf32> -> vector<4x8x1xf32>
    %209 = vector.broadcast %208 : vector<4x8x1xf32> to vector<4x8x8xf32>
    %210 = arith.mulf %205, %209 : vector<4x8x8xf32>
    %cst_63 = arith.constant 0.000000e+00 : f32
    %211 = arith.truncf %cst_63 : f32 to bf16
    %212 = vector.shape_cast %194 : vector<1x1x128xi1> to vector<1x1x128xi1>
    %213 = vector.broadcast %212 : vector<1x1x128xi1> to vector<4x8x128xi1>
    %214 = vector.broadcast %211 : bf16 to vector<4x8x128xbf16>
    %215 = arith.select %213, %32, %214 : vector<4x8x128xi1>, vector<4x8x128xbf16>
    %216 = arith.truncf %210 : vector<4x8x8xf32> to vector<4x8x8xbf16>
    "tpu.trace_start"() <{level = 10 : i32, message = "bqk,bke->bqe"}> : () -> ()
    %cst_64 = arith.constant dense<0.000000e+00> : vector<4x8x128xf32>
    %217 = tpu.matmul %216, %215, %cst_64 {dimension_numbers = #tpu.dot_dimension_numbers<[2], [1], [1], [2], [0, 0, 0, 1, 1, 2], [0], [0]>} : vector<4x8x8xbf16>, vector<4x8x128xbf16>, vector<4x8x128xf32> -> vector<4x8x128xf32>
    "tpu.trace_stop"() : () -> ()
    %218 = arith.addf %189, %217 : vector<4x8x128xf32>
    %c64_i32_65 = arith.constant 64 : i32
    %219 = vector.broadcast %c64_i32_65 : i32 to vector<1x1x128xi32>
    %220 = arith.cmpi sge, %42, %219 : vector<1x1x128xi32>
    %c96_i32_66 = arith.constant 96 : i32
    %221 = vector.broadcast %c96_i32_66 : i32 to vector<1x1x128xi32>
    %222 = arith.cmpi slt, %42, %221 : vector<1x1x128xi32>
    %223 = arith.andi %220, %222 : vector<1x1x128xi1>
    %cst_67 = arith.constant 0.000000e+00 : f32
    %224 = arith.truncf %cst_67 : f32 to bf16
    %225 = vector.shape_cast %223 : vector<1x1x128xi1> to vector<1x1x128xi1>
    %226 = vector.broadcast %225 : vector<1x1x128xi1> to vector<4x8x128xi1>
    %227 = vector.broadcast %224 : bf16 to vector<4x8x128xbf16>
    %228 = arith.select %226, %35, %227 : vector<4x8x128xi1>, vector<4x8x128xbf16>
    "tpu.trace_start"() <{level = 10 : i32, message = "bqe,bke->bqk"}> : () -> ()
    %cst_68 = arith.constant dense<0.000000e+00> : vector<4x8x8xf32>
    %229 = tpu.matmul %228, %29, %cst_68 {dimension_numbers = #tpu.dot_dimension_numbers<[2], [2], [1], [1], [0, 0, 0, 1, 1, 1], [0], [0]>} : vector<4x8x128xbf16>, vector<4x8x128xbf16>, vector<4x8x8xf32> -> vector<4x8x8xf32>
    "tpu.trace_stop"() : () -> ()
    %cst_69 = arith.constant dense<0xFF800000> : vector<4x8xf32>
    %230 = vector.multi_reduction <maximumf>, %229, %cst_69 [2] : vector<4x8x8xf32> to vector<4x8xf32>
    %231 = vector.shape_cast %230 : vector<4x8xf32> to vector<4x8x1xf32>
    %232 = vector.broadcast %231 : vector<4x8x1xf32> to vector<4x8x8xf32>
    %233 = arith.subf %229, %232 : vector<4x8x8xf32>
    %234 = math.exp %233 : vector<4x8x8xf32>
    %cst_70 = arith.constant dense<0.000000e+00> : vector<4x8xf32>
    %235 = vector.multi_reduction <add>, %234, %cst_70 [2] : vector<4x8x8xf32> to vector<4x8xf32>
    %236 = vector.shape_cast %235 : vector<4x8xf32> to vector<4x8x1xf32>
    %237 = tpu.reciprocal %236 {approx = true} : vector<4x8x1xf32> -> vector<4x8x1xf32>
    %238 = vector.broadcast %237 : vector<4x8x1xf32> to vector<4x8x8xf32>
    %239 = arith.mulf %234, %238 : vector<4x8x8xf32>
    %cst_71 = arith.constant 0.000000e+00 : f32
    %240 = arith.truncf %cst_71 : f32 to bf16
    %241 = vector.shape_cast %223 : vector<1x1x128xi1> to vector<1x1x128xi1>
    %242 = vector.broadcast %241 : vector<1x1x128xi1> to vector<4x8x128xi1>
    %243 = vector.broadcast %240 : bf16 to vector<4x8x128xbf16>
    %244 = arith.select %242, %32, %243 : vector<4x8x128xi1>, vector<4x8x128xbf16>
    %245 = arith.truncf %239 : vector<4x8x8xf32> to vector<4x8x8xbf16>
    "tpu.trace_start"() <{level = 10 : i32, message = "bqk,bke->bqe"}> : () -> ()
    %cst_72 = arith.constant dense<0.000000e+00> : vector<4x8x128xf32>
    %246 = tpu.matmul %245, %244, %cst_72 {dimension_numbers = #tpu.dot_dimension_numbers<[2], [1], [1], [2], [0, 0, 0, 1, 1, 2], [0], [0]>} : vector<4x8x8xbf16>, vector<4x8x128xbf16>, vector<4x8x128xf32> -> vector<4x8x128xf32>
    "tpu.trace_stop"() : () -> ()
    %247 = arith.addf %218, %246 : vector<4x8x128xf32>
    %c96_i32_73 = arith.constant 96 : i32
    %248 = vector.broadcast %c96_i32_73 : i32 to vector<1x1x128xi32>
    %249 = arith.cmpi sge, %42, %248 : vector<1x1x128xi32>
    %c128_i32_74 = arith.constant 128 : i32
    %250 = vector.broadcast %c128_i32_74 : i32 to vector<1x1x128xi32>
    %251 = arith.cmpi slt, %42, %250 : vector<1x1x128xi32>
    %252 = arith.andi %249, %251 : vector<1x1x128xi1>
    %cst_75 = arith.constant 0.000000e+00 : f32
    %253 = arith.truncf %cst_75 : f32 to bf16
    %254 = vector.shape_cast %252 : vector<1x1x128xi1> to vector<1x1x128xi1>
    %255 = vector.broadcast %254 : vector<1x1x128xi1> to vector<4x8x128xi1>
    %256 = vector.broadcast %253 : bf16 to vector<4x8x128xbf16>
    %257 = arith.select %255, %35, %256 : vector<4x8x128xi1>, vector<4x8x128xbf16>
    "tpu.trace_start"() <{level = 10 : i32, message = "bqe,bke->bqk"}> : () -> ()
    %cst_76 = arith.constant dense<0.000000e+00> : vector<4x8x8xf32>
    %258 = tpu.matmul %257, %29, %cst_76 {dimension_numbers = #tpu.dot_dimension_numbers<[2], [2], [1], [1], [0, 0, 0, 1, 1, 1], [0], [0]>} : vector<4x8x128xbf16>, vector<4x8x128xbf16>, vector<4x8x8xf32> -> vector<4x8x8xf32>
    "tpu.trace_stop"() : () -> ()
    %cst_77 = arith.constant dense<0xFF800000> : vector<4x8xf32>
    %259 = vector.multi_reduction <maximumf>, %258, %cst_77 [2] : vector<4x8x8xf32> to vector<4x8xf32>
    %260 = vector.shape_cast %259 : vector<4x8xf32> to vector<4x8x1xf32>
    %261 = vector.broadcast %260 : vector<4x8x1xf32> to vector<4x8x8xf32>
    %262 = arith.subf %258, %261 : vector<4x8x8xf32>
    %263 = math.exp %262 : vector<4x8x8xf32>
    %cst_78 = arith.constant dense<0.000000e+00> : vector<4x8xf32>
    %264 = vector.multi_reduction <add>, %263, %cst_78 [2] : vector<4x8x8xf32> to vector<4x8xf32>
    %265 = vector.shape_cast %264 : vector<4x8xf32> to vector<4x8x1xf32>
    %266 = tpu.reciprocal %265 {approx = true} : vector<4x8x1xf32> -> vector<4x8x1xf32>
    %267 = vector.broadcast %266 : vector<4x8x1xf32> to vector<4x8x8xf32>
    %268 = arith.mulf %263, %267 : vector<4x8x8xf32>
    %cst_79 = arith.constant 0.000000e+00 : f32
    %269 = arith.truncf %cst_79 : f32 to bf16
    %270 = vector.shape_cast %252 : vector<1x1x128xi1> to vector<1x1x128xi1>
    %271 = vector.broadcast %270 : vector<1x1x128xi1> to vector<4x8x128xi1>
    %272 = vector.broadcast %269 : bf16 to vector<4x8x128xbf16>
    %273 = arith.select %271, %32, %272 : vector<4x8x128xi1>, vector<4x8x128xbf16>
    %274 = arith.truncf %268 : vector<4x8x8xf32> to vector<4x8x8xbf16>
    "tpu.trace_start"() <{level = 10 : i32, message = "bqk,bke->bqe"}> : () -> ()
    %cst_80 = arith.constant dense<0.000000e+00> : vector<4x8x128xf32>
    %275 = tpu.matmul %274, %273, %cst_80 {dimension_numbers = #tpu.dot_dimension_numbers<[2], [1], [1], [2], [0, 0, 0, 1, 1, 2], [0], [0]>} : vector<4x8x8xbf16>, vector<4x8x128xbf16>, vector<4x8x128xf32> -> vector<4x8x128xf32>
    "tpu.trace_stop"() : () -> ()
    %276 = arith.addf %247, %275 : vector<4x8x128xf32>
    %277 = vector.shape_cast %159 : vector<4x8x128xf32> to vector<32x128xf32>
    %278 = arith.truncf %277 : vector<32x128xf32> to vector<32x128xbf16>
    %c0_81 = arith.constant 0 : index
    %c768 = arith.constant 768 : index
    %279 = vector.load %arg4[%c0_81, %c768] : memref<128x1024xbf16, #tpu.memory_space<vmem>>, vector<128x128xbf16>
    %cst_82 = arith.constant dense<0.000000e+00> : vector<32x128xf32>
    %280 = tpu.matmul %278, %279, %cst_82 {dimension_numbers = #tpu.dot_dimension_numbers<[1], [0], [0], [1], [0, 0, 1, 1], [], []>} : vector<32x128xbf16>, vector<128x128xbf16>, vector<32x128xf32> -> vector<32x128xf32>
    %281 = vector.broadcast %3 : vector<1x128xf32> to vector<32x128xf32>
    %282 = arith.addf %280, %281 : vector<32x128xf32>
    %283 = vector.shape_cast %276 : vector<4x8x128xf32> to vector<32x128xf32>
    %284 = arith.truncf %283 : vector<32x128xf32> to vector<32x128xbf16>
    %c0_83 = arith.constant 0 : index
    %c896_84 = arith.constant 896 : index
    %285 = vector.load %arg4[%c0_83, %c896_84] : memref<128x1024xbf16, #tpu.memory_space<vmem>>, vector<128x128xbf16>
    %cst_85 = arith.constant dense<0.000000e+00> : vector<32x128xf32>
    %286 = tpu.matmul %284, %285, %cst_85 {dimension_numbers = #tpu.dot_dimension_numbers<[1], [0], [0], [1], [0, 0, 1, 1], [], []>} : vector<32x128xbf16>, vector<128x128xbf16>, vector<32x128xf32> -> vector<32x128xf32>
    %287 = vector.broadcast %4 : vector<1x128xf32> to vector<32x128xf32>
    %288 = arith.addf %286, %287 : vector<32x128xf32>
    %289 = vector.shape_cast %282 : vector<32x128xf32> to vector<4x8x128xf32>
    %cst_86 = arith.constant dense<0.000000e+00> : vector<4x128xf32>
    %290 = vector.multi_reduction <add>, %289, %cst_86 [1] : vector<4x8x128xf32> to vector<4x128xf32>
    %cst_87 = arith.constant 8.000000e+00 : f32
    %291 = vector.broadcast %cst_87 : f32 to vector<4x128xf32>
    %292 = arith.divf %290, %291 : vector<4x128xf32>
    %293 = vector.shape_cast %288 : vector<32x128xf32> to vector<4x8x128xf32>
    %cst_88 = arith.constant dense<0.000000e+00> : vector<4x128xf32>
    %294 = vector.multi_reduction <add>, %293, %cst_88 [1] : vector<4x8x128xf32> to vector<4x128xf32>
    %cst_89 = arith.constant 8.000000e+00 : f32
    %295 = vector.broadcast %cst_89 : f32 to vector<4x128xf32>
    %296 = arith.divf %294, %295 : vector<4x128xf32>
    %297 = arith.addf %292, %296 : vector<4x128xf32>
    %cst_90 = arith.constant 5.000000e-01 : f32
    %298 = vector.broadcast %cst_90 : f32 to vector<4x128xf32>
    %299 = arith.mulf %298, %297 : vector<4x128xf32>
    %300 = arith.subf %292, %296 : vector<4x128xf32>
    %301 = math.absf %300 : vector<4x128xf32>
    %cst_91 = arith.constant 0.707106769 : f32
    %302 = vector.broadcast %cst_91 : f32 to vector<4x128xf32>
    %303 = arith.mulf %301, %302 : vector<4x128xf32>
    %304 = tpu.concatenate %299, %303 in 1 : vector<4x128xf32>, vector<4x128xf32> -> vector<4x256xf32>
    %305 = arith.truncf %304 : vector<4x256xf32> to vector<4x256xbf16>
    %c0_92 = arith.constant 0 : index
    %c0_93 = arith.constant 0 : index
    %306 = vector.load %arg5[%c0_92, %c0_93] : memref<256x128xbf16, #tpu.memory_space<vmem>>, vector<256x128xbf16>
    %cst_94 = arith.constant dense<0.000000e+00> : vector<4x128xf32>
    %307 = tpu.matmul %305, %306, %cst_94 {dimension_numbers = #tpu.dot_dimension_numbers<[1], [0], [0], [1], [0, 0, 1, 1], [], []>} : vector<4x256xbf16>, vector<256x128xbf16>, vector<4x128xf32> -> vector<4x128xf32>
    %308 = vector.broadcast %5 : vector<1x128xf32> to vector<4x128xf32>
    %309 = arith.addf %307, %308 : vector<4x128xf32>
    %310 = arith.truncf %309 : vector<4x128xf32> to vector<4x128xbf16>
    %c0_95 = arith.constant 0 : index
    %c0_96 = arith.constant 0 : index
    %311 = vector.load %arg6[%c0_95, %c0_96] : memref<128x128xbf16, #tpu.memory_space<vmem>>, vector<128x128xbf16>
    %cst_97 = arith.constant dense<0.000000e+00> : vector<4x128xf32>
    %312 = tpu.matmul %310, %311, %cst_97 {dimension_numbers = #tpu.dot_dimension_numbers<[1], [0], [0], [1], [0, 0, 1, 1], [], []>} : vector<4x128xbf16>, vector<128x128xbf16>, vector<4x128xf32> -> vector<4x128xf32>
    %313 = vector.broadcast %6 : vector<1x128xf32> to vector<4x128xf32>
    %314 = arith.addf %312, %313 : vector<4x128xf32>
    %315 = arith.addf %309, %314 : vector<4x128xf32>
    %c0_98 = arith.constant 0 : index
    %c0_99 = arith.constant 0 : index
    %c0_100 = arith.constant 0 : index
    %316 = vector.load %arg8[%c0_98, %c0_99, %c0_100] : memref<1x4x128xf32, #tpu.memory_space<vmem>>, vector<1x4x128xf32>
    %317 = vector.shape_cast %316 : vector<1x4x128xf32> to vector<4x128xf32>
    %318 = vector.shape_cast %315 : vector<4x128xf32> to vector<1x4x128xf32>
    tpu.vector_store %arg8[%c0_98, %c0_99, %c0_100], %318 {strides = array<i32>} : memref<1x4x128xf32, #tpu.memory_space<vmem>>, vector<1x4x128xf32>,
    return
  }
  func.func @transform_0(%arg0: i32) -> (i32, i32, i32) {
    %c0_i32 = arith.constant 0 : i32
    %c0_i32_0 = arith.constant 0 : i32
    %c0_i32_1 = arith.constant 0 : i32
    return %arg0, %c0_i32, %c0_i32_0 : i32, i32, i32
  }
  func.func @transform_1(%arg0: i32) -> (i32, i32, i32) {
    %c0_i32 = arith.constant 0 : i32
    %c0_i32_0 = arith.constant 0 : i32
    %c0_i32_1 = arith.constant 0 : i32
    return %arg0, %c0_i32, %c0_i32_0 : i32, i32, i32
  }
  func.func @transform_2(%arg0: i32) -> (i32, i32) {
    %c0_i32 = arith.constant 0 : i32
    %c0_i32_0 = arith.constant 0 : i32
    %c0_i32_1 = arith.constant 0 : i32
    return %c0_i32, %c0_i32_0 : i32, i32
  }
  func.func @transform_3(%arg0: i32) -> (i32, i32) {
    %c0_i32 = arith.constant 0 : i32
    %c0_i32_0 = arith.constant 0 : i32
    %c0_i32_1 = arith.constant 0 : i32
    return %c0_i32, %c0_i32_0 : i32, i32
  }
  func.func @transform_4(%arg0: i32) -> (i32, i32) {
    %c0_i32 = arith.constant 0 : i32
    %c0_i32_0 = arith.constant 0 : i32
    %c0_i32_1 = arith.constant 0 : i32
    return %c0_i32, %c0_i32_0 : i32, i32
  }
  func.func @transform_5(%arg0: i32) -> (i32, i32) {
    %c0_i32 = arith.constant 0 : i32
    %c0_i32_0 = arith.constant 0 : i32
    %c0_i32_1 = arith.constant 0 : i32
    return %c0_i32, %c0_i32_0 : i32, i32
  }
  func.func @transform_6(%arg0: i32) -> (i32, i32) {
    %c0_i32 = arith.constant 0 : i32
    %c0_i32_0 = arith.constant 0 : i32
    %c0_i32_1 = arith.constant 0 : i32
    return %c0_i32, %c0_i32_0 : i32, i32
  }
  func.func @transform_7(%arg0: i32) -> (i32, i32, i32) {
    %c0_i32 = arith.constant 0 : i32
    %c0_i32_0 = arith.constant 0 : i32
    %c0_i32_1 = arith.constant 0 : i32
    return %arg0, %c0_i32, %c0_i32_0 : i32, i32, i32
  }
}

</mosaic_0001>

<bundles_post_ra>
// kernel: tpu_custom_call.1
= control target key start
LH: loop header
LB: loop body
LE: loop exit
PB: predicated region body
PF: predicated region fallthrough
CT: control target
= control target key end

     0   :  { %s8065_s0 = inlined_call_operand.hbm [shape: bf16[8,8,256], index: 0, kind: input, shape index: {}]   ;;  %s8066_s1 = inlined_call_operand.hbm [shape: bf16[8,8,128], index: 1, kind: input, shape index: {}]   ;;  %s8067_s2 = inlined_call_operand.hbm [shape: bf16[256,128], index: 2, kind: input, shape index: {}]   ;;  %s8068_s3 = inlined_call_operand.hbm [shape: bf16[128,1024], index: 3, kind: input, shape index: {}]   ;;  %s8069_s4 = inlined_call_operand.hbm [shape: bf16[256,128], index: 4, kind: input, shape index: {}]   ;;  %s8070_s5 = inlined_call_operand.hbm [shape: bf16[128,128], index: 5, kind: input, shape index: {}]   ;;  %s8071_s6 = inlined_call_operand.vmem [shape: f32[1,1408], index: 6, kind: input, shape index: {}]   ;;  %s8072_s7 = inlined_call_operand.hbm [shape: f32[2,4,128], index: 7, kind: output, shape index: {}]  }
   0x1   :  { %8081 = sst [smem:[#allocation22_spill]] %s8065_s0 }
   0x2   :  { %8082 = sst [smem:[#allocation23_spill]] %s8067_s2 }
   0x3   :  { %8083 = sst [smem:[#allocation24_spill]] %s8068_s3 }
   0x4   :  { %8084 = sst [smem:[#allocation25_spill]] %s8069_s4 }
   0x5   :  { %8085 = sst [smem:[#allocation26_spill]] %s8070_s5 }
   0x6   :  { %12 = vsyncpa [#allocation3], 0 }
   0x7   :  { %14 = vsyncpa [#allocation3 + $0x1], 0 }
   0x8   :  { %15 = vsyncpa [#allocation6], 0 }
   0x9   :  { %17 = vsyncpa [#allocation6 + $0x1], 0 }
   0xa   :  { %18 = vsyncpa [#allocation9], 0 }
   0xb   :  { %19 = vsyncpa [#allocation12], 0 }
   0xc   :  { %20 = vsyncpa [#allocation4], 0 }
   0xd   :  { %22 = vsyncpa [#allocation4 + $0x1], 0  ;;  %s6919_s24 = smov 0   ;;  %s6921_s25 = smov 0  }
   0xe   :  { %s6923_s26 = smov 0   ;;  %s6925_s27 = smov 0  }
   0xf LB: > { %8086 = sst [smem:[#allocation20_spill]] %s6857_s26  ;;  %s6940_s28 = sadd.s32 4294967295, %s6861_s27   ;;  %s6861_s27 = sphi %s6925_s27, %s8126_s27   ;;  %s6857_s26 = sphi %s6923_s26, %s8123_s26   ;;  %s6853_s25 = sphi %s6921_s25, %s8125_s25   ;;  %s6849_s24 = sphi %s6919_s24, %s8124_s24  }
  0x10   : > { %s5299_s29 = sadd.s32 4294967294, %s6861_s27   ;;  %p48_p0 = scmp.ne.s32.totalorder %s6853_s25, %s6849_s24 }
  0x11   : > { %p8073_p1 = scmp.eq.s32.totalorder %s6940_s28, 0  ;;  %p209_p3 = scmp.eq.s32.totalorder %s5299_s29, 1 }
  0x12   : > { %p5300_p5 = scmp.ge.s32.totalorder %s6861_s27, 1  ;;  %p216_p7 = scmp.lt.s32.totalorder %s6861_s27, 3 }
  0x13   : > { %p6949_p4 = por %p8073_p1, %p48_p0  ;;  %p6954_p6 = por %p209_p3, %p48_p0 }
  0x14   : > { %p6959_p8 = pnand %p5300_p5, %p216_p7  ;;  %s6863_s10 = smov [#allocation7]  }
  0x15   : > { %s8087_s30 = scalar_select %p6949_p4, 1, 0 }
  0x16   : > { %s8088_s8 = scalar_select %p6954_p6, 1, 0 }
  0x17   : > { %s8089_s9 = scalar_select %p6959_p8, 1, 0 }
  0x18   : > { %s228_s11 = sshll.u32 %s6863_s10, 4  ;;  %p6352_p9 = pneg %p6959_p8  ;;  %s6963_s11 = int_to_ptr.vmem [resolvable:$true] %s228_s11 }
  0x19   : > { %s6864_s13 = smov [#allocation8]   ;;  %s8091_s2 = sld [smem:[#allocation23_spill]] }
  0x1a   : > { %p6970_p11 = pnand %p6352_p9, %p8073_p1  ;;  %s241_s14 = sshll.u32 %s6864_s13, 4  ;;  %s6974_s14 = int_to_ptr.vmem [resolvable:$true] %s241_s14 }
  0x1c   : > { %p6984_p13 = pneg %p6970_p11 }
  0x1f   : > { %s6607_s17 = scalar_lea.hbm %s8091_s2, 2048 }
  0x20   : > { %p6608_p12 = scmp.ne.s32.totalorder %s8091_s2, %s6607_s17  ;;  %p6614_p5 = scmp.lt.u32.totalorder %s6607_s17, %s8091_s2 }
  0x22   : > { %p6610_p0 = pnand %p6984_p13, %p6608_p12 }
  0x24   : > { %p6611_p3 = pneg %p6610_p0 }
  0x26   : > { %p6616_p7 = pnand %p6614_p5, %p6611_p3 }
  0x28   : > { %6619 = shalt.err (!%p6616_p7)
}
  0x29   : > { %s6620_s23 = scalar_lea.vmem %s6963_s11, 2048  ;;  %p6628_p2 = scmp.lt.s32.totalorder %s6963_s11, %s6963_s11 }
  0x2a   : > { %p6621_p9 = scmp.ne.s32.totalorder %s6963_s11, %s6620_s23  ;;  %p6629_p6 = scmp.lt.s32.totalorder %s6620_s23, %s6620_s23 }
  0x2c   : > { %p6623_p10 = pnand %p6621_p9, %p6984_p13  ;;  %p6630_p12 = por %p6629_p6, %p6628_p2 }
  0x2e   : > { %p6624_p1 = pneg %p6623_p10 }
  0x30   : > { %p6631_p0 = pnand %p6630_p12, %p6624_p1 }
  0x32   : > { %6634 = shalt.err (!%p6631_p0)
}
  0x33   : > { %s8074_s29 = smov 64   ;;  %s8076_s10 = smov 4  }
  0x34   : > { %6355 = dma.hbm_to_vmem [thread:$0]  (!%p6970_p11), %s8091_s2, 2048, %s6963_s11, [#allocation6], %s8074_s29, %s8074_s29, %s8076_s10  }
  0x35   : > { %s8093_s3 = sld [smem:[#allocation24_spill]] }
  0x3b   : > { %s6635_s18 = scalar_lea.hbm %s8093_s3, 8192 }
  0x3c   : > { %p6636_p1 = scmp.ne.s32.totalorder %s8093_s3, %s6635_s18  ;;  %p6642_p10 = scmp.lt.u32.totalorder %s6635_s18, %s8093_s3 }
  0x3e   : > { %p6638_p2 = pnand %p6636_p1, %p6984_p13 }
  0x40   : > { %p6639_p6 = pneg %p6638_p2 }
  0x42   : > { %p6644_p3 = pnand %p6642_p10, %p6639_p6 }
  0x44   : > { %6647 = shalt.err (!%p6644_p3)
}
  0x45   : > { %s6648_s11 = scalar_lea.vmem %s6974_s14, 8192  ;;  %p6656_p12 = scmp.lt.s32.totalorder %s6974_s14, %s6974_s14 }
  0x46   : > { %p6649_p5 = scmp.ne.s32.totalorder %s6974_s14, %s6648_s11  ;;  %p6657_p0 = scmp.lt.s32.totalorder %s6648_s11, %s6648_s11 }
  0x48   : > { %p6651_p7 = pnand %p6649_p5, %p6984_p13  ;;  %p6658_p1 = por %p6657_p0, %p6656_p12 }
  0x4a   : > { %p6652_p9 = pneg %p6651_p7 }
  0x4c   : > { %p6659_p2 = pnand %p6658_p1, %p6652_p9 }
  0x4e   : > { %6662 = shalt.err (!%p6659_p2)
}
  0x4f   : > { %s6867_s13 = smov 512   ;;  %s6868_s15 = smov 32  }
  0x50   : > { %6358 = dma.hbm_to_vmem [thread:$0]  (!%p6970_p11), %s8093_s3, 8192, %s6974_s14, [#allocation9], %s6867_s13, %s6867_s13, %s6868_s15  }
  0x51   : > { %s6869_s18 = smov [#allocation10]   ;;  %s6870_s21 = smov [#allocation11]  }
  0x52   : > { %s254_s19 = sshll.u32 %s6869_s18, 4  ;;  %s267_s22 = sshll.u32 %s6870_s21, 4  ;;  %s255_s19 = int_to_ptr.vmem [resolvable:$true] %s254_s19  ;;  %s7031_s22 = int_to_ptr.vmem [resolvable:$true] %s267_s22 }
  0x53   : > { %s8094_s4 = sld [smem:[#allocation25_spill]] }
  0x59   : > { %s6663_s29 = scalar_lea.hbm %s8094_s4, 2048 }
  0x5a   : > { %p6664_p6 = scmp.ne.s32.totalorder %s8094_s4, %s6663_s29  ;;  %p6670_p5 = scmp.lt.u32.totalorder %s6663_s29, %s8094_s4 }
  0x5c   : > { %p6666_p10 = pnand %p6664_p6, %p6984_p13 }
  0x5e   : > { %p6667_p3 = pneg %p6666_p10 }
  0x60   : > { %p6672_p7 = pnand %p6670_p5, %p6667_p3 }
  0x62   : > { %6675 = shalt.err (!%p6672_p7)
}
  0x63   : > { %s6676_s13 = scalar_lea.vmem %s255_s19, 2048  ;;  %p6684_p1 = scmp.lt.s32.totalorder %s255_s19, %s255_s19 }
  0x64   : > { %p6677_p9 = scmp.ne.s32.totalorder %s255_s19, %s6676_s13  ;;  %p6685_p2 = scmp.lt.s32.totalorder %s6676_s13, %s6676_s13 }
  0x66   : > { %p6679_p12 = pnand %p6677_p9, %p6984_p13  ;;  %p6686_p4 = por %p6685_p2, %p6684_p1 }
  0x68   : > { %p6680_p0 = pneg %p6679_p12 }
  0x6a   : > { %p6687_p8 = pnand %p6686_p4, %p6680_p0 }
  0x6c   : > { %6690 = shalt.err (!%p6687_p8)
}
  0x6d   : > { %s8095_s2 = smov 4   ;;  %s8096_s10 = smov 64  }
  0x6e   : > { %6361 = dma.hbm_to_vmem [thread:$0]  (!%p6970_p11), %s8094_s4, 2048, %s255_s19, [#allocation9], %s8096_s10, %s8096_s10, %s8095_s2  }
  0x6f   : > { %s8097_s5 = sld [smem:[#allocation26_spill]] }
  0x75   : > { %s6691_s21 = scalar_lea.hbm %s8097_s5, 1024 }
  0x76   : > { %p6692_p6 = scmp.ne.s32.totalorder %s8097_s5, %s6691_s21  ;;  %p6698_p10 = scmp.lt.u32.totalorder %s6691_s21, %s8097_s5 }
  0x78   : > { %p6694_p4 = pnand %p6692_p6, %p6984_p13 }
  0x7a   : > { %p6695_p8 = pneg %p6694_p4 }
  0x7c   : > { %p6700_p3 = pnand %p6698_p10, %p6695_p8 }
  0x7e   : > { %6703 = shalt.err (!%p6700_p3)
}
  0x7f   : > { %s6704_s19 = scalar_lea.vmem %s7031_s22, 1024  ;;  %p6712_p12 = scmp.lt.s32.totalorder %s7031_s22, %s7031_s22 }
  0x80   : > { %p6705_p5 = scmp.ne.s32.totalorder %s7031_s22, %s6704_s19  ;;  %p6713_p0 = scmp.lt.s32.totalorder %s6704_s19, %s6704_s19 }
  0x82   : > { %p6707_p7 = pnand %p6705_p5, %p6984_p13  ;;  %p6714_p1 = por %p6713_p0, %p6712_p12 }
  0x84   : > { %p6708_p9 = pneg %p6707_p7 }
  0x86   : > { %p6715_p2 = pnand %p6714_p1, %p6708_p9 }
  0x88   : > { %6718 = shalt.err (!%p6715_p2)
}
  0x89   : > { %6364 = dma.hbm_to_vmem [thread:$0]  (!%p6970_p11), %s8097_s5, 1024, %s7031_s22, [#allocation12], %s8096_s10, %s8096_s10, %s8095_s2  }
  0x8a   : > { %s7081_s12 = sadd.s32 1, %s6861_s27   ;;  %s35_s29 = sadd.s32 1, %s6857_s26 }
  0x8b   : > { %s32_s20 = ssub.s32 %s6861_s27, %s7081_s12  ;;  %p42_p6 = scmp.ne.s32.totalorder %s6857_s26, %s6853_s25 }
  0x8c   : > { %p33_p13 = scmp.eq.s32.totalorder %s32_s20, 0  ;;  %p43_p4 = scmp.eq.s32.totalorder %s6861_s27, 0 }
  0x8d   : > { %p8099_p10 = scmp.eq.s32.totalorder %s6940_s28, 1  ;;  %p6380_p5 = scmp.lt.s32.totalorder %s6861_s27, 2 }
  0x8e   : > { %s7090_s17 = scalar_select %p33_p13, %s6857_s26, %s35_s29  }
  0x8f   : > { %p44_p8 = por %p43_p4, %p42_p6  ;;  %p7094_p3 = por %p8099_p10, %p42_p6 }
  0x90   : > { %8098 = sst [smem:[#allocation21_spill]] %s7090_s17  ;;  %s7100_s21 = sand.u32 1, %s6857_s26  }
  0x91   : > { %s5306_s22 = sshll.u32 %s7100_s21, 5  ;;  %s5497_s23 = sshll.u32 %s6861_s27, 9 }
  0x92   : > { %s8101_s0 = sld [smem:[#allocation22_spill]]  ;;  %s288_s19 = scalar_lea.vmem [#allocation2], %s5306_s22 }
  0x93   : > { %s296_s13 = sshll.u32 %s288_s19, 4  ;;  %p7111_p11 = pnand %p6380_p5, %p44_p8  ;;  %s7109_s13 = int_to_ptr.vmem [resolvable:$true] %s296_s13 }
  0x94   : > { %s285_s29 = scalar_lea.sflag [#allocation3], %s7100_s21 }
  0x95   : > { %p6721_p9 = pneg %p7111_p11 }
  0x98   : > { %s7107_s14 = scalar_lea.hbm %s8101_s0, %s5497_s23  ;;  %s6724_s11 = scalar_lea.hbm %s8101_s0, 1024 }
  0x99   : > { %s6719_s3 = scalar_lea.hbm %s7107_s14, 512  ;;  %p6725_p1 = scmp.lt.u32.totalorder %s7107_s14, %s8101_s0 }
  0x9a   : > { %p6720_p7 = scmp.ne.s32.totalorder %s7107_s14, %s6719_s3  ;;  %p6726_p2 = scmp.lt.u32.totalorder %s6724_s11, %s6719_s3 }
  0x9b   : > { %p6728_p6 = scmp.lt.u32.totalorder %s6719_s3, %s7107_s14 }
  0x9c   : > { %p6722_p12 = pnand %p6721_p9, %p6720_p7  ;;  %p6727_p13 = por %p6726_p2, %p6725_p1 }
  0x9e   : > { %p6723_p0 = pneg %p6722_p12  ;;  %p6729_p4 = por %p6728_p6, %p6727_p13 }
  0xa0   : > { %p6730_p8 = pnand %p6729_p4, %p6723_p0 }
  0xa2   : > { %6733 = shalt.err (!%p6730_p8)
}
  0xa3   : > { %s6734_s20 = scalar_lea.vmem %s7109_s13, 512  ;;  %s6871_s22 = smov [#allocation2]  }
  0xa4   : > { %p6735_p10 = scmp.ne.s32.totalorder %s7109_s13, %s6734_s20  ;;  %s6739_s23 = sshll.u32 %s6871_s22, 4  ;;  %s6740_s23 = int_to_ptr.vmem [resolvable:$false] %s6739_s23 }
  0xa5   : > { %s6741_s16 = scalar_lea.vmem %s6740_s23, 1024  ;;  %p6742_p12 = scmp.lt.s32.totalorder %s7109_s13, %s6740_s23 }
  0xa6   : > { %p6737_p5 = pnand %p6735_p10, %p6721_p9  ;;  %p6743_p1 = scmp.lt.s32.totalorder %s6741_s16, %s6734_s20 }
  0xa8   : > { %p6738_p7 = pneg %p6737_p5  ;;  %p6744_p2 = por %p6743_p1, %p6742_p12 }
  0xaa   : > { %p6745_p13 = pnand %p6744_p2, %p6738_p7 }
  0xac   : > { %6748 = shalt.err (!%p6745_p13)
}
  0xad   : > { %s6872_s3 = smov 128   ;;  %s6873_s11 = smov 8  }
  0xae   : > { %6368 = dma.hbm_to_vmem [thread:$0]  (!%p7111_p11), %s7107_s14, 512, %s7109_s13, %s285_s29, %s6872_s3, %s6872_s3, %s6873_s11  }
  0xaf   : > { %s5310_s19 = sshll.u32 %s7100_s21, 4  ;;  %s5498_s22 = sshll.u32 %s6861_s27, 8 }
  0xb0   : > { %s7149_s16 = scalar_lea.hbm %s8066_s1, %s5498_s22  ;;  %s310_s0 = scalar_lea.vmem [#allocation5], %s5310_s19 }
  0xb1   : > { %s317_s4 = sshll.u32 %s310_s0, 4  ;;  %s8103_s5 = sand.u32 1, %s6861_s27   ;;  %s7151_s4 = int_to_ptr.vmem [resolvable:$true] %s317_s4 }
  0xb2   : > { %s7155_s17 = scalar_lea.sflag [#allocation6], %s8103_s5  ;;  %s6749_s26 = scalar_lea.hbm %s7149_s16, 256 }
  0xb3   : > { %p6750_p0 = scmp.ne.s32.totalorder %s7149_s16, %s6749_s26  ;;  %s6754_s13 = scalar_lea.hbm %s8066_s1, 512 }
  0xb4   : > { %p6755_p8 = scmp.lt.u32.totalorder %s7149_s16, %s8066_s1  ;;  %p6756_p10 = scmp.lt.u32.totalorder %s6754_s13, %s6749_s26 }
  0xb5   : > { %p6752_p6 = pnand %p6750_p0, %p6721_p9  ;;  %p6758_p7 = scmp.lt.u32.totalorder %s6749_s26, %s7149_s16 }
  0xb6   : > { %p6757_p5 = por %p6756_p10, %p6755_p8 }
  0xb7   : > { %p6753_p4 = pneg %p6752_p6 }
  0xb8   : > { %p6759_p12 = por %p6758_p7, %p6757_p5 }
  0xba   : > { %p6760_p1 = pnand %p6759_p12, %p6753_p4 }
  0xbc   : > { %6763 = shalt.err (!%p6760_p1)
}
  0xbd   : > { %s6764_s0 = scalar_lea.vmem %s7151_s4, 256  ;;  %s6874_s5 = smov [#allocation5]  }
  0xbe   : > { %p6765_p2 = scmp.ne.s32.totalorder %s7151_s4, %s6764_s0  ;;  %s6769_s11 = sshll.u32 %s6874_s5, 4  ;;  %s6770_s11 = int_to_ptr.vmem [resolvable:$false] %s6769_s11 }
  0xbf   : > { %s6771_s19 = scalar_lea.vmem %s6770_s11, 512  ;;  %p6772_p6 = scmp.lt.s32.totalorder %s7151_s4, %s6770_s11 }
  0xc0   : > { %p6767_p13 = pnand %p6765_p2, %p6721_p9  ;;  %p6773_p8 = scmp.lt.s32.totalorder %s6771_s19, %s6764_s0 }
  0xc2   : > { %p6768_p0 = pneg %p6767_p13  ;;  %p6774_p10 = por %p6773_p8, %p6772_p6 }
  0xc4   : > { %p6775_p5 = pnand %p6774_p10, %p6768_p0 }
  0xc6   : > { %6778 = shalt.err (!%p6775_p5)
}
  0xc7   : > { %6371 = dma.hbm_to_vmem [thread:$0]  (!%p7111_p11), %s7149_s16, 256, %s7151_s4, %s7155_s17, %s8096_s10, %s8096_s10, %s8095_s2  }
  0xc8   : > { %p8104_p9 = scmp.ne.s32.totalorder %s8089_s9, 0 }
  0xc9   : > { %s7187_s26 = sand.u32 (!%p8104_p9), 1, %s6853_s25   ;;  %p8105_p4 = scmp.ne.s32.totalorder (!%p8104_p9), %s8087_s30, 0 }
  0xca   : > { %329 = sbr.rel (%p8104_p9) target bundleno = 4977 (0x1371), region = 48  ;;  %s5314_s22 = sshll.u32 (!%p8104_p9), %s7187_s26, 5 }
  0xcb   : > { %s332_s23 = scalar_lea.sflag (!%p8104_p9), [#allocation3], %s7187_s26  ;;  %s7191_s20 = scalar_lea.vmem (!%p8104_p9), [#allocation2], %s5314_s22 }
  0xd1   : > { %6824 = dma.done.wait (%p8105_p4), %s332_s23, 512  }
  0xd2   : > { %6826 = vsyncadd (%p8105_p4), %s332_s23, 4294966784  ;;  %s340_s4 = sand.u32 1, %s6940_s28   ;;  %s5315_s9 = sshll.u32 %s7187_s26, 4 }
  0xd3   : > { %s341_s2 = scalar_lea.sflag [#allocation6], %s340_s4  ;;  %s7199_s10 = scalar_lea.vmem [#allocation5], %s5315_s9 }
  0xd4   : > { %6828 = dma.done.wait (%p8105_p4), %s341_s2, 256  }
  0xd5   : > { %6830 = vsyncadd (%p8105_p4), %s341_s2, 4294967040  ;;  %p8106_p11 = scmp.eq.s32.totalorder %s6940_s28, 0 }
  0xd7   : > { %6832 = dma.done.wait (%p8106_p11), [#allocation6], 2048   ;;  %p8107_p7 = pmov %p8106_p11 }
  0xd9   : > { %6834 = vsyncadd (%p8107_p7), [#allocation6], 4294965248  ;;  %p8108_p12 = pmov %p8107_p7 }
  0xda   : > { %p8109_p1 = pmov %p8107_p7 }
  0xdb   : > { %6836 = dma.done.wait (%p8108_p12), [#allocation9], 10240  }
  0xdc   : > { %6838 = vsyncadd (%p8109_p1), [#allocation9], 4294957056  ;;  %p8110_p2 = pmov %p8109_p1 }
  0xdd   : > { %p8111_p13 = pmov %p8109_p1 }
  0xde   : > { %6840 = dma.done.wait (%p8110_p2), [#allocation12], 1024  }
  0xdf   : > { %6842 = vsyncadd (%p8111_p13), [#allocation12], 4294966272  ;;  %v6431_v0 = vld [vmem:[#allocation7 + $0x40] sm:$0xff]   ;;  %v6433_v2 = vld [vmem:[#allocation7 + $0x48] sm:$0xff]   ;;  %vm6877_vm0 = vmmov 0   ;;  %vm1733_vm7 = vcmask 1043456  }
  0xe0   : > { %v6432_v1 = vld [vmem:[#allocation7] sm:$0xff]   ;;  %5523 = vmatprep.subr.bf16.mxu0 %v6431_v0  ;;  %v6434_v3 = vld [vmem:[#allocation7 + $0x8] sm:$0xff]   ;;  %v6435_v4 = vld [vmem:[#allocation7 + $0x50] sm:$0xff]   ;;  %vm1455_vm8 = vcmask 64512   ;;  %vm4850_vm15 = vcmask 1041409   ;;  %s5320_s19 = sshll.u32 %s7187_s26, 2 }
  0xe1   : > { %5524 = vmatpush3.bf16.msra.mxu0 %v6432_v1  ;;  %v6436_v5 = vld [vmem:[#allocation7 + $0x10] sm:$0xff]   ;;  %v6437_v6 = vld [vmem:[#allocation7 + $0x58] sm:$0xff]   ;;  %v6439_v8 = vld [vmem:[#allocation7 + $0x60] sm:$0xff]   ;;  %s395_s4 = scalar_lea.vmem [#allocation13], %s5320_s19  ;;  %s5155_s17 = scalar_lea.sflag [#allocation4], %s7187_s26 }
  0xe2   : > { %5525 = vmatprep.subr.bf16.mxu0 %v6433_v2  ;;  %v6438_v7 = vld [vmem:[#allocation7 + $0x18] sm:$0xff]   ;;  %v6440_v9 = vld [vmem:[#allocation7 + $0x20] sm:$0xff]   ;;  %v6441_v10 = vld [vmem:[#allocation7 + $0x68] sm:$0xff]   ;;  %v6875_v2 = vmov 0   ;;  %s5168_s9 = sshll.u32 %s395_s4, 4  ;;  %s6878_s15 = smov [#allocation13]   ;;  %s8023_s9 = int_to_ptr.vmem [resolvable:$true] %s5168_s9 }
  0xe3   : > { %v6449_v11 = vld [vmem:[%s7191_s20 + $0x4] ss:$8 sps:$4 sm:$0xff]   ;;  %v6443_v17 = vld [vmem:[#allocation7 + $0x70] sm:$0xff]   ;;  %v6445_v24 = vld [vmem:[#allocation7 + $0x78] sm:$0xff]   ;;  %827 = vmatprep.mubr.bf16.mxu1 %v6875_v2  ;;  %s6783_s16 = sshll.u32 %s6878_s15, 4  ;;  %s6784_s16 = int_to_ptr.vmem [resolvable:$false] %s6783_s16 }
  0xe4   : > { %v6442_v12 = vld [vmem:[#allocation7 + $0x28] sm:$0xff]   ;;  %v619_v13 = vld [vmem:[#allocation8] sm:$0xff]  ;;  %600 = vmatprep.mubr.bf16.mxu0 %v6449_v11  ;;  %v6444_v23 = vld [vmem:[#allocation7 + $0x30] sm:$0xff]   ;;  %s6785_s21 = scalar_lea.vmem %s6784_s16, 128  ;;  %p6786_p10 = scmp.lt.s32.totalorder %s8023_s9, %s6784_s16 }
  0xe5   : > { %5526 = vmatpush3.bf16.msra.mxu0 %v6434_v3  ;;  %v621_v14 = vld [vmem:[#allocation8 + $0x20] sm:$0xff]  ;;  %v620_v28 = vld [vmem:[#allocation8 + $0x8] sm:$0xf]  ;;  %v6446_v31 = vld [vmem:[#allocation7 + $0x38] sm:$0xff]  }
  0xe6   : > { %5527 = vmatprep.subr.bf16.mxu0 %v6435_v4  ;;  %v623_v15 = vld [vmem:[#allocation8 + $0x40] sm:$0xff]  ;;  %v5343_v18 = vcombine.high %v619_v13, %v621_v14  ;;  %v5342_v19 = vcombine.low %v619_v13, %v621_v14  ;;  %v622_v29 = vld [vmem:[#allocation8 + $0x28] sm:$0xf]  ;;  %v6450_v40 = vld [vmem:[%s7191_s20 + $0x14] ss:$8 sps:$4 sm:$0xff]  }
  0xe7   : > { %v625_v16 = vld [vmem:[#allocation8 + $0x60] sm:$0xff]  ;;  %v5344_v37 = vcombine.low %v620_v28, %v622_v29  ;;  %v624_v38 = vld [vmem:[#allocation8 + $0x48] sm:$0xf]  ;;  %v6452_v47 = vld [vmem:[%s7191_s20 + $0x10] ss:$8 sps:$4 sm:$0xff]  }
  0xe8   : > { %v5346_v20 = vcombine.high %v623_v15, %v625_v16  ;;  %v627_v21 = vld [vmem:[#allocation8 + $0x80] sm:$0xff]  ;;  %795 = vmatprep.subr.bf16.mxu1 %v5343_v18  ;;  %v5345_v25 = vcombine.low %v623_v15, %v625_v16  ;;  %v626_v39 = vld [vmem:[#allocation8 + $0x68] sm:$0xf]  ;;  %v897_v0 = vld [vmem:[#allocation8 + $0xc] sm:$0xff] }
  0xe9   : > { %5528 = vmatpush3.bf16.msra.mxu0 %v6436_v5  ;;  %v629_v22 = vld [vmem:[#allocation8 + $0xa0] sm:$0xff]  ;;  %796 = vmatpush1.bf16.msra.mxu1 %v5342_v19  ;;  %v5347_v45 = vcombine.low %v624_v38, %v626_v39  ;;  %v628_v54 = vld [vmem:[#allocation8 + $0x88] sm:$0xf]  ;;  %v899_v1 = vld [vmem:[#allocation8 + $0x2c] sm:$0xff] }
  0xea   : > { %5529 = vmatprep.subr.bf16.mxu0 %v6437_v6  ;;  %v631_v26 = vld [vmem:[#allocation8 + $0xc0] sm:$0xff]  ;;  %797 = vmatprep.subr.bf16.mxu1 %v5346_v20  ;;  %v5349_v30 = vcombine.high %v627_v21, %v629_v22  ;;  %v5348_v32 = vcombine.low %v627_v21, %v629_v22  ;;  %v630_v55 = vld [vmem:[#allocation8 + $0xa8] sm:$0xf]  ;;  %v5368_v3 = vcombine.low %v897_v0, %v899_v1 }
  0xeb   : > { %v633_v27 = vld [vmem:[#allocation8 + $0xe0] sm:$0xff]  ;;  %v5350_v56 = vcombine.low %v628_v54, %v630_v55  ;;  %v632_v61 = vld [vmem:[#allocation8 + $0xc8] sm:$0xf]  ;;  %v5369_v4 = vcombine.high %v897_v0, %v899_v1 }
  0xec   : > { %v635_v33 = vld [vmem:[#allocation8 + $0x100] sm:$0xff]  ;;  %v5352_v36 = vcombine.high %v631_v26, %v633_v27  ;;  %v5351_v41 = vcombine.low %v631_v26, %v633_v27  ;;  %v634_v62 = vld [vmem:[#allocation8 + $0xe8] sm:$0xf] }
  0xed   : > { %5530 = vmatpush3.bf16.msra.mxu0 %v6438_v7  ;;  %798 = vmatpush1.bf16.msra.mxu1 %v5345_v25  ;;  %v637_v34 = vld [vmem:[#allocation8 + $0x120] sm:$0xff]  ;;  %v5353_v63 = vcombine.low %v632_v61, %v634_v62  ;;  %v636_v5 = vld [vmem:[#allocation8 + $0x108] sm:$0xf]  ;;  %v903_v25 = vld [vmem:[#allocation8 + $0x6c] sm:$0xff] }
  0xee   : > { %5531 = vmatprep.subr.bf16.mxu0 %v6439_v8  ;;  %v6447_v35 = vld [vmem:[%s7191_s20] ss:$8 sps:$4 sm:$0xff]   ;;  %799 = vmatprep.subr.bf16.mxu1 %v5349_v30  ;;  %v5355_v44 = vcombine.high %v635_v33, %v637_v34  ;;  %v5354_v46 = vcombine.low %v635_v33, %v637_v34  ;;  %v927_v61 = vld [vmem:[#allocation8 + $0x1ec] sm:$0xff]  ;;  %s5493_s20 = sshll.u32 %s6940_s28, 6  ;;  %s6779_s28 = scalar_lea.vmem %s8023_s9, 64 }
  0xef   : > { %v639_v42 = vld [vmem:[#allocation8 + $0x140] sm:$0xff]  ;;  %v638_v6 = vld [vmem:[#allocation8 + $0x128] sm:$0xf]  ;;  %s8021_s30 = scalar_lea.hbm %s8072_s7, %s5493_s20  ;;  %p6780_p0 = scmp.ne.s32.totalorder %s8023_s9, %s6779_s28 }
  0xf0   : > { %v641_v43 = vld [vmem:[#allocation8 + $0x160] sm:$0xff]  ;;  %v5356_v7 = vcombine.low %v636_v5, %v638_v6  ;;  %v640_v8 = vld [vmem:[#allocation8 + $0x148] sm:$0xf]  ;;  %v902_v6 = vld [vmem:[#allocation8 + $0x54] sm:$0xf]  ;;  %p6787_p5 = scmp.lt.s32.totalorder %s6785_s21, %s6779_s28 }
  0xf1   : > { %5532 = vmatpush3.bf16.msra.mxu0 %v6440_v9  ;;  %800 = vmatpush1.bf16.msra.mxu1 %v5348_v32  ;;  %v5358_v48 = vcombine.high %v639_v42, %v641_v43  ;;  %v5357_v49 = vcombine.low %v639_v42, %v641_v43  ;;  %v643_v50 = vld [vmem:[#allocation8 + $0x180] sm:$0xff]  ;;  %v642_v9 = vld [vmem:[#allocation8 + $0x168] sm:$0xf]  ;;  %v907_v32 = vld [vmem:[#allocation8 + $0xac] sm:$0xff]  ;;  %p6781_p6 = pnand %p6780_p0, %p7094_p3 }
  0xf2   : > { %5533 = vmatprep.subr.bf16.mxu0 %v6441_v10  ;;  %801 = vmatprep.subr.bf16.mxu1 %v5352_v36  ;;  %v645_v51 = vld [vmem:[#allocation8 + $0x1a0] sm:$0xff]  ;;  %v5359_v10 = vcombine.low %v640_v8, %v642_v9  ;;  %v644_v11 = vld [vmem:[#allocation8 + $0x188] sm:$0xf]  ;;  %v911_v42 = vld [vmem:[#allocation8 + $0xec] sm:$0xff]  ;;  %p6788_p9 = por %p6787_p5, %p6786_p10 }
  0xf3   : > { %v5361_v52 = vcombine.high %v643_v50, %v645_v51  ;;  %v5360_v53 = vcombine.low %v643_v50, %v645_v51  ;;  %v647_v57 = vld [vmem:[#allocation8 + $0x1c0] sm:$0xff]  ;;  %v648_v14 = vld [vmem:[#allocation8 + $0x1c8] sm:$0xf]  ;;  %v906_v9 = vld [vmem:[#allocation8 + $0x94] sm:$0xf]  ;;  %p6782_p8 = pneg %p6781_p6 }
  0xf4   : > { %v649_v58 = vld [vmem:[#allocation8 + $0x1e0] sm:$0xff]  ;;  %v650_v15 = vld [vmem:[#allocation8 + $0x1e8] sm:$0xf] }
  0xf5   : > { %5534 = vmatpush3.bf16.msra.mxu0 %v6442_v12  ;;  %802 = vmatpush1.bf16.msra.mxu1 %v5351_v41  ;;  %v5364_v59 = vcombine.high %v647_v57, %v649_v58  ;;  %v5363_v60 = vcombine.low %v647_v57, %v649_v58  ;;  %v646_v12 = vld [vmem:[#allocation8 + $0x1a8] sm:$0xf]  ;;  %v5365_v16 = vcombine.low %v648_v14, %v650_v15  ;;  %v5321_v21 = vld [vmem:[%s8071_s6] ss:$0 sm:$0xff]  ;;  %v909_v41 = vld [vmem:[#allocation8 + $0xcc] sm:$0xff]  ;;  %p6789_p4 = pnand %p6788_p9, %p6782_p8 }
  0xf6   : > { %5535 = vmatprep.subr.bf16.mxu0 %v6443_v17  ;;  %803 = vmatprep.subr.bf16.mxu1 %v5355_v44  ;;  %v5362_v13 = vcombine.low %v644_v11, %v646_v12  ;;  %v5377_v50 = vcombine.low %v909_v41, %v911_v42  ;;  %v923_v57 = vld [vmem:[#allocation8 + $0x1ac] sm:$0xff]  ;;  %v910_v12 = vld [vmem:[#allocation8 + $0xd4] sm:$0xf] }
  0xf7   : > { %v6454_v1 = vld [vmem:[%s7199_s10 + $0x8] sm:$0xff]   ;;  %v916_v15 = vld [vmem:[#allocation8 + $0x134] sm:$0xf] }
  0xf9   : > { %5536 = vmatpush3.bf16.msra.mxu0 %v6444_v23  ;;  %804 = vmatpush1.bf16.msra.mxu1 %v5354_v46 }
  0xfa   : > { %5537 = vmatprep.subr.bf16.mxu0 %v6445_v24  ;;  %805 = vmatprep.subr.bf16.mxu1 %v5358_v48  ;;  %v901_v24 = vld [vmem:[#allocation8 + $0x4c] sm:$0xff] }
  0xfb   : > { %v5372_v29 = vcombine.high %v901_v24, %v903_v25  ;;  %v5371_v36 = vcombine.low %v901_v24, %v903_v25  ;;  %v915_v48 = vld [vmem:[#allocation8 + $0x12c] sm:$0xff]  ;;  %v928_v24 = vld [vmem:[#allocation8 + $0x1f4] sm:$0xf] }
  0xfd   : > { %5538 = vmatpush3.bf16.msra.mxu0 %v6446_v31  ;;  %806 = vmatpush1.bf16.msra.mxu1 %v5357_v49  ;;  %v905_v31 = vld [vmem:[#allocation8 + $0x8c] sm:$0xff] }
  0xfe   : > { %5750 = vmatprep.subr.bf16.mxu0 %v5344_v37  ;;  %807 = vmatprep.subr.bf16.mxu1 %v5361_v52  ;;  %v5375_v38 = vcombine.high %v905_v31, %v907_v32  ;;  %v5374_v44 = vcombine.low %v905_v31, %v907_v32  ;;  %v6453_v49 = vld [vmem:[%s7199_s10] sm:$0xff]  }
  0xff   : > { %v917_v52 = vld [vmem:[#allocation8 + $0x14c] sm:$0xff] }
 0x100   : > { %601 = vmatmul.mubr.bf16.vlgmr.msra.gmra.mrb[0].mxu0 %v6447_v35 }
 0x101   : > { %608 = vmatprep.mubr.bf16.mxu0 %v6450_v40  ;;  %5751 = vmatpush3.bf16.msra.mxu0 %v5344_v37 }
 0x102   : > { %5752 = vmatprep.subr.bf16.mxu0 %v5347_v45  ;;  %808 = vmatpush1.bf16.msra.mxu1 %v5360_v53  ;;  %v919_v53 = vld [vmem:[#allocation8 + $0x16c] sm:$0xff] }
 0x103   : > { %809 = vmatprep.subr.bf16.mxu1 %v5364_v59  ;;  %v5384_v55 = vcombine.high %v917_v52, %v919_v53  ;;  %v5383_v58 = vcombine.low %v917_v52, %v919_v53  ;;  %v7268_v52 = vld [vmem:[%s8071_s6 + $0x4] sm:$0x7] }
 0x105   : > { %5753 = vmatpush3.bf16.msra.mxu0 %v5347_v45  ;;  %v5378_v45 = vcombine.high %v909_v41, %v911_v42 }
 0x106   : > { %5754 = vmatprep.subr.bf16.mxu0 %v5350_v56  ;;  %810 = vmatpush1.bf16.msra.mxu1 %v5363_v60  ;;  %v925_v60 = vld [vmem:[#allocation8 + $0x1cc] sm:$0xff] }
 0x107   : > { %1085 = vmatprep.subr.bf16.mxu1 %v5369_v4  ;;  %v5389_v0 = vcombine.low %v925_v60, %v927_v61  ;;  %v900_v4 = vld [vmem:[#allocation8 + $0x34] sm:$0xf] }
 0x108   : > { %609 = vmatmul.mubr.bf16.gmra.mrb[4].mxu0 %v6452_v47  ;;  %v913_v47 = vld [vmem:[#allocation8 + $0x10c] sm:$0xff] }
 0x109   : > { %5755 = vmatpush3.bf16.msra.mxu0 %v5350_v56  ;;  %v5381_v51 = vcombine.high %v913_v47, %v915_v48  ;;  %v5380_v54 = vcombine.low %v913_v47, %v915_v48  ;;  %v921_v56 = vld [vmem:[#allocation8 + $0x18c] sm:$0xff] }
 0x10a   : > { %5756 = vmatprep.subr.bf16.mxu0 %v5353_v63  ;;  %v5387_v59 = vcombine.high %v921_v56, %v923_v57  ;;  %v5386_v62 = vcombine.low %v921_v56, %v923_v57 }
 0x10d   : > { %5757 = vmatpush3.bf16.msra.mxu0 %v5353_v63  ;;  %v5390_v63 = vcombine.high %v925_v60, %v927_v61 }
 0x10e   : > { %5758 = vmatprep.subr.bf16.mxu0 %v5356_v7 }
 0x111   : > { %5759 = vmatpush3.bf16.msra.mxu0 %v5356_v7  ;;  %v904_v7 = vld [vmem:[#allocation8 + $0x74] sm:$0xf] }
 0x112   : > { %5760 = vmatprep.subr.bf16.mxu0 %v5359_v10  ;;  %v5373_v8 = vcombine.low %v902_v6, %v904_v7 }
 0x115   : > { %5761 = vmatpush3.bf16.msra.mxu0 %v5359_v10  ;;  %v908_v10 = vld [vmem:[#allocation8 + $0xb4] sm:$0xf] }
 0x116   : > { %5762 = vmatprep.subr.bf16.mxu0 %v5362_v13  ;;  %v5376_v11 = vcombine.low %v906_v9, %v908_v10 }
 0x119   : > { %5763 = vmatpush3.bf16.msra.mxu0 %v5362_v13  ;;  %v912_v13 = vld [vmem:[#allocation8 + $0xf4] sm:$0xf] }
 0x11a   : > { %5764 = vmatprep.subr.bf16.mxu0 %v5365_v16  ;;  %v5379_v14 = vcombine.low %v910_v12, %v912_v13 }
 0x11d   : > { %5765 = vmatpush3.bf16.msra.mxu0 %v5365_v16 }
 0x1d3   : > { %v5539_v17 = vpop.f32.mrb[0].mxu0 }
 0x1d4   : > { %v5540_v18 = vpop.f32.mrb[1].mxu0 }
 0x1d5   : > { %v5541_v19 = vadd.f32 %v5540_v18, %v5539_v17  ;;  %v5542_v20 = vpop.f32.mrb[2].mxu0  ;;  %v918_v17 = vld [vmem:[#allocation8 + $0x154] sm:$0xf] }
 0x1d6   : > { %v5543_v22 = vpop.f32.mrb[3].mxu0  ;;  %v920_v18 = vld [vmem:[#allocation8 + $0x174] sm:$0xf] }
 0x1d7   : > { %v5544_v23 = vadd.f32 %v5543_v22, %v5542_v20  ;;  %v603_v26 = vadd.f32 %v5541_v19, %v5321_v21  ;;  %v5385_v19 = vcombine.low %v918_v17, %v920_v18  ;;  %v922_v20 = vld [vmem:[#allocation8 + $0x194] sm:$0xf] }
 0x1d9   : > { %v606_v27 = vadd.f32 %v5544_v23, %v5321_v21  ;;  %v926_v23 = vld [vmem:[#allocation8 + $0x1d4] sm:$0xf] }
 0x1da   : > { %v5391_v25 = vcombine.low %v926_v23, %v928_v24 }
 0x1db   : > { %v617_v28 = vpack.c.bf16 %v606_v27, %v603_v26  ;;  %v5545_v30 = vpop.f32.mrb[4].mxu0  ;;  %v6876_v26 = vmov 0.0   ;;  %v652_v27 = vlaneseq }
 0x1dc   : > { %v5546_v33 = vpop.f32.mrb[5].mxu0 }
 0x1dd   : > { %828 = vmatmul.mubr.bf16.vlgmr.msra.gmra.mrb[0].mxu1 %v617_v28  ;;  %5766 = vmatprep.mubr.bf16.mxu0 %v617_v28  ;;  %v5547_v34 = vadd.f32 %v5546_v33, %v5545_v30  ;;  %v5548_v35 = vpop.f32.mrb[6].mxu0  ;;  %v7236_v28 = vshrl.u32 %v652_v27, 7  ;;  %v400_v30 = vld [vmem:[%s8071_s6 + $0x1] sm:$0x7] }
 0x1de   : > { %1086 = vmatpush1.bf16.msra.mxu1 %v5368_v3  ;;  %v5549_v37 = vpop.f32.mrb[7].mxu0  ;;  %837 = vmatprep.mubr.bf16.mxu1 %v6875_v2  ;;  %v898_v3 = vld [vmem:[#allocation8 + $0x14] sm:$0xf] }
 0x1df   : > { %1087 = vmatprep.subr.bf16.mxu1 %v5372_v29  ;;  %v611_v39 = vadd.f32 %v5547_v34, %v5321_v21  ;;  %v5550_v40 = vadd.f32 %v5549_v37, %v5548_v35  ;;  %v5370_v5 = vcombine.low %v898_v3, %v900_v4  ;;  %v658_v29 = vsub.s32 1, %v7236_v28 }
 0x1e0   : > { %v662_v34 = vsub.s32 2, %v7236_v28  ;;  %v654_v53 = vsub.s32 0, %v7236_v28 }
 0x1e1   : > { %v614_v43 = vadd.f32 %v5550_v40, %v5321_v21  ;;  %5770 = vmatprep.subr.bf16.mxu0 %v5370_v5  ;;  %v924_v21 = vld [vmem:[#allocation8 + $0x1b4] sm:$0xf]  ;;  %v659_v31 = vrot.slane %v400_v30, %v658_v29 }
 0x1e2   : > { %1088 = vmatpush1.bf16.msra.mxu1 %v5371_v36  ;;  %v5388_v22 = vcombine.low %v922_v20, %v924_v21 }
 0x1e3   : > { %1089 = vmatprep.subr.bf16.mxu1 %v5375_v38  ;;  %v618_v46 = vpack.c.bf16 %v614_v43, %v611_v39  ;;  %v7249_v39 = vrot.slane %v400_v30, %v662_v34 }
 0x1e5   : > { %838 = vmatmul.mubr.bf16.gmra.mrb[4].mxu1 %v618_v46  ;;  %5767 = vmatmul.mubr.bf16.vlgmr.msra.gmra.mrb[8].mxu0 %v618_v46 }
 0x1e6   : > { %1090 = vmatpush1.bf16.msra.mxu1 %v5374_v44  ;;  %1117 = vmatprep.mubr.bf16.mxu1 %v6875_v2 }
 0x1e7   : > { %1091 = vmatprep.subr.bf16.mxu1 %v5378_v45  ;;  %5786 = vmatprep.mubr.bf16.mxu0 %v6453_v49 }
 0x1e8   : > { %5771 = vmatpush3.bf16.msra.mxu0 %v5370_v5 }
 0x1e9   : > { %5772 = vmatprep.subr.bf16.mxu0 %v5373_v8 }
 0x1ea   : > { %1092 = vmatpush1.bf16.msra.mxu1 %v5377_v50 }
 0x1eb   : > { %1093 = vmatprep.subr.bf16.mxu1 %v5381_v51 }
 0x1ec   : > { %5773 = vmatpush3.bf16.msra.mxu0 %v5373_v8 }
 0x1ed   : > { %5774 = vmatprep.subr.bf16.mxu0 %v5376_v11 }
 0x1ee   : > { %1094 = vmatpush1.bf16.msra.mxu1 %v5380_v54  ;;  %v937_v54 = vrot.slane %v7268_v52, %v658_v29  ;;  %v941_v29 = vrot.slane %v7268_v52, %v662_v34 }
 0x1ef   : > { %1095 = vmatprep.subr.bf16.mxu1 %v5384_v55  ;;  %v655_v55 = vrot.slane %v400_v30, %v654_v53 }
 0x1f0   : > { %5775 = vmatpush3.bf16.msra.mxu0 %v5376_v11 }
 0x1f1   : > { %5776 = vmatprep.subr.bf16.mxu0 %v5379_v14 }
 0x1f2   : > { %1096 = vmatpush1.bf16.msra.mxu1 %v5383_v58  ;;  %v7276_v58 = vand.u32 127, %v652_v27 }
 0x1f3   : > { %1097 = vmatprep.subr.bf16.mxu1 %v5387_v59 }
 0x1f4   : > { %5777 = vmatpush3.bf16.msra.mxu0 %v5379_v14  ;;  %vm1286_vm1 = vcmp.lt.s32.totalorder %v7276_v58, 32  ;;  %vm1508_vm3 = vcmp.ge.s32.totalorder %v7276_v58, 32  ;;  %vm1509_vm4 = vcmp.lt.s32.totalorder %v7276_v58, 64  ;;  %vm2099_vm9 = vcmp.ge.s32.totalorder %v7276_v58, 64 }
 0x1f5   : > { %vm7289_vm2 = vmpackc.low %vm1286_vm1, %vm1286_vm1  ;;  %vm2100_vm10 = vcmp.lt.s32.totalorder %v7276_v58, 96  ;;  %vm2509_vm13 = vcmp.ge.s32.totalorder %v7276_v58, 96  ;;  %vm4854_vm1 = vcmask 1043459  }
 0x1f6   : > { %1098 = vmatpush1.bf16.msra.mxu1 %v5386_v62  ;;  %vm1510_vm5 = vmand %vm1508_vm3, %vm1509_vm4 }
 0x1f7   : > { %1099 = vmatprep.subr.bf16.mxu1 %v5390_v63  ;;  %vm7335_vm6 = vmpackc.low %vm1510_vm5, %vm1510_vm5 }
 0x1f8   : > { %vm2101_vm11 = vmand %vm2099_vm9, %vm2100_vm10 }
 0x1f9   : > { %vm7487_vm12 = vmpackc.low %vm2101_vm11, %vm2101_vm11 }
 0x1fa   : > { %1100 = vmatpush1.bf16.msra.mxu1 %v5389_v0  ;;  %vm7560_vm14 = vmpackc.low %vm2509_vm13, %vm2509_vm13 }
 0x1fb   : > { %5790 = vmatprep.subr.bf16.mxu1 %v6876_v26 }
 0x1fd   : > { %1118 = vmatmul.mubr.bf16.vlgmr.msra.gmra.mrb[8].mxu1 %v6453_v49 }
 0x1fe   : > { %1127 = vmatprep.mubr.bf16.mxu1 %v6875_v2  ;;  %v914_v2 = vld [vmem:[#allocation8 + $0x114] sm:$0xf] }
 0x1ff   : > { %v5382_v16 = vcombine.low %v914_v2, %v916_v15 }
 0x201   : > { %5778 = vmatprep.subr.bf16.mxu0 %v5382_v16 }
 0x202   : > { %5779 = vmatpush3.bf16.msra.mxu0 %v5382_v16 }
 0x203   : > { %5780 = vmatprep.subr.bf16.mxu0 %v5385_v19 }
 0x205   : > { %1128 = vmatmul.mubr.bf16.gmra.mrb[12].mxu1 %v6454_v1 }
 0x206   : > { %5781 = vmatpush3.bf16.msra.mxu0 %v5385_v19  ;;  %5792 = vmatprep.mubr.msk.bf16.mxu1 %vm6877_vm0, %v6876_v26 }
 0x207   : > { %5782 = vmatprep.subr.bf16.mxu0 %v5388_v22 }
 0x20a   : > { %5783 = vmatpush3.bf16.msra.mxu0 %v5388_v22 }
 0x20b   : > { %5784 = vmatprep.subr.bf16.mxu0 %v5391_v25 }
 0x20e   : > { %5785 = vmatpush3.bf16.msra.mxu0 %v5391_v25 }
 0x20f   : > { %5808 = vmatprep.subr.bf16.mxu0 %v6876_v26 }
 0x211   : > { %5787 = vmatmul.mubr.bf16.vlgmr.msra.gmra.mrb[12].mxu0 %v6454_v1 }
 0x212   : > { %5810 = vmatprep.mubr.msk.bf16.mxu0 %vm6877_vm0, %v6876_v26 }
 0x2b0   : > { %v829_v32 = vpop.f32.mrb[0].mxu1 }
 0x2b1   : > { %v831_v33 = vpop.f32.mrb[1].mxu1  ;;  %v830_v62 = vadd.f32 %v829_v32, %v655_v55 }
 0x2b2   : > { %v7243_v35 = vadd.f32 %v831_v33, %v659_v31  ;;  %v833_v36 = vpop.f32.mrb[2].mxu1 }
 0x2b3   : > { %v835_v37 = vpop.f32.mrb[3].mxu1  ;;  %v7285_v0 = vpack.c.bf16 %v830_v62, %v830_v62  ;;  %v834_v8 = vadd.f32 %v833_v36, %v655_v55 }
 0x2b4   : > { %v7245_v38 = vadd.f32 %v835_v37, %v659_v31 }
 0x2b5   : > { %v1291_v11 = vsel %vm7289_vm2, %v7285_v0, 0  ;;  %v7306_v2 = vpack.c.bf16 %v834_v8, %v834_v8  ;;  %v1514_v24 = vsel %vm7335_vm6, %v7285_v0, 0  ;;  %v2515_v58 = vsel %vm7560_vm14, %v7285_v0, 0 }
 0x2b7   : > { %v1292_v18 = vsel %vm7289_vm2, %v7306_v2, 0  ;;  %v1515_v23 = vsel %vm7335_vm6, %v7306_v2, 0 }
 0x2b8   : > { %v839_v40 = vpop.f32.mrb[4].mxu1  ;;  %v5768_v41 = vpop.f32.mrb[8].mxu0 }
 0x2b9   : > { %v7252_v42 = vadd.f32 %v5768_v41, %v7249_v39  ;;  %v841_v43 = vpop.f32.mrb[5].mxu1  ;;  %v7254_v44 = vpop.f32.mrb[9].mxu0  ;;  %v840_v17 = vadd.f32 %v839_v40, %v655_v55 }
 0x2ba   : > { %v7256_v45 = vadd.f32 %v841_v43, %v659_v31  ;;  %v843_v46 = vpop.f32.mrb[6].mxu1  ;;  %v5769_v47 = vpop.f32.mrb[10].mxu0 }
 0x2bb   : > { %v7259_v48 = vadd.f32 %v5769_v47, %v7249_v39  ;;  %v845_v49 = vpop.f32.mrb[7].mxu1  ;;  %v7261_v50 = vpop.f32.mrb[11].mxu0  ;;  %v844_v12 = vadd.f32 %v843_v46, %v655_v55  ;;  %v7326_v20 = vpack.c.bf16 %v840_v17, %v840_v17 }
 0x2bc   : > { %v7263_v51 = vadd.f32 %v845_v49, %v659_v31 }
 0x2bd   : > { %v7310_v15 = vpack.c.bf16 %v844_v12, %v844_v12  ;;  %v1293_v21 = vsel %vm7289_vm2, %v7326_v20, 0  ;;  %v1516_v27 = vsel %vm7335_vm6, %v7326_v20, 0 }
 0x2bf   : > { %v1294_v19 = vsel %vm7289_vm2, %v7310_v15, 0  ;;  %v1517_v25 = vsel %vm7335_vm6, %v7310_v15, 0 }
 0x2d0   : > { %v7274_v56 = vpop.f32.mrb[8].mxu1 }
 0x2d1   : > { %v1121_v57 = vpop.f32.mrb[9].mxu1 }
 0x2d2   : > { %v1122_v59 = vadd.f32 %v1121_v57, %v937_v54  ;;  %v7278_v60 = vpop.f32.mrb[10].mxu1 }
 0x2d3   : > { %v1125_v61 = vpop.f32.mrb[11].mxu1 }
 0x2d4   : > { %v7280_v63 = vpack.c.bf16 %v1122_v59, %v1122_v59  ;;  %v1126_v1 = vadd.f32 %v1125_v61, %v937_v54 }
 0x2d6   : > { %5791 = vmatpush3.bf16.xpose.msra.mxu1 %v7280_v63  ;;  %v7295_v9 = vpack.c.bf16 %v1126_v1, %v1126_v1 }
 0x2d7   : > { %5796 = vmatprep.subr.bf16.mxu1 %v6876_v26 }
 0x2d8   : > { %v7287_v3 = vpop.f32.mrb[12].mxu1 }
 0x2d9   : > { %v1131_v5 = vpop.f32.mrb[13].mxu1 }
 0x2da   : > { %v7293_v6 = vpop.f32.mrb[14].mxu1  ;;  %v1132_v13 = vadd.f32 %v1131_v5, %v937_v54 }
 0x2db   : > { %v1135_v7 = vpop.f32.mrb[15].mxu1 }
 0x2dc   : > { %v1136_v10 = vadd.f32 %v1135_v7, %v937_v54  ;;  %v7312_v16 = vpack.c.bf16 %v1132_v13, %v1132_v13 }
 0x2dd   : > { %5793 = vmatmul.mubr.bf16.vlgmr.msra.gmra.mrb[16].mxu1 %v1291_v11 }
 0x2de   : > { %v7300_v14 = vpack.c.bf16 %v1136_v10, %v1136_v10  ;;  %5797 = vmatpush3.bf16.xpose.msra.mxu1 %v7295_v9  ;;  %5798 = vmatprep.mubr.msk.bf16.mxu1 %vm6877_vm0, %v6876_v26 }
 0x2df   : > { %5802 = vmatprep.subr.bf16.mxu1 %v6876_v26 }
 0x2e0   : > { %5809 = vmatpush3.bf16.xpose.msra.mxu0 %v7300_v14 }
 0x2e1   : > { %5820 = vmatprep.subr.bf16.mxu0 %v6876_v26 }
 0x2e4   : > { %v5788_v30 = vpop.f32.mrb[12].mxu0 }
 0x2e5   : > { %5799 = vmatmul.mubr.bf16.vlgmr.msra.gmra.mrb[20].mxu1 %v1292_v18  ;;  %v1172_v31 = vpop.f32.mrb[13].mxu0  ;;  %v7370_v32 = vadd.f32 %v5788_v30, %v941_v29 }
 0x2e6   : > { %5803 = vmatpush3.bf16.xpose.msra.mxu1 %v7312_v16  ;;  %5804 = vmatprep.mubr.msk.bf16.mxu1 %vm6877_vm0, %v6876_v26  ;;  %v5789_v33 = vpop.f32.mrb[14].mxu0  ;;  %v1173_v40 = vadd.f32 %v1172_v31, %v941_v29 }
 0x2e7   : > { %5811 = vmatmul.mubr.bf16.vlgmr.msra.gmra.mrb[16].mxu0 %v1294_v19  ;;  %5814 = vmatprep.subr.bf16.mxu1 %v6876_v26  ;;  %v7372_v36 = vadd.f32 %v5789_v33, %v941_v29  ;;  %v1175_v37 = vpop.f32.mrb[15].mxu0 }
 0x2e8   : > { %5821 = vmatpush3.bf16.xpose.msra.mxu0 %v7295_v9  ;;  %5822 = vmatprep.mubr.msk.bf16.mxu0 %vm6877_vm0, %v6876_v26  ;;  %v1176_v41 = vadd.f32 %v1175_v37, %v941_v29  ;;  %v7374_v43 = vpack.c.bf16 %v1173_v40, %v1173_v40 }
 0x2e9   : > { %5832 = vmatprep.subr.bf16.mxu0 %v6876_v26 }
 0x2ea   : > { %v7376_v46 = vpack.c.bf16 %v1176_v41, %v1176_v41  ;;  %v1722_v47 = vsel %vm7335_vm6, %v7374_v43, 0 }
 0x2eb   : > { %v1735_v49 = vsel %vm1733_vm7, %v1722_v47, 0 }
 0x2ec   : > { %v1723_v34 = vsel %vm7335_vm6, %v7376_v46, 0 }
 0x2ed   : > { %5805 = vmatmul.mubr.bf16.vlgmr.msra.gmra.mrb[24].mxu1 %v1293_v21  ;;  %v1781_v54 = vsel %vm1733_vm7, %v1723_v34, 0 }
 0x2ee   : > { %5815 = vmatpush3.bf16.xpose.msra.mxu1 %v7280_v63  ;;  %5816 = vmatprep.mubr.msk.bf16.mxu1 %vm6877_vm0, %v6876_v26 }
 0x2ef   : > { %5823 = vmatmul.mubr.bf16.vlgmr.msra.gmra.mrb[20].mxu0 %v1515_v23  ;;  %5826 = vmatprep.subr.bf16.mxu1 %v6876_v26 }
 0x2f0   : > { %5833 = vmatpush3.bf16.xpose.msra.mxu0 %v7300_v14  ;;  %5834 = vmatprep.mubr.msk.bf16.mxu0 %vm6877_vm0, %v6876_v26 }
 0x2f1   : > { %5844 = vmatprep.subr.bf16.mxu0 %v6876_v26 }
 0x2f5   : > { %5817 = vmatmul.mubr.bf16.vlgmr.msra.gmra.mrb[28].mxu1 %v1514_v24 }
 0x2f6   : > { %5827 = vmatpush3.bf16.xpose.msra.mxu1 %v7312_v16  ;;  %5828 = vmatprep.mubr.msk.bf16.mxu1 %vm6877_vm0, %v6876_v26 }
 0x2f7   : > { %5835 = vmatmul.mubr.bf16.vlgmr.msra.gmra.mrb[24].mxu0 %v1517_v25  ;;  %5838 = vmatprep.subr.bf16.mxu1 %v6876_v26 }
 0x2f8   : > { %5846 = vmatprep.mubr.msk.bf16.mxu0 %vm6877_vm0, %v6876_v26  ;;  %5845 = vmatpush3.bf16.msra.mxu0 %v1781_v54 }
 0x2f9   : > { %5856 = vmatprep.subr.bf16.mxu0 %v6876_v26 }
 0x2fd   : > { %5829 = vmatmul.mubr.bf16.vlgmr.msra.gmra.mrb[32].mxu1 %v1516_v27 }
 0x2fe   : > { %5840 = vmatprep.mubr.msk.bf16.mxu1 %vm6877_vm0, %v6876_v26  ;;  %5839 = vmatpush3.bf16.msra.mxu1 %v1735_v49 }
 0x2ff   : > { %5850 = vmatprep.subr.bf16.mxu1 %v6876_v26 }
 0x3b0   : > { %v1329_v55 = vpop.f32.mrb[16].mxu1 }
 0x3b1   : > { %v5794_v57 = vpop.f32.mrb[17].mxu1 }
 0x3b2   : > { %v1332_v59 = vpop.f32.mrb[18].mxu1  ;;  %v1456_v57 = vsel %vm1455_vm8, %v1329_v55, -inf }
 0x3b3   : > { %v5795_v61 = vpop.f32.mrb[19].mxu1 }
 0x3b8   : > { %v7388_v62 = vpop.f32.mrb[20].mxu1 }
 0x3b9   : > { %v5800_v1 = vpop.f32.mrb[21].mxu1 }
 0x3ba   : > { %v1372_v5 = vpop.f32.mrb[22].mxu1  ;;  %v7390_v7 = vpop.f32.mrb[16].mxu0 }
 0x3bb   : > { %v5801_v8 = vpop.f32.mrb[23].mxu1  ;;  %v5812_v10 = vpop.f32.mrb[17].mxu0 }
 0x3bc   : > { %v1452_v11 = vpop.f32.mrb[18].mxu0  ;;  %v1459_v10 = vsel %vm1455_vm8, %v7388_v62, -inf }
 0x3bd   : > { %v5813_v12 = vpop.f32.mrb[19].mxu0  ;;  %v1465_v11 = vsel %vm1455_vm8, %v7390_v7, -inf }
 0x3c0   : > { %v1409_v13 = vpop.f32.mrb[24].mxu1 }
 0x3c1   : > { %v5806_v17 = vpop.f32.mrb[25].mxu1  ;;  %v1462_v5 = vsel %vm1455_vm8, %v1409_v13, -inf }
 0x3c2   : > { %v1412_v18 = vpop.f32.mrb[26].mxu1  ;;  %v1592_v19 = vpop.f32.mrb[20].mxu0 }
 0x3c3   : > { %v5807_v21 = vpop.f32.mrb[27].mxu1  ;;  %v5824_v23 = vpop.f32.mrb[21].mxu0  ;;  %v1681_v34 = vsel %vm1455_vm8, %v1592_v19, -inf }
 0x3c4   : > { %v1595_v24 = vpop.f32.mrb[22].mxu0 }
 0x3c5   : > { %v5825_v25 = vpop.f32.mrb[23].mxu0 }
 0x3c8   : > { %v1552_v27 = vpop.f32.mrb[28].mxu1 }
 0x3c9   : > { %v5818_v29 = vpop.f32.mrb[29].mxu1  ;;  %v1678_v30 = vsel %vm1455_vm8, %v1552_v27, -inf }
 0x3ca   : > { %v1672_v31 = vpop.f32.mrb[24].mxu0  ;;  %1679 = vmax.xlane.f32.xlu0 %v1678_v30  ;;  %v1555_v33 = vpop.f32.mrb[30].mxu1 }
 0x3cb   : > { %v5819_v37 = vpop.f32.mrb[31].mxu1  ;;  %v5836_v40 = vpop.f32.mrb[25].mxu0  ;;  %v1687_v8 = vsel %vm1455_vm8, %v1672_v31, -inf }
 0x3cc   : > { %v1675_v41 = vpop.f32.mrb[26].mxu0 }
 0x3cd   : > { %v5837_v47 = vpop.f32.mrb[27].mxu0 }
 0x3ce   : > { %1682 = vmax.xlane.f32.xlu0 %v1681_v34 }
 0x3d0   : > { %v1632_v49 = vpop.f32.mrb[32].mxu1 }
 0x3d1   : > { %v5830_v54 = vpop.f32.mrb[33].mxu1  ;;  %v1684_v59 = vsel %vm1455_vm8, %v1632_v49, -inf }
 0x3d2   : > { %1457 = vmax.xlane.f32.xlu0 %v1456_v57  ;;  %1685 = vmax.xlane.f32.xlu1 %v1684_v59  ;;  %v1635_v61 = vpop.f32.mrb[34].mxu1 }
 0x3d3   : > { %v5831_v1 = vpop.f32.mrb[35].mxu1 }
 0x3d6   : > { %1463 = vmax.xlane.f32.xlu0 %v1462_v5  ;;  %1688 = vmax.xlane.f32.xlu1 %v1687_v8 }
 0x3da   : > { %1460 = vmax.xlane.f32.xlu1 %v1459_v10 }
 0x3de   : > { %1466 = vmax.xlane.f32.xlu1 %v1465_v11 }
 0x457   : > { %v1680_v12 = vpop.xlane.xlu0 %1679 }
 0x458   : > { %v1690_v17 = vsub.f32 %v1552_v27, %v1680_v12 }
 0x45a   : > { %v1694_v18 = vmul.f32 1.442695, %v1690_v17 }
 0x45b   : > { %v1683_v21 = vpop.xlane.xlu0 %1682 }
 0x45c   : > { %6479 = vpow2.f32 %v1694_v18  ;;  %v1691_v23 = vsub.f32 %v1592_v19, %v1683_v21 }
 0x45e   : > { %v1696_v24 = vmul.f32 1.442695, %v1691_v23 }
 0x45f   : > { %v1458_v25 = vpop.xlane.xlu0 %1457  ;;  %v1686_v29 = vpop.xlane.xlu1 %1685 }
 0x460   : > { %6481 = vpow2.f32 %v1696_v24  ;;  %v1468_v30 = vsub.f32 %v1329_v55, %v1458_v25  ;;  %v1692_v33 = vsub.f32 %v1632_v49, %v1686_v29 }
 0x462   : > { %v1698_v37 = vmul.f32 1.442695, %v1692_v33  ;;  %v1472_v40 = vmul.f32 1.442695, %v1468_v30 }
 0x463   : > { %v1464_v41 = vpop.xlane.xlu0 %1463  ;;  %v1689_v47 = vpop.xlane.xlu1 %1688 }
 0x464   : > { %v1470_v34 = vsub.f32 %v1409_v13, %v1464_v41  ;;  %v1693_v54 = vsub.f32 %v1672_v31, %v1689_v47  ;;  %6483 = vpow2.f32 %v1698_v37  ;;  %v7423_v37 = vpack.c.bf16 %v7370_v32, %v7370_v32 }
 0x465   : > { %6485 = vpow2.f32 %v1472_v40 }
 0x466   : > { %v6480_v57 = vpop.eup %6479  ;;  %v1700_v59 = vmul.f32 1.442695, %v1693_v54  ;;  %v1476_v27 = vmul.f32 1.442695, %v1470_v34  ;;  %v7427_v34 = vpack.c.bf16 %v7372_v36, %v7372_v36 }
 0x467   : > { %v1461_v61 = vpop.xlane.xlu1 %1460  ;;  %v1702_v19 = vsel %vm1455_vm8, %v6480_v57, 0.0 }
 0x468   : > { %v1469_v1 = vsub.f32 %v7388_v62, %v1461_v61  ;;  %1703 = vadd.xlane.f32.xlu0 %v1702_v19  ;;  %6487 = vpow2.f32 %v1700_v59  ;;  %v1725_v36 = vsel %vm7335_vm6, %v7427_v34, 0 }
 0x469   : > { %6489 = vpow2.f32 %v1476_v27  ;;  %v1724_v27 = vsel %vm7335_vm6, %v7423_v37, 0 }
 0x46a   : > { %v6482_v55 = vpop.eup %6481  ;;  %v1474_v49 = vmul.f32 1.442695, %v1469_v1  ;;  %v1827_v1 = vsel %vm1733_vm7, %v1724_v27, 0 }
 0x46b   : > { %v1467_v5 = vpop.xlane.xlu1 %1466  ;;  %v1705_v8 = vsel %vm1455_vm8, %v6482_v55, 0.0 }
 0x46c   : > { %6491 = vpow2.f32 %v1474_v49  ;;  %v1471_v13 = vsub.f32 %v7390_v7, %v1467_v5  ;;  %1706 = vadd.xlane.f32.xlu1 %v1705_v8 }
 0x46e   : > { %v1478_v31 = vmul.f32 1.442695, %v1471_v13  ;;  %v6484_v10 = vpop.eup %6483 }
 0x46f   : > { %v1708_v11 = vsel %vm1455_vm8, %v6484_v10, 0.0  ;;  %v6486_v12 = vpop.eup %6485 }
 0x470   : > { %6493 = vpow2.f32 %v1478_v31  ;;  %1709 = vadd.xlane.f32.xlu0 %v1708_v11  ;;  %v1480_v17 = vsel %vm1455_vm8, %v6486_v12, 0.0  ;;  %v1500_v31 = vsel %vm7289_vm2, %v7374_v43, 0 }
 0x472   : > { %v6488_v62 = vpop.eup %6487 }
 0x473   : > { %v1711_v18 = vsel %vm1455_vm8, %v6488_v62, 0.0  ;;  %v7409_v21 = vpop.eup %6489 }
 0x474   : > { %1481 = vadd.xlane.f32.xlu0 %v1480_v17  ;;  %1712 = vadd.xlane.f32.xlu1 %v1711_v18  ;;  %v1486_v24 = vsel %vm1455_vm8, %v7409_v21, 0.0 }
 0x476   : > { %v7411_v23 = vpop.eup %6491 }
 0x477   : > { %v1483_v7 = vsel %vm1455_vm8, %v7411_v23, 0.0 }
 0x478   : > { %1487 = vadd.xlane.f32.xlu0 %v1486_v24  ;;  %1484 = vadd.xlane.f32.xlu1 %v1483_v7  ;;  %v1919_v24 = vsel %vm1733_vm7, %v1500_v31, 0  ;;  %v2108_v31 = vsel %vm7487_vm12, %v7310_v15, 0 }
 0x47a   : > { %v7417_v25 = vpop.eup %6493 }
 0x47b   : > { %v1489_v29 = vsel %vm1455_vm8, %v7417_v25, 0.0 }
 0x47c   : > { %1490 = vadd.xlane.f32.xlu1 %v1489_v29 }
 0x4f5   : > { %v1704_v30 = vpop.xlane.xlu0 %1703 }
 0x4f6   : > { %6495 = vrcp.f32 %v1704_v30  ;;  %v1501_v30 = vsel %vm7289_vm2, %v7376_v46, 0 }
 0x4f9   : > { %v1707_v33 = vpop.xlane.xlu1 %1706 }
 0x4fa   : > { %6497 = vrcp.f32 %v1707_v33 }
 0x4fd   : > { %v1710_v40 = vpop.xlane.xlu0 %1709 }
 0x4fe   : > { %6499 = vrcp.f32 %v1710_v40 }
 0x500   : > { %v6496_v41 = vpop.eup %6495 }
 0x501   : > { %v1718_v47 = vmul.f32 %v6496_v41, %v6480_v57  ;;  %v1482_v54 = vpop.xlane.xlu0 %1481  ;;  %v1713_v59 = vpop.xlane.xlu1 %1712  ;;  %v1965_v41 = vsel %vm1733_vm7, %v1501_v30, 0 }
 0x502   : > { %6501 = vrcp.f32 %v1482_v54 }
 0x503   : > { %v1726_v61 = vpack.c.bf16 %v1718_v47, %v1718_v47  ;;  %6503 = vrcp.f32 %v1713_v59 }
 0x504   : > { %v6498_v19 = vpop.eup %6497 }
 0x505   : > { %v1719_v32 = vmul.f32 %v6498_v19, %v6482_v55  ;;  %5841 = vmatmul.mubr.msk.bf16.vlgmr.msra.gmra.mrb[36].mxu1 %vm1455_vm8, %v1726_v61  ;;  %v1485_v57 = vpop.xlane.xlu1 %1484  ;;  %v1488_v5 = vpop.xlane.xlu0 %1487  ;;  %v1873_v55 = vsel %vm1733_vm7, %v1725_v36, 0  ;;  %v1503_v61 = vsel %vm7289_vm2, %v7427_v34, 0 }
 0x506   : > { %5851 = vmatpush3.bf16.msra.mxu1 %v1827_v1  ;;  %5852 = vmatprep.mubr.msk.bf16.mxu1 %vm6877_vm0, %v6876_v26  ;;  %6505 = vrcp.f32 %v1485_v57 }
 0x507   : > { %v1727_v49 = vpack.c.bf16 %v1719_v32, %v1719_v32  ;;  %5862 = vmatprep.subr.bf16.mxu1 %v6876_v26  ;;  %6507 = vrcp.f32 %v1488_v5  ;;  %v2057_v32 = vsel %vm1733_vm7, %v1503_v61, 0  ;;  %v2313_v5 = vsel %vm7487_vm12, %v7374_v43, 0 }
 0x508   : > { %v6500_v8 = vpop.eup %6499 }
 0x509   : > { %5847 = vmatmul.mubr.msk.bf16.vlgmr.msra.gmra.mrb[28].mxu0 %vm1455_vm8, %v1727_v49  ;;  %v1720_v13 = vmul.f32 %v6500_v8, %v6484_v10  ;;  %v1491_v18 = vpop.xlane.xlu1 %1490  ;;  %v2106_v49 = vsel %vm7487_vm12, %v7306_v2, 0  ;;  %v2107_v8 = vsel %vm7487_vm12, %v7326_v20, 0 }
 0x50a   : > { %5857 = vmatpush3.bf16.msra.mxu0 %v1873_v55  ;;  %5858 = vmatprep.mubr.msk.bf16.mxu0 %vm6877_vm0, %v6876_v26  ;;  %6509 = vrcp.f32 %v1491_v18  ;;  %v2325_v55 = vsel %vm1733_vm7, %v2313_v5, 0 }
 0x50b   : > { %5868 = vmatprep.subr.bf16.mxu0 %v6876_v26  ;;  %v1728_v11 = vpack.c.bf16 %v1720_v13, %v1720_v13  ;;  %v2314_v13 = vsel %vm7487_vm12, %v7376_v46, 0 }
 0x50c   : > { %v6502_v17 = vpop.eup %6501 }
 0x50d   : > { %v6504_v7 = vpop.eup %6503  ;;  %5853 = vmatmul.mubr.msk.bf16.vlgmr.msra.gmra.mrb[40].mxu1 %vm1455_vm8, %v1728_v11  ;;  %v1496_v29 = vmul.f32 %v6502_v17, %v6486_v12  ;;  %v2371_v11 = vsel %vm1733_vm7, %v2314_v13, 0 }
 0x50e   : > { %v1721_v10 = vmul.f32 %v6504_v7, %v6488_v62  ;;  %5863 = vmatpush3.bf16.msra.mxu1 %v1919_v24  ;;  %5864 = vmatprep.mubr.msk.bf16.mxu1 %vm6877_vm0, %v6876_v26  ;;  %v1502_v62 = vsel %vm7289_vm2, %v7423_v37, 0 }
 0x50f   : > { %5874 = vmatprep.subr.bf16.mxu1 %v6876_v26  ;;  %v1504_v47 = vpack.c.bf16 %v1496_v29, %v1496_v29  ;;  %v2011_v59 = vsel %vm1733_vm7, %v1502_v62, 0 }
 0x510   : > { %v1729_v33 = vpack.c.bf16 %v1721_v10, %v1721_v10  ;;  %v6506_v40 = vpop.eup %6505 }
 0x511   : > { %v6508_v12 = vpop.eup %6507  ;;  %v1497_v54 = vmul.f32 %v6506_v40, %v7411_v23 }
 0x512   : > { %5859 = vmatmul.mubr.msk.bf16.vlgmr.msra.gmra.mrb[32].mxu0 %vm1455_vm8, %v1729_v33  ;;  %v1498_v27 = vmul.f32 %v6508_v12, %v7409_v21 }
 0x513   : > { %5869 = vmatpush3.bf16.msra.mxu0 %v1965_v41  ;;  %5870 = vmatprep.mubr.msk.bf16.mxu0 %vm6877_vm0, %v6876_v26  ;;  %v1505_v19 = vpack.c.bf16 %v1497_v54, %v1497_v54 }
 0x514   : > { %5880 = vmatprep.subr.bf16.mxu0 %v6876_v26  ;;  %v6510_v23 = vpop.eup %6509  ;;  %v1506_v1 = vpack.c.bf16 %v1498_v27, %v1498_v27 }
 0x515   : > { %5865 = vmatmul.mubr.msk.bf16.vlgmr.msra.gmra.mrb[36].mxu1 %vm1455_vm8, %v1504_v47  ;;  %v1499_v21 = vmul.f32 %v6510_v23, %v7417_v25  ;;  %v2105_v25 = vsel %vm7487_vm12, %v7285_v0, 0  ;;  %v2517_v0 = vsel %vm7560_vm14, %v7326_v20, 0 }
 0x516   : > { %5875 = vmatpush3.bf16.msra.mxu1 %v2011_v59  ;;  %5876 = vmatprep.mubr.msk.bf16.mxu1 %vm6877_vm0, %v6876_v26 }
 0x517   : > { %5886 = vmatprep.subr.bf16.mxu1 %v6876_v26  ;;  %v1507_v57 = vpack.c.bf16 %v1499_v21, %v1499_v21 }
 0x51a   : > { %5871 = vmatmul.mubr.msk.bf16.vlgmr.msra.gmra.mrb[28].mxu0 %vm1455_vm8, %v1505_v19 }
 0x51b   : > { %5881 = vmatpush3.bf16.msra.mxu0 %v2057_v32  ;;  %5882 = vmatprep.mubr.msk.bf16.mxu0 %vm6877_vm0, %v6876_v26 }
 0x51c   : > { %5892 = vmatprep.subr.bf16.mxu0 %v6876_v26 }
 0x51d   : > { %5877 = vmatmul.mubr.msk.bf16.vlgmr.msra.gmra.mrb[40].mxu1 %vm1455_vm8, %v1506_v1 }
 0x51e   : > { %5888 = vmatprep.mubr.msk.bf16.mxu1 %vm6877_vm0, %v6876_v26 }
 0x51f   : > { %5887 = vmatpush3.bf16.xpose.msra.mxu1 %v7280_v63 }
 0x520   : > { %5898 = vmatprep.subr.bf16.mxu1 %v6876_v26 }
 0x522   : > { %5883 = vmatmul.mubr.msk.bf16.vlgmr.msra.gmra.mrb[32].mxu0 %vm1455_vm8, %v1507_v57 }
 0x523   : > { %5894 = vmatprep.mubr.msk.bf16.mxu0 %vm6877_vm0, %v6876_v26 }
 0x524   : > { %5893 = vmatpush3.bf16.xpose.msra.mxu0 %v7295_v9 }
 0x525   : > { %5904 = vmatprep.subr.bf16.mxu0 %v6876_v26 }
 0x526   : > { %5889 = vmatmul.mubr.bf16.vlgmr.msra.gmra.mrb[44].mxu1 %v2105_v25 }
 0x527   : > { %5899 = vmatpush3.bf16.xpose.msra.mxu1 %v7312_v16  ;;  %5900 = vmatprep.mubr.msk.bf16.mxu1 %vm6877_vm0, %v6876_v26 }
 0x528   : > { %5910 = vmatprep.subr.bf16.mxu1 %v6876_v26 }
 0x52b   : > { %5895 = vmatmul.mubr.bf16.vlgmr.msra.gmra.mrb[36].mxu0 %v2106_v49 }
 0x52c   : > { %5905 = vmatpush3.bf16.xpose.msra.mxu0 %v7300_v14  ;;  %5906 = vmatprep.mubr.msk.bf16.mxu0 %vm6877_vm0, %v6876_v26 }
 0x52d   : > { %5916 = vmatprep.subr.bf16.mxu0 %v6876_v26 }
 0x52e   : > { %5901 = vmatmul.mubr.bf16.vlgmr.msra.gmra.mrb[48].mxu1 %v2107_v8 }
 0x52f   : > { %5911 = vmatpush3.bf16.msra.mxu1 %v2325_v55  ;;  %5912 = vmatprep.mubr.msk.bf16.mxu1 %vm6877_vm0, %v6876_v26 }
 0x530   : > { %5922 = vmatprep.subr.bf16.mxu1 %v6876_v26 }
 0x533   : > { %5907 = vmatmul.mubr.bf16.vlgmr.msra.gmra.mrb[40].mxu0 %v2108_v31 }
 0x534   : > { %5917 = vmatpush3.bf16.msra.mxu0 %v2371_v11  ;;  %5918 = vmatprep.mubr.msk.bf16.mxu0 %vm6877_vm0, %v6876_v26 }
 0x535   : > { %5928 = vmatprep.subr.bf16.mxu0 %v6876_v26 }
 0x5f9   : > { %v2143_v17 = vpop.f32.mrb[44].mxu1 }
 0x5fa   : > { %v5890_v18 = vpop.f32.mrb[45].mxu1  ;;  %v2269_v7 = vsel %vm1455_vm8, %v2143_v17, -inf }
 0x5fb   : > { %2270 = vmax.xlane.f32.xlu0 %v2269_v7  ;;  %v2146_v24 = vpop.f32.mrb[46].mxu1 }
 0x5fc   : > { %v5891_v10 = vpop.f32.mrb[47].mxu1 }
 0x5fe   : > { %v2183_v29 = vpop.f32.mrb[36].mxu0 }
 0x5ff   : > { %v5896_v30 = vpop.f32.mrb[37].mxu0  ;;  %v2272_v33 = vsel %vm1455_vm8, %v2183_v29, -inf }
 0x600   : > { %2273 = vmax.xlane.f32.xlu1 %v2272_v33  ;;  %v2186_v40 = vpop.f32.mrb[38].mxu0 }
 0x601   : > { %v5897_v41 = vpop.f32.mrb[39].mxu0  ;;  %v2223_v62 = vpop.f32.mrb[48].mxu1 }
 0x602   : > { %v5902_v47 = vpop.f32.mrb[49].mxu1  ;;  %v2275_v12 = vsel %vm1455_vm8, %v2223_v62, -inf }
 0x603   : > { %2276 = vmax.xlane.f32.xlu0 %v2275_v12  ;;  %v2226_v54 = vpop.f32.mrb[50].mxu1 }
 0x604   : > { %v5903_v59 = vpop.f32.mrb[51].mxu1 }
 0x606   : > { %v2263_v27 = vpop.f32.mrb[40].mxu0 }
 0x607   : > { %v5908_v61 = vpop.f32.mrb[41].mxu0  ;;  %v2278_v19 = vsel %vm1455_vm8, %v2263_v27, -inf }
 0x608   : > { %2279 = vmax.xlane.f32.xlu1 %v2278_v19  ;;  %v2266_v23 = vpop.f32.mrb[42].mxu0 }
 0x609   : > { %v5909_v32 = vpop.f32.mrb[43].mxu0 }
 0x688   : > { %v2271_v1 = vpop.xlane.xlu0 %2270 }
 0x689   : > { %v2281_v21 = vsub.f32 %v2143_v17, %v2271_v1  ;;  %v2316_v1 = vsel %vm7487_vm12, %v7427_v34, 0 }
 0x68b   : > { %v2285_v57 = vmul.f32 1.442695, %v2281_v21 }
 0x68d   : > { %6511 = vpow2.f32 %v2285_v57  ;;  %v2274_v25 = vpop.xlane.xlu1 %2273 }
 0x68e   : > { %v2282_v49 = vsub.f32 %v2183_v29, %v2274_v25 }
 0x690   : > { %v2287_v5 = vmul.f32 1.442695, %v2282_v49  ;;  %v2277_v8 = vpop.xlane.xlu0 %2276  ;;  %v2463_v49 = vsel %vm1733_vm7, %v2316_v1, 0 }
 0x691   : > { %v2283_v55 = vsub.f32 %v2223_v62, %v2277_v8 }
 0x692   : > { %6513 = vpow2.f32 %v2287_v5 }
 0x693   : > { %v2289_v13 = vmul.f32 1.442695, %v2283_v55 }
 0x695   : > { %6515 = vpow2.f32 %v2289_v13  ;;  %v2280_v31 = vpop.xlane.xlu1 %2279 }
 0x696   : > { %v2284_v11 = vsub.f32 %v2263_v27, %v2280_v31  ;;  %v2315_v27 = vsel %vm7487_vm12, %v7423_v37, 0  ;;  %v4534_v31 = vld [vmem:[#allocation8 + $0xb8] sm:$0xf] }
 0x697   : > { %v6512_v18 = vpop.eup %6511  ;;  %v2417_v23 = vsel %vm1733_vm7, %v2315_v27, 0 }
 0x698   : > { %v2291_v7 = vmul.f32 1.442695, %v2284_v11  ;;  %v2293_v24 = vsel %vm1455_vm8, %v6512_v18, 0.0 }
 0x699   : > { %2294 = vadd.xlane.f32.xlu0 %v2293_v24 }
 0x69a   : > { %6517 = vpow2.f32 %v2291_v7 }
 0x69c   : > { %v6514_v10 = vpop.eup %6513 }
 0x69d   : > { %v2296_v17 = vsel %vm1455_vm8, %v6514_v10, 0.0 }
 0x69e   : > { %2297 = vadd.xlane.f32.xlu1 %v2296_v17 }
 0x69f   : > { %v6516_v30 = vpop.eup %6515 }
 0x6a0   : > { %v2299_v29 = vsel %vm1455_vm8, %v6516_v30, 0.0 }
 0x6a1   : > { %2300 = vadd.xlane.f32.xlu0 %v2299_v29 }
 0x6a4   : > { %v6518_v33 = vpop.eup %6517 }
 0x6a5   : > { %v2302_v40 = vsel %vm1455_vm8, %v6518_v33, 0.0 }
 0x6a6   : > { %2303 = vadd.xlane.f32.xlu1 %v2302_v40 }
 0x726   : > { %v2295_v41 = vpop.xlane.xlu0 %2294 }
 0x727   : > { %6519 = vrcp.f32 %v2295_v41 }
 0x72b   : > { %v2298_v62 = vpop.xlane.xlu1 %2297 }
 0x72c   : > { %6521 = vrcp.f32 %v2298_v62 }
 0x72e   : > { %v2301_v47 = vpop.xlane.xlu0 %2300 }
 0x72f   : > { %6523 = vrcp.f32 %v2301_v47 }
 0x731   : > { %v6520_v12 = vpop.eup %6519 }
 0x732   : > { %v2309_v54 = vmul.f32 %v6520_v12, %v6512_v18 }
 0x733   : > { %v2304_v59 = vpop.xlane.xlu1 %2303 }
 0x734   : > { %6525 = vrcp.f32 %v2304_v59  ;;  %v2317_v61 = vpack.c.bf16 %v2309_v54, %v2309_v54 }
 0x736   : > { %v6522_v19 = vpop.eup %6521  ;;  %5913 = vmatmul.mubr.msk.bf16.vlgmr.msra.gmra.mrb[36].mxu1 %vm1455_vm8, %v2317_v61 }
 0x737   : > { %v2310_v32 = vmul.f32 %v6522_v19, %v6514_v10  ;;  %5923 = vmatpush3.bf16.msra.mxu1 %v2417_v23  ;;  %5924 = vmatprep.mubr.msk.bf16.mxu1 %vm6877_vm0, %v6876_v26 }
 0x738   : > { %5934 = vmatprep.subr.bf16.mxu1 %v6876_v26 }
 0x739   : > { %v6524_v21 = vpop.eup %6523  ;;  %v2318_v57 = vpack.c.bf16 %v2310_v32, %v2310_v32 }
 0x73a   : > { %v2311_v25 = vmul.f32 %v6524_v21, %v6516_v30 }
 0x73b   : > { %5919 = vmatmul.mubr.msk.bf16.vlgmr.msra.gmra.mrb[28].mxu0 %vm1455_vm8, %v2318_v57 }
 0x73c   : > { %5929 = vmatpush3.bf16.msra.mxu0 %v2463_v49  ;;  %v2319_v5 = vpack.c.bf16 %v2311_v25, %v2311_v25  ;;  %5930 = vmatprep.mubr.msk.bf16.mxu0 %vm6877_vm0, %v6876_v26 }
 0x73d   : > { %5940 = vmatprep.subr.bf16.mxu0 %v6876_v26 }
 0x73e   : > { %v6526_v8 = vpop.eup %6525  ;;  %5925 = vmatmul.mubr.msk.bf16.vlgmr.msra.gmra.mrb[40].mxu1 %vm1455_vm8, %v2319_v5 }
 0x73f   : > { %v2312_v55 = vmul.f32 %v6526_v8, %v6518_v33  ;;  %5936 = vmatprep.mubr.msk.bf16.mxu1 %vm6877_vm0, %v6876_v26 }
 0x740   : > { %5935 = vmatpush3.bf16.xpose.msra.mxu1 %v7280_v63  ;;  %v2516_v63 = vsel %vm7560_vm14, %v7306_v2, 0  ;;  %v2518_v2 = vsel %vm7560_vm14, %v7310_v15, 0 }
 0x741   : > { %v2320_v13 = vpack.c.bf16 %v2312_v55, %v2312_v55  ;;  %5946 = vmatprep.subr.bf16.mxu1 %v6876_v26 }
 0x743   : > { %5931 = vmatmul.mubr.msk.bf16.vlgmr.msra.gmra.mrb[32].mxu0 %vm1455_vm8, %v2320_v13 }
 0x744   : > { %5942 = vmatprep.mubr.msk.bf16.mxu0 %vm6877_vm0, %v6876_v26 }
 0x745   : > { %5941 = vmatpush3.bf16.xpose.msra.mxu0 %v7295_v9  ;;  %v2723_v9 = vsel %vm7560_vm14, %v7374_v43, 0 }
 0x746   : > { %5952 = vmatprep.subr.bf16.mxu0 %v6876_v26 }
 0x747   : > { %5937 = vmatmul.mubr.bf16.vlgmr.msra.gmra.mrb[52].mxu1 %v2515_v58 }
 0x748   : > { %5947 = vmatpush3.bf16.xpose.msra.mxu1 %v7312_v16  ;;  %5948 = vmatprep.mubr.msk.bf16.mxu1 %vm6877_vm0, %v6876_v26  ;;  %v2735_v16 = vsel %vm1733_vm7, %v2723_v9, 0 }
 0x749   : > { %5958 = vmatprep.subr.bf16.mxu1 %v6876_v26 }
 0x74c   : > { %5943 = vmatmul.mubr.bf16.vlgmr.msra.gmra.mrb[44].mxu0 %v2516_v63 }
 0x74d   : > { %5953 = vmatpush3.bf16.xpose.msra.mxu0 %v7300_v14  ;;  %5954 = vmatprep.mubr.msk.bf16.mxu0 %vm6877_vm0, %v6876_v26  ;;  %v2724_v14 = vsel %vm7560_vm14, %v7376_v46, 0 }
 0x74e   : > { %5964 = vmatprep.subr.bf16.mxu0 %v6876_v26  ;;  %v2781_v20 = vsel %vm1733_vm7, %v2724_v14, 0 }
 0x74f   : > { %5949 = vmatmul.mubr.bf16.vlgmr.msra.gmra.mrb[56].mxu1 %v2517_v0 }
 0x750   : > { %5959 = vmatpush3.bf16.msra.mxu1 %v2735_v16  ;;  %5960 = vmatprep.mubr.msk.bf16.mxu1 %vm6877_vm0, %v6876_v26 }
 0x751   : > { %5970 = vmatprep.subr.bf16.mxu1 %v6876_v26 }
 0x754   : > { %5955 = vmatmul.mubr.bf16.vlgmr.msra.gmra.mrb[48].mxu0 %v2518_v2 }
 0x755   : > { %5965 = vmatpush3.bf16.msra.mxu0 %v2781_v20  ;;  %5966 = vmatprep.mubr.msk.bf16.mxu0 %vm6877_vm0, %v6876_v26 }
 0x756   : > { %5976 = vmatprep.subr.bf16.mxu0 %v6876_v26 }
 0x81a   : > { %v2553_v43 = vpop.f32.mrb[52].mxu1 }
 0x81b   : > { %v5938_v11 = vpop.f32.mrb[53].mxu1  ;;  %v2679_v18 = vsel %vm1455_vm8, %v2553_v43, -inf }
 0x81c   : > { %2680 = vmax.xlane.f32.xlu0 %v2679_v18  ;;  %v2556_v46 = vpop.f32.mrb[54].mxu1 }
 0x81d   : > { %v5939_v7 = vpop.f32.mrb[55].mxu1 }
 0x81f   : > { %v2593_v24 = vpop.f32.mrb[44].mxu0 }
 0x820   : > { %v5944_v10 = vpop.f32.mrb[45].mxu0  ;;  %v2682_v15 = vsel %vm1455_vm8, %v2593_v24, -inf }
 0x821   : > { %2683 = vmax.xlane.f32.xlu1 %v2682_v15  ;;  %v2596_v17 = vpop.f32.mrb[46].mxu0 }
 0x822   : > { %v5945_v30 = vpop.f32.mrb[47].mxu0  ;;  %v2633_v29 = vpop.f32.mrb[56].mxu1 }
 0x823   : > { %v5950_v33 = vpop.f32.mrb[57].mxu1  ;;  %v2685_v40 = vsel %vm1455_vm8, %v2633_v29, -inf }
 0x824   : > { %2686 = vmax.xlane.f32.xlu0 %v2685_v40  ;;  %v2636_v41 = vpop.f32.mrb[58].mxu1  ;;  %v933_v40 = vrot.slane %v7268_v52, %v654_v53 }
 0x825   : > { %v5951_v62 = vpop.f32.mrb[59].mxu1 }
 0x826   : > { %v1120_v28 = vadd.f32 %v7274_v56, %v933_v40  ;;  %v7653_v56 = vpack.c.bf16 %v7256_v45, %v7256_v45 }
 0x827   : > { %v2673_v47 = vpop.f32.mrb[48].mxu0 }
 0x828   : > { %v5956_v12 = vpop.f32.mrb[49].mxu0  ;;  %v2688_v54 = vsel %vm1455_vm8, %v2673_v47, -inf }
 0x829   : > { %2689 = vmax.xlane.f32.xlu1 %v2688_v54  ;;  %v2676_v59 = vpop.f32.mrb[50].mxu0  ;;  %v7632_v12 = vpack.c.bf16 %v7243_v35, %v7243_v35  ;;  %v7640_v54 = vpack.c.bf16 %v1120_v28, %v1120_v28  ;;  %v1124_v35 = vadd.f32 %v7278_v60, %v933_v40 }
 0x82a   : > { %v5957_v27 = vpop.f32.mrb[51].mxu0  ;;  %v7644_v59 = vpack.c.bf16 %v7245_v38, %v7245_v38 }
 0x82b   : > { %v1130_v27 = vadd.f32 %v7287_v3, %v933_v40  ;;  %v2919_v38 = vsel %vm7289_vm2, %v7640_v54, 0  ;;  %v7660_v60 = vpack.c.bf16 %v1124_v35, %v1124_v35  ;;  %v7670_v3 = vpack.c.bf16 %v7263_v51, %v7263_v51 }
 0x82d   : > { %v7666_v45 = vpack.c.bf16 %v1130_v27, %v1130_v27 }
 0x8a9   : > { %v2681_v61 = vpop.xlane.xlu0 %2680 }
 0x8aa   : > { %v2691_v19 = vsub.f32 %v2553_v43, %v2681_v61  ;;  %v1134_v61 = vadd.f32 %v7293_v6, %v933_v40 }
 0x8ac   : > { %v2695_v23 = vmul.f32 1.442695, %v2691_v19  ;;  %v2920_v19 = vsel %vm7289_vm2, %v7660_v60, 0  ;;  %v7683_v51 = vpack.c.bf16 %v1134_v61, %v1134_v61 }
 0x8ae   : > { %6527 = vpow2.f32 %v2695_v23  ;;  %v2684_v32 = vpop.xlane.xlu1 %2683  ;;  %v2921_v23 = vsel %vm7289_vm2, %v7666_v45, 0  ;;  %v2922_v6 = vsel %vm7289_vm2, %v7683_v51, 0 }
 0x8af   : > { %v2692_v1 = vsub.f32 %v2593_v24, %v2684_v32  ;;  %v2725_v24 = vsel %vm7560_vm14, %v7423_v37, 0  ;;  %v883_v32 = vadd.f32 %v7254_v44, %v7249_v39  ;;  %v886_v44 = vadd.f32 %v7261_v50, %v7249_v39 }
 0x8b0   : > { %v2827_v17 = vsel %vm1733_vm7, %v2725_v24, 0  ;;  %v3137_v39 = vsel %vm7335_vm6, %v7666_v45, 0 }
 0x8b1   : > { %v2697_v21 = vmul.f32 1.442695, %v2692_v1  ;;  %v2687_v57 = vpop.xlane.xlu0 %2686  ;;  %v3135_v1 = vsel %vm7335_vm6, %v7640_v54, 0 }
 0x8b2   : > { %v2693_v25 = vsub.f32 %v2633_v29, %v2687_v57  ;;  %v2726_v29 = vsel %vm7560_vm14, %v7427_v34, 0  ;;  %v3136_v57 = vsel %vm7335_vm6, %v7660_v60, 0 }
 0x8b3   : > { %6529 = vpow2.f32 %v2697_v21  ;;  %v2873_v62 = vsel %vm1733_vm7, %v2726_v29, 0  ;;  %v7701_v21 = vpack.c.bf16 %v883_v32, %v883_v32 }
 0x8b4   : > { %v2699_v49 = vmul.f32 1.442695, %v2693_v25 }
 0x8b5   : > { %v3343_v25 = vsel %vm7335_vm6, %v7701_v21, 0 }
 0x8b6   : > { %6531 = vpow2.f32 %v2699_v49  ;;  %v2690_v5 = vpop.xlane.xlu1 %2689  ;;  %v7715_v49 = vpack.c.bf16 %v886_v44, %v886_v44  ;;  %v3355_v50 = vsel %vm1733_vm7, %v3343_v25, 0 }
 0x8b7   : > { %v2694_v8 = vsub.f32 %v2673_v47, %v2690_v5 }
 0x8b8   : > { %v6528_v55 = vpop.eup %6527  ;;  %v3344_v5 = vsel %vm7335_vm6, %v7715_v49, 0 }
 0x8b9   : > { %v2701_v13 = vmul.f32 1.442695, %v2694_v8  ;;  %v2703_v58 = vsel %vm1455_vm8, %v6528_v55, 0.0  ;;  %v3138_v8 = vsel %vm7335_vm6, %v7683_v51, 0 }
 0x8ba   : > { %2704 = vadd.xlane.f32.xlu0 %v2703_v58 }
 0x8bb   : > { %6533 = vpow2.f32 %v2701_v13 }
 0x8bd   : > { %v6530_v63 = vpop.eup %6529 }
 0x8be   : > { %v2706_v9 = vsel %vm1455_vm8, %v6530_v63, 0.0 }
 0x8bf   : > { %2707 = vadd.xlane.f32.xlu1 %v2706_v9 }
 0x8c0   : > { %v6532_v0 = vpop.eup %6531 }
 0x8c1   : > { %v2709_v16 = vsel %vm1455_vm8, %v6532_v0, 0.0 }
 0x8c2   : > { %2710 = vadd.xlane.f32.xlu0 %v2709_v16 }
 0x8c5   : > { %v6534_v14 = vpop.eup %6533 }
 0x8c6   : > { %v2712_v2 = vsel %vm1455_vm8, %v6534_v14, 0.0 }
 0x8c7   : > { %2713 = vadd.xlane.f32.xlu1 %v2712_v2 }
 0x947   : > { %v2705_v20 = vpop.xlane.xlu0 %2704 }
 0x948   : > { %6535 = vrcp.f32 %v2705_v20 }
 0x94c   : > { %v2708_v43 = vpop.xlane.xlu1 %2707 }
 0x94d   : > { %6537 = vrcp.f32 %v2708_v43 }
 0x94f   : > { %v2711_v11 = vpop.xlane.xlu0 %2710 }
 0x950   : > { %6539 = vrcp.f32 %v2711_v11 }
 0x952   : > { %v6536_v18 = vpop.eup %6535 }
 0x953   : > { %v2719_v46 = vmul.f32 %v6536_v18, %v6528_v55  ;;  %v3401_v55 = vsel %vm1733_vm7, %v3344_v5, 0 }
 0x954   : > { %v2714_v7 = vpop.xlane.xlu1 %2713 }
 0x955   : > { %6541 = vrcp.f32 %v2714_v7  ;;  %v2727_v10 = vpack.c.bf16 %v2719_v46, %v2719_v46 }
 0x957   : > { %v6538_v15 = vpop.eup %6537  ;;  %5961 = vmatmul.mubr.msk.bf16.vlgmr.msra.gmra.mrb[36].mxu1 %vm1455_vm8, %v2727_v10 }
 0x958   : > { %v2720_v30 = vmul.f32 %v6538_v15, %v6530_v63  ;;  %5971 = vmatpush3.bf16.msra.mxu1 %v2827_v17  ;;  %5972 = vmatprep.mubr.msk.bf16.mxu1 %vm6877_vm0, %v6876_v26 }
 0x959   : > { %5982 = vmatprep.subr.bf16.mxu1 %v6876_v26 }
 0x95a   : > { %v6540_v33 = vpop.eup %6539  ;;  %v2728_v37 = vpack.c.bf16 %v2720_v30, %v2720_v30 }
 0x95b   : > { %v2721_v41 = vmul.f32 %v6540_v33, %v6532_v0 }
 0x95c   : > { %5967 = vmatmul.mubr.msk.bf16.vlgmr.msra.gmra.mrb[28].mxu0 %vm1455_vm8, %v2728_v37 }
 0x95d   : > { %5977 = vmatpush3.bf16.msra.mxu0 %v2873_v62  ;;  %v2729_v47 = vpack.c.bf16 %v2721_v41, %v2721_v41  ;;  %5978 = vmatprep.mubr.msk.bf16.mxu0 %vm6877_vm0, %v6876_v26 }
 0x95e   : > { %5988 = vmatprep.subr.bf16.mxu0 %v6876_v26 }
 0x95f   : > { %v6542_v34 = vpop.eup %6541  ;;  %5973 = vmatmul.mubr.msk.bf16.vlgmr.msra.gmra.mrb[40].mxu1 %vm1455_vm8, %v2729_v47 }
 0x960   : > { %v2722_v52 = vmul.f32 %v6542_v34, %v6534_v14  ;;  %5984 = vmatprep.mubr.msk.bf16.mxu1 %vm6877_vm0, %v6876_v26 }
 0x961   : > { %5983 = vmatpush3.bf16.xpose.msra.mxu1 %v7632_v12 }
 0x962   : > { %v2730_v53 = vpack.c.bf16 %v2722_v52, %v2722_v52  ;;  %5994 = vmatprep.subr.bf16.mxu1 %v6876_v26 }
 0x964   : > { %5979 = vmatmul.mubr.msk.bf16.vlgmr.msra.gmra.mrb[32].mxu0 %vm1455_vm8, %v2730_v53 }
 0x965   : > { %5990 = vmatprep.mubr.msk.bf16.mxu0 %vm6877_vm0, %v6876_v26 }
 0x966   : > { %5989 = vmatpush3.bf16.xpose.msra.mxu0 %v7644_v59 }
 0x967   : > { %6000 = vmatprep.subr.bf16.mxu0 %v6876_v26 }
 0x968   : > { %5985 = vmatmul.mubr.bf16.vlgmr.msra.gmra.mrb[60].mxu1 %v2919_v38 }
 0x969   : > { %5995 = vmatpush3.bf16.xpose.msra.mxu1 %v7653_v56  ;;  %5996 = vmatprep.mubr.msk.bf16.mxu1 %vm6877_vm0, %v6876_v26 }
 0x96a   : > { %6006 = vmatprep.subr.bf16.mxu1 %v6876_v26 }
 0x96d   : > { %5991 = vmatmul.mubr.bf16.vlgmr.msra.gmra.mrb[52].mxu0 %v2920_v19 }
 0x96e   : > { %6001 = vmatpush3.bf16.xpose.msra.mxu0 %v7670_v3  ;;  %6002 = vmatprep.mubr.msk.bf16.mxu0 %vm6877_vm0, %v6876_v26 }
 0x96f   : > { %6012 = vmatprep.subr.bf16.mxu0 %v6876_v26 }
 0x970   : > { %5997 = vmatmul.mubr.bf16.vlgmr.msra.gmra.mrb[64].mxu1 %v2921_v23 }
 0x971   : > { %6007 = vmatpush3.bf16.xpose.msra.mxu1 %v7632_v12  ;;  %6008 = vmatprep.mubr.msk.bf16.mxu1 %vm6877_vm0, %v6876_v26 }
 0x972   : > { %6018 = vmatprep.subr.bf16.mxu1 %v6876_v26 }
 0x975   : > { %6003 = vmatmul.mubr.bf16.vlgmr.msra.gmra.mrb[56].mxu0 %v2922_v6 }
 0x976   : > { %6013 = vmatpush3.bf16.xpose.msra.mxu0 %v7644_v59  ;;  %6014 = vmatprep.mubr.msk.bf16.mxu0 %vm6877_vm0, %v6876_v26 }
 0x977   : > { %6024 = vmatprep.subr.bf16.mxu0 %v6876_v26 }
 0x978   : > { %6009 = vmatmul.mubr.bf16.vlgmr.msra.gmra.mrb[68].mxu1 %v3135_v1 }
 0x979   : > { %6019 = vmatpush3.bf16.xpose.msra.mxu1 %v7653_v56  ;;  %6020 = vmatprep.mubr.msk.bf16.mxu1 %vm6877_vm0, %v6876_v26 }
 0x97a   : > { %6030 = vmatprep.subr.bf16.mxu1 %v6876_v26 }
 0x97d   : > { %6015 = vmatmul.mubr.bf16.vlgmr.msra.gmra.mrb[60].mxu0 %v3136_v57 }
 0x97e   : > { %6025 = vmatpush3.bf16.xpose.msra.mxu0 %v7670_v3  ;;  %6026 = vmatprep.mubr.msk.bf16.mxu0 %vm6877_vm0, %v6876_v26 }
 0x97f   : > { %6036 = vmatprep.subr.bf16.mxu0 %v6876_v26 }
 0x980   : > { %6021 = vmatmul.mubr.bf16.vlgmr.msra.gmra.mrb[72].mxu1 %v3137_v39 }
 0x981   : > { %6031 = vmatpush3.bf16.msra.mxu1 %v3355_v50  ;;  %6032 = vmatprep.mubr.msk.bf16.mxu1 %vm6877_vm0, %v6876_v26 }
 0x982   : > { %6042 = vmatprep.subr.bf16.mxu1 %v6876_v26 }
 0x985   : > { %6027 = vmatmul.mubr.bf16.vlgmr.msra.gmra.mrb[64].mxu0 %v3138_v8 }
 0x986   : > { %6037 = vmatpush3.bf16.msra.mxu0 %v3401_v55  ;;  %6038 = vmatprep.mubr.msk.bf16.mxu0 %vm6877_vm0, %v6876_v26 }
 0x987   : > { %6048 = vmatprep.subr.bf16.mxu0 %v6876_v26 }
 0xa2a   : > { %v7738_v13 = vpop.f32.mrb[36].mxu1 }
 0xa2b   : > { %v5962_v58 = vpop.f32.mrb[37].mxu1 }
 0xa2c   : > { %v2774_v63 = vpop.f32.mrb[38].mxu1 }
 0xa2d   : > { %v5963_v9 = vpop.f32.mrb[39].mxu1 }
 0xa2f   : > { %v7740_v0 = vpop.f32.mrb[28].mxu0 }
 0xa30   : > { %v4527_v16 = vpack.c.bf16 %v7740_v0, %v7738_v13  ;;  %v5968_v14 = vpop.f32.mrb[29].mxu0  ;;  %v4656_v13 = vld [vmem:[#allocation8 + $0xdc] sm:$0xf] }
 0xa31   : > { %v2820_v2 = vpop.f32.mrb[30].mxu0  ;;  %v4657_v0 = vld [vmem:[#allocation8 + $0xfc] sm:$0xf] }
 0xa32   : > { %v5969_v20 = vpop.f32.mrb[31].mxu0  ;;  %v7744_v43 = vpop.f32.mrb[40].mxu1 }
 0xa33   : > { %v5974_v11 = vpop.f32.mrb[41].mxu1 }
 0xa34   : > { %v2866_v18 = vpop.f32.mrb[42].mxu1 }
 0xa35   : > { %v5975_v46 = vpop.f32.mrb[43].mxu1 }
 0xa37   : > { %v7746_v7 = vpop.f32.mrb[32].mxu0 }
 0xa38   : > { %v4528_v24 = vpack.c.bf16 %v7746_v7, %v7744_v43  ;;  %v5980_v10 = vpop.f32.mrb[33].mxu0 }
 0xa39   : > { %v2912_v15 = vpop.f32.mrb[34].mxu0 }
 0xa3a   : > { %v5981_v17 = vpop.f32.mrb[35].mxu0 }
 0xa3b   : > { %v7750_v30 = vpop.f32.mrb[60].mxu1 }
 0xa3c   : > { %v5986_v29 = vpop.f32.mrb[61].mxu1  ;;  %v3083_v14 = vsel %vm1455_vm8, %v7750_v30, -inf }
 0xa3d   : > { %v2960_v33 = vpop.f32.mrb[62].mxu1 }
 0xa3e   : > { %v5987_v37 = vpop.f32.mrb[63].mxu1 }
 0xa40   : > { %v7752_v40 = vpop.f32.mrb[52].mxu0 }
 0xa41   : > { %v5992_v41 = vpop.f32.mrb[53].mxu0  ;;  %v3086_v10 = vsel %vm1455_vm8, %v7752_v40, -inf }
 0xa42   : > { %v3000_v62 = vpop.f32.mrb[54].mxu0 }
 0xa43   : > { %v5993_v47 = vpop.f32.mrb[55].mxu0  ;;  %v7754_v34 = vpop.f32.mrb[64].mxu1 }
 0xa44   : > { %v5998_v28 = vpop.f32.mrb[65].mxu1  ;;  %v3089_v46 = vsel %vm1455_vm8, %v7754_v34, -inf }
 0xa45   : > { %v3040_v52 = vpop.f32.mrb[66].mxu1 }
 0xa46   : > { %v5999_v53 = vpop.f32.mrb[67].mxu1 }
 0xa48   : > { %v7756_v35 = vpop.f32.mrb[56].mxu0 }
 0xa49   : > { %v6004_v27 = vpop.f32.mrb[57].mxu0  ;;  %v3092_v15 = vsel %vm1455_vm8, %v7756_v35, -inf }
 0xa4a   : > { %v3080_v38 = vpop.f32.mrb[58].mxu0 }
 0xa4b   : > { %v6005_v61 = vpop.f32.mrb[59].mxu0  ;;  %v3173_v19 = vpop.f32.mrb[68].mxu1 }
 0xa4c   : > { %v6010_v23 = vpop.f32.mrb[69].mxu1  ;;  %v3299_v6 = vsel %vm1455_vm8, %v3173_v19, -inf }
 0xa4d   : > { %3300 = vmax.xlane.f32.xlu0 %v3299_v6  ;;  %v3176_v32 = vpop.f32.mrb[70].mxu1 }
 0xa4e   : > { %v6011_v1 = vpop.f32.mrb[71].mxu1 }
 0xa50   : > { %v3213_v44 = vpop.f32.mrb[60].mxu0 }
 0xa51   : > { %v6016_v57 = vpop.f32.mrb[61].mxu0  ;;  %v3302_v25 = vsel %vm1455_vm8, %v3213_v44, -inf }
 0xa52   : > { %3303 = vmax.xlane.f32.xlu1 %v3302_v25  ;;  %v3216_v39 = vpop.f32.mrb[62].mxu0 }
 0xa53   : > { %v6017_v50 = vpop.f32.mrb[63].mxu0  ;;  %v3253_v5 = vpop.f32.mrb[72].mxu1 }
 0xa54   : > { %v6022_v8 = vpop.f32.mrb[73].mxu1  ;;  %v3305_v55 = vsel %vm1455_vm8, %v3253_v5, -inf }
 0xa55   : > { %3306 = vmax.xlane.f32.xlu0 %v3305_v55  ;;  %v3256_v58 = vpop.f32.mrb[74].mxu1 }
 0xa56   : > { %v6023_v63 = vpop.f32.mrb[75].mxu1 }
 0xa58   : > { %v3293_v9 = vpop.f32.mrb[64].mxu0 }
 0xa59   : > { %v6028_v2 = vpop.f32.mrb[65].mxu0  ;;  %v3308_v20 = vsel %vm1455_vm8, %v3293_v9, -inf  ;;  %3084 = vmax.xlane.f32.xlu0 %v3083_v14 }
 0xa5a   : > { %3309 = vmax.xlane.f32.xlu1 %v3308_v20  ;;  %v3296_v11 = vpop.f32.mrb[66].mxu0 }
 0xa5b   : > { %v6029_v18 = vpop.f32.mrb[67].mxu0 }
 0xa5d   : > { %3090 = vmax.xlane.f32.xlu0 %v3089_v46 }
 0xa5e   : > { %3087 = vmax.xlane.f32.xlu1 %v3086_v10 }
 0xa62   : > { %3093 = vmax.xlane.f32.xlu1 %v3092_v15 }
 0xada   : > { %v3301_v17 = vpop.xlane.xlu0 %3300 }
 0xadb   : > { %v3311_v29 = vsub.f32 %v3173_v19, %v3301_v17 }
 0xadd   : > { %v3315_v33 = vmul.f32 1.442695, %v3311_v29 }
 0xadf   : > { %6543 = vpow2.f32 %v3315_v33  ;;  %v3304_v37 = vpop.xlane.xlu1 %3303  ;;  %v7793_v33 = vpack.c.bf16 %v7252_v42, %v7252_v42 }
 0xae0   : > { %v3312_v41 = vsub.f32 %v3213_v44, %v3304_v37 }
 0xae2   : > { %v3317_v62 = vmul.f32 1.442695, %v3312_v41  ;;  %v3307_v47 = vpop.xlane.xlu0 %3306 }
 0xae3   : > { %v3313_v28 = vsub.f32 %v3253_v5, %v3307_v47 }
 0xae4   : > { %6545 = vpow2.f32 %v3317_v62 }
 0xae5   : > { %v3319_v52 = vmul.f32 1.442695, %v3313_v28  ;;  %v3345_v28 = vsel %vm7335_vm6, %v7793_v33, 0 }
 0xae6   : > { %v3085_v53 = vpop.xlane.xlu0 %3084  ;;  %v3447_v42 = vsel %vm1733_vm7, %v3345_v28, 0  ;;  %v3722_v28 = vsel %vm7487_vm12, %v7683_v51, 0 }
 0xae7   : > { %6547 = vpow2.f32 %v3319_v52  ;;  %v3310_v27 = vpop.xlane.xlu1 %3309  ;;  %v3095_v38 = vsub.f32 %v7750_v30, %v3085_v53  ;;  %v7800_v52 = vpack.c.bf16 %v7259_v48, %v7259_v48 }
 0xae8   : > { %v3314_v61 = vsub.f32 %v3293_v9, %v3310_v27 }
 0xae9   : > { %v6544_v23 = vpop.eup %6543  ;;  %v3099_v6 = vmul.f32 1.442695, %v3095_v38  ;;  %v3346_v48 = vsel %vm7335_vm6, %v7800_v52, 0 }
 0xaea   : > { %v3321_v32 = vmul.f32 1.442695, %v3314_v61  ;;  %v3091_v1 = vpop.xlane.xlu0 %3090  ;;  %v3323_v19 = vsel %vm1455_vm8, %v6544_v23, 0.0 }
 0xaeb   : > { %6549 = vpow2.f32 %v3099_v6  ;;  %v3088_v57 = vpop.xlane.xlu1 %3087  ;;  %v3097_v44 = vsub.f32 %v7754_v34, %v3091_v1  ;;  %3324 = vadd.xlane.f32.xlu0 %v3323_v19  ;;  %v3493_v19 = vsel %vm1733_vm7, %v3346_v48, 0 }
 0xaec   : > { %6551 = vpow2.f32 %v3321_v32  ;;  %v3096_v25 = vsub.f32 %v7752_v40, %v3088_v57  ;;  %v3127_v57 = vsel %vm7289_vm2, %v7701_v21, 0 }
 0xaed   : > { %v3103_v39 = vmul.f32 1.442695, %v3097_v44 }
 0xaee   : > { %v6546_v50 = vpop.eup %6545  ;;  %v3101_v5 = vmul.f32 1.442695, %v3096_v25 }
 0xaef   : > { %6553 = vpow2.f32 %v3103_v39  ;;  %v3094_v30 = vpop.xlane.xlu1 %3093  ;;  %v3326_v8 = vsel %vm1455_vm8, %v6546_v50, 0.0 }
 0xaf0   : > { %6555 = vpow2.f32 %v3101_v5  ;;  %v3098_v55 = vsub.f32 %v7756_v35, %v3094_v30  ;;  %3327 = vadd.xlane.f32.xlu1 %v3326_v8  ;;  %v3128_v8 = vsel %vm7289_vm2, %v7715_v49, 0 }
 0xaf1   : > { %v6548_v58 = vpop.eup %6547 }
 0xaf2   : > { %v3105_v63 = vmul.f32 1.442695, %v3098_v55  ;;  %v3329_v9 = vsel %vm1455_vm8, %v6548_v58, 0.0 }
 0xaf3   : > { %3330 = vadd.xlane.f32.xlu0 %v3329_v9  ;;  %v3129_v9 = vsel %vm7289_vm2, %v7793_v33, 0 }
 0xaf4   : > { %6557 = vpow2.f32 %v3105_v63  ;;  %v3585_v63 = vsel %vm1733_vm7, %v3128_v8, 0 }
 0xaf5   : > { %v6550_v34 = vpop.eup %6549 }
 0xaf6   : > { %v6552_v14 = vpop.eup %6551  ;;  %v3107_v40 = vsel %vm1455_vm8, %v6550_v34, 0.0 }
 0xaf7   : > { %v3332_v2 = vsel %vm1455_vm8, %v6552_v14, 0.0  ;;  %3108 = vadd.xlane.f32.xlu0 %v3107_v40 }
 0xaf8   : > { %3333 = vadd.xlane.f32.xlu1 %v3332_v2  ;;  %v3631_v2 = vsel %vm1733_vm7, %v3129_v9, 0 }
 0xaf9   : > { %v7779_v20 = vpop.eup %6553 }
 0xafa   : > { %v7781_v11 = vpop.eup %6555  ;;  %v3113_v35 = vsel %vm1455_vm8, %v7779_v20, 0.0 }
 0xafb   : > { %v3110_v18 = vsel %vm1455_vm8, %v7781_v11, 0.0  ;;  %3114 = vadd.xlane.f32.xlu0 %v3113_v35 }
 0xafc   : > { %3111 = vadd.xlane.f32.xlu1 %v3110_v18  ;;  %v3130_v18 = vsel %vm7289_vm2, %v7800_v52, 0 }
 0xafe   : > { %v7787_v46 = vpop.eup %6557 }
 0xaff   : > { %v3116_v10 = vsel %vm1455_vm8, %v7787_v46, 0.0 }
 0xb00   : > { %3117 = vadd.xlane.f32.xlu1 %v3116_v10 }
 0xb78   : > { %v3325_v15 = vpop.xlane.xlu0 %3324 }
 0xb79   : > { %6559 = vrcp.f32 %v3325_v15  ;;  %v3677_v15 = vsel %vm1733_vm7, %v3130_v18, 0 }
 0xb7d   : > { %v3328_v17 = vpop.xlane.xlu1 %3327 }
 0xb7e   : > { %6561 = vrcp.f32 %v3328_v17 }
 0xb80   : > { %v3331_v29 = vpop.xlane.xlu0 %3330 }
 0xb81   : > { %6563 = vrcp.f32 %v3331_v29 }
 0xb83   : > { %v6560_v37 = vpop.eup %6559 }
 0xb84   : > { %v3339_v41 = vmul.f32 %v6560_v37, %v6544_v23  ;;  %v3109_v62 = vpop.xlane.xlu0 %3108  ;;  %v3927_v37 = vsel %vm7487_vm12, %v7701_v21, 0 }
 0xb85   : > { %v3334_v47 = vpop.xlane.xlu1 %3333  ;;  %6565 = vrcp.f32 %v3109_v62  ;;  %v3939_v62 = vsel %vm1733_vm7, %v3927_v37, 0 }
 0xb86   : > { %6567 = vrcp.f32 %v3334_v47  ;;  %v3347_v53 = vpack.c.bf16 %v3339_v41, %v3339_v41  ;;  %v3721_v41 = vsel %vm7487_vm12, %v7666_v45, 0  ;;  %v3928_v47 = vsel %vm7487_vm12, %v7715_v49, 0 }
 0xb88   : > { %v6562_v27 = vpop.eup %6561  ;;  %6033 = vmatmul.mubr.msk.bf16.vlgmr.msra.gmra.mrb[76].mxu1 %vm1455_vm8, %v3347_v53  ;;  %v3115_v23 = vpop.xlane.xlu0 %3114  ;;  %v3985_v53 = vsel %vm1733_vm7, %v3928_v47, 0 }
 0xb89   : > { %v3340_v38 = vmul.f32 %v6562_v27, %v6546_v50  ;;  %v3112_v61 = vpop.xlane.xlu1 %3111  ;;  %6043 = vmatpush3.bf16.msra.mxu1 %v3447_v42  ;;  %6044 = vmatprep.mubr.msk.bf16.mxu1 %vm6877_vm0, %v6876_v26  ;;  %v3539_v50 = vsel %vm1733_vm7, %v3127_v57, 0 }
 0xb8a   : > { %6569 = vrcp.f32 %v3112_v61  ;;  %6054 = vmatprep.subr.bf16.mxu1 %v6876_v26 }
 0xb8b   : > { %v6564_v6 = vpop.eup %6563  ;;  %v3348_v32 = vpack.c.bf16 %v3340_v38, %v3340_v38  ;;  %6571 = vrcp.f32 %v3115_v23 }
 0xb8c   : > { %v3341_v1 = vmul.f32 %v6564_v6, %v6548_v58 }
 0xb8d   : > { %6039 = vmatmul.mubr.msk.bf16.vlgmr.msra.gmra.mrb[68].mxu0 %vm1455_vm8, %v3348_v32  ;;  %v3118_v25 = vpop.xlane.xlu1 %3117 }
 0xb8e   : > { %6049 = vmatpush3.bf16.msra.mxu0 %v3493_v19  ;;  %v3349_v44 = vpack.c.bf16 %v3341_v1, %v3341_v1  ;;  %6050 = vmatprep.mubr.msk.bf16.mxu0 %vm6877_vm0, %v6876_v26  ;;  %6573 = vrcp.f32 %v3118_v25 }
 0xb8f   : > { %v6566_v22 = vpop.eup %6565  ;;  %6060 = vmatprep.subr.bf16.mxu0 %v6876_v26 }
 0xb90   : > { %v6568_v39 = vpop.eup %6567  ;;  %6045 = vmatmul.mubr.msk.bf16.vlgmr.msra.gmra.mrb[80].mxu1 %vm1455_vm8, %v3349_v44  ;;  %v3123_v30 = vmul.f32 %v6566_v22, %v6550_v34 }
 0xb91   : > { %v3342_v5 = vmul.f32 %v6568_v39, %v6552_v14  ;;  %6055 = vmatpush3.bf16.msra.mxu1 %v3539_v50  ;;  %6056 = vmatprep.mubr.msk.bf16.mxu1 %vm6877_vm0, %v6876_v26 }
 0xb92   : > { %6066 = vmatprep.subr.bf16.mxu1 %v6876_v26  ;;  %v3131_v14 = vpack.c.bf16 %v3123_v30, %v3123_v30 }
 0xb93   : > { %v3350_v55 = vpack.c.bf16 %v3342_v5, %v3342_v5 }
 0xb94   : > { %v6570_v58 = vpop.eup %6569 }
 0xb95   : > { %6051 = vmatmul.mubr.msk.bf16.vlgmr.msra.gmra.mrb[72].mxu0 %vm1455_vm8, %v3350_v55  ;;  %v6572_v34 = vpop.eup %6571  ;;  %v3124_v40 = vmul.f32 %v6570_v58, %v7781_v11 }
 0xb96   : > { %6061 = vmatpush3.bf16.msra.mxu0 %v3585_v63  ;;  %6062 = vmatprep.mubr.msk.bf16.mxu0 %vm6877_vm0, %v6876_v26  ;;  %v3125_v35 = vmul.f32 %v6572_v34, %v7779_v20  ;;  %v3719_v20 = vsel %vm7487_vm12, %v7640_v54, 0 }
 0xb97   : > { %6072 = vmatprep.subr.bf16.mxu0 %v6876_v26  ;;  %v3132_v10 = vpack.c.bf16 %v3124_v40, %v3124_v40 }
 0xb98   : > { %6057 = vmatmul.mubr.msk.bf16.vlgmr.msra.gmra.mrb[76].mxu1 %vm1455_vm8, %v3131_v14  ;;  %v6574_v11 = vpop.eup %6573  ;;  %v3133_v17 = vpack.c.bf16 %v3125_v35, %v3125_v35 }
 0xb99   : > { %6067 = vmatpush3.bf16.msra.mxu1 %v3631_v2  ;;  %6068 = vmatprep.mubr.msk.bf16.mxu1 %vm6877_vm0, %v6876_v26  ;;  %v3126_v29 = vmul.f32 %v6574_v11, %v7787_v46  ;;  %v3720_v46 = vsel %vm7487_vm12, %v7660_v60, 0 }
 0xb9a   : > { %6078 = vmatprep.subr.bf16.mxu1 %v6876_v26 }
 0xb9b   : > { %v3134_v4 = vpack.c.bf16 %v3126_v29, %v3126_v29 }
 0xb9d   : > { %6063 = vmatmul.mubr.msk.bf16.vlgmr.msra.gmra.mrb[68].mxu0 %vm1455_vm8, %v3132_v10 }
 0xb9e   : > { %6073 = vmatpush3.bf16.msra.mxu0 %v3677_v15  ;;  %6074 = vmatprep.mubr.msk.bf16.mxu0 %vm6877_vm0, %v6876_v26 }
 0xb9f   : > { %6084 = vmatprep.subr.bf16.mxu0 %v6876_v26 }
 0xba0   : > { %6069 = vmatmul.mubr.msk.bf16.vlgmr.msra.gmra.mrb[80].mxu1 %vm1455_vm8, %v3133_v17 }
 0xba1   : > { %6080 = vmatprep.mubr.msk.bf16.mxu1 %vm6877_vm0, %v6876_v26 }
 0xba2   : > { %6079 = vmatpush3.bf16.xpose.msra.mxu1 %v7632_v12 }
 0xba3   : > { %6090 = vmatprep.subr.bf16.mxu1 %v6876_v26 }
 0xba5   : > { %6075 = vmatmul.mubr.msk.bf16.vlgmr.msra.gmra.mrb[72].mxu0 %vm1455_vm8, %v3134_v4 }
 0xba6   : > { %6086 = vmatprep.mubr.msk.bf16.mxu0 %vm6877_vm0, %v6876_v26 }
 0xba7   : > { %6085 = vmatpush3.bf16.xpose.msra.mxu0 %v7644_v59 }
 0xba8   : > { %6096 = vmatprep.subr.bf16.mxu0 %v6876_v26 }
 0xba9   : > { %6081 = vmatmul.mubr.bf16.vlgmr.msra.gmra.mrb[84].mxu1 %v3719_v20 }
 0xbaa   : > { %6091 = vmatpush3.bf16.xpose.msra.mxu1 %v7653_v56  ;;  %6092 = vmatprep.mubr.msk.bf16.mxu1 %vm6877_vm0, %v6876_v26 }
 0xbab   : > { %6102 = vmatprep.subr.bf16.mxu1 %v6876_v26 }
 0xbae   : > { %6087 = vmatmul.mubr.bf16.vlgmr.msra.gmra.mrb[76].mxu0 %v3720_v46 }
 0xbaf   : > { %6097 = vmatpush3.bf16.xpose.msra.mxu0 %v7670_v3  ;;  %6098 = vmatprep.mubr.msk.bf16.mxu0 %vm6877_vm0, %v6876_v26 }
 0xbb0   : > { %6108 = vmatprep.subr.bf16.mxu0 %v6876_v26 }
 0xbb1   : > { %6093 = vmatmul.mubr.bf16.vlgmr.msra.gmra.mrb[88].mxu1 %v3721_v41 }
 0xbb2   : > { %6103 = vmatpush3.bf16.msra.mxu1 %v3939_v62  ;;  %6104 = vmatprep.mubr.msk.bf16.mxu1 %vm6877_vm0, %v6876_v26 }
 0xbb3   : > { %6114 = vmatprep.subr.bf16.mxu1 %v6876_v26 }
 0xbb6   : > { %6099 = vmatmul.mubr.bf16.vlgmr.msra.gmra.mrb[80].mxu0 %v3722_v28 }
 0xbb7   : > { %6109 = vmatpush3.bf16.msra.mxu0 %v3985_v53  ;;  %6110 = vmatprep.mubr.msk.bf16.mxu0 %vm6877_vm0, %v6876_v26 }
 0xbb8   : > { %6120 = vmatprep.subr.bf16.mxu0 %v6876_v26 }
 0xc7c   : > { %v3757_v27 = vpop.f32.mrb[84].mxu1 }
 0xc7d   : > { %v6082_v42 = vpop.f32.mrb[85].mxu1  ;;  %v3883_v38 = vsel %vm1455_vm8, %v3757_v27, -inf }
 0xc7e   : > { %3884 = vmax.xlane.f32.xlu0 %v3883_v38  ;;  %v3760_v61 = vpop.f32.mrb[86].mxu1 }
 0xc7f   : > { %v6083_v23 = vpop.f32.mrb[87].mxu1  ;;  %v3929_v61 = vsel %vm7487_vm12, %v7793_v33, 0 }
 0xc81   : > { %v3797_v48 = vpop.f32.mrb[76].mxu0 }
 0xc82   : > { %v6088_v6 = vpop.f32.mrb[77].mxu0  ;;  %v3886_v32 = vsel %vm1455_vm8, %v3797_v48, -inf }
 0xc83   : > { %3887 = vmax.xlane.f32.xlu1 %v3886_v32  ;;  %v3800_v1 = vpop.f32.mrb[78].mxu0  ;;  %v4031_v6 = vsel %vm1733_vm7, %v3929_v61, 0 }
 0xc84   : > { %v6089_v19 = vpop.f32.mrb[79].mxu0  ;;  %v3837_v57 = vpop.f32.mrb[88].mxu1  ;;  %v3930_v1 = vsel %vm7487_vm12, %v7800_v52, 0 }
 0xc85   : > { %v6094_v44 = vpop.f32.mrb[89].mxu1  ;;  %v3889_v22 = vsel %vm1455_vm8, %v3837_v57, -inf }
 0xc86   : > { %3890 = vmax.xlane.f32.xlu0 %v3889_v22  ;;  %v3840_v25 = vpop.f32.mrb[90].mxu1  ;;  %v4077_v22 = vsel %vm1733_vm7, %v3930_v1, 0 }
 0xc87   : > { %v6095_v39 = vpop.f32.mrb[91].mxu1 }
 0xc89   : > { %v3877_v50 = vpop.f32.mrb[80].mxu0 }
 0xc8a   : > { %v6100_v5 = vpop.f32.mrb[81].mxu0  ;;  %v3892_v30 = vsel %vm1455_vm8, %v3877_v50, -inf }
 0xc8b   : > { %3893 = vmax.xlane.f32.xlu1 %v3892_v30  ;;  %v3880_v8 = vpop.f32.mrb[82].mxu0  ;;  %v4123_v5 = vsel %vm7560_vm14, %v7640_v54, 0  ;;  %v4125_v54 = vsel %vm7560_vm14, %v7666_v45, 0 }
 0xc8c   : > { %v6101_v55 = vpop.f32.mrb[83].mxu0 }
 0xd0b   : > { %v3885_v58 = vpop.xlane.xlu0 %3884 }
 0xd0c   : > { %v3895_v63 = vsub.f32 %v3757_v27, %v3885_v58 }
 0xd0e   : > { %v3899_v9 = vmul.f32 1.442695, %v3895_v63 }
 0xd10   : > { %6575 = vpow2.f32 %v3899_v9  ;;  %v3888_v14 = vpop.xlane.xlu1 %3887 }
 0xd11   : > { %v3896_v34 = vsub.f32 %v3797_v48, %v3888_v14 }
 0xd13   : > { %v3901_v40 = vmul.f32 1.442695, %v3896_v34  ;;  %v3891_v2 = vpop.xlane.xlu0 %3890 }
 0xd14   : > { %v3897_v35 = vsub.f32 %v3837_v57, %v3891_v2 }
 0xd15   : > { %6577 = vpow2.f32 %v3901_v40 }
 0xd16   : > { %v3903_v18 = vmul.f32 1.442695, %v3897_v35 }
 0xd18   : > { %6579 = vpow2.f32 %v3903_v18  ;;  %v3894_v10 = vpop.xlane.xlu1 %3893 }
 0xd19   : > { %v3898_v11 = vsub.f32 %v3877_v50, %v3894_v10 }
 0xd1a   : > { %v6576_v15 = vpop.eup %6575 }
 0xd1b   : > { %v3905_v17 = vmul.f32 1.442695, %v3898_v11  ;;  %v3907_v29 = vsel %vm1455_vm8, %v6576_v15, 0.0 }
 0xd1c   : > { %3908 = vadd.xlane.f32.xlu0 %v3907_v29 }
 0xd1d   : > { %6581 = vpow2.f32 %v3905_v17 }
 0xd1f   : > { %v6578_v4 = vpop.eup %6577 }
 0xd20   : > { %v3910_v20 = vsel %vm1455_vm8, %v6578_v4, 0.0 }
 0xd21   : > { %3911 = vadd.xlane.f32.xlu1 %v3910_v20 }
 0xd22   : > { %v6580_v46 = vpop.eup %6579 }
 0xd23   : > { %v3913_v37 = vsel %vm1455_vm8, %v6580_v46, 0.0 }
 0xd24   : > { %3914 = vadd.xlane.f32.xlu0 %v3913_v37 }
 0xd27   : > { %v6582_v41 = vpop.eup %6581 }
 0xd28   : > { %v3916_v62 = vsel %vm1455_vm8, %v6582_v41, 0.0 }
 0xd29   : > { %3917 = vadd.xlane.f32.xlu1 %v3916_v62 }
 0xda9   : > { %v3909_v47 = vpop.xlane.xlu0 %3908 }
 0xdaa   : > { %6583 = vrcp.f32 %v3909_v47 }
 0xdae   : > { %v3912_v28 = vpop.xlane.xlu1 %3911 }
 0xdaf   : > { %6585 = vrcp.f32 %v3912_v28 }
 0xdb1   : > { %v3915_v53 = vpop.xlane.xlu0 %3914 }
 0xdb2   : > { %6587 = vrcp.f32 %v3915_v53 }
 0xdb4   : > { %v6584_v27 = vpop.eup %6583 }
 0xdb5   : > { %v3923_v42 = vmul.f32 %v6584_v27, %v6576_v15 }
 0xdb6   : > { %v3918_v38 = vpop.xlane.xlu1 %3917 }
 0xdb7   : > { %6589 = vrcp.f32 %v3918_v38  ;;  %v3931_v23 = vpack.c.bf16 %v3923_v42, %v3923_v42 }
 0xdb9   : > { %v6586_v48 = vpop.eup %6585  ;;  %6105 = vmatmul.mubr.msk.bf16.vlgmr.msra.gmra.mrb[76].mxu1 %vm1455_vm8, %v3931_v23 }
 0xdba   : > { %v3924_v32 = vmul.f32 %v6586_v48, %v6578_v4  ;;  %6115 = vmatpush3.bf16.msra.mxu1 %v4031_v6  ;;  %6116 = vmatprep.mubr.msk.bf16.mxu1 %vm6877_vm0, %v6876_v26 }
 0xdbb   : > { %6126 = vmatprep.subr.bf16.mxu1 %v6876_v26 }
 0xdbc   : > { %v6588_v19 = vpop.eup %6587  ;;  %v3932_v57 = vpack.c.bf16 %v3924_v32, %v3924_v32 }
 0xdbd   : > { %v3925_v44 = vmul.f32 %v6588_v19, %v6580_v46 }
 0xdbe   : > { %6111 = vmatmul.mubr.msk.bf16.vlgmr.msra.gmra.mrb[68].mxu0 %vm1455_vm8, %v3932_v57 }
 0xdbf   : > { %6121 = vmatpush3.bf16.msra.mxu0 %v4077_v22  ;;  %v3933_v25 = vpack.c.bf16 %v3925_v44, %v3925_v44  ;;  %6122 = vmatprep.mubr.msk.bf16.mxu0 %vm6877_vm0, %v6876_v26 }
 0xdc0   : > { %6132 = vmatprep.subr.bf16.mxu0 %v6876_v26 }
 0xdc1   : > { %v6590_v39 = vpop.eup %6589  ;;  %6117 = vmatmul.mubr.msk.bf16.vlgmr.msra.gmra.mrb[80].mxu1 %vm1455_vm8, %v3933_v25 }
 0xdc2   : > { %v3926_v36 = vmul.f32 %v6590_v39, %v6582_v41  ;;  %6128 = vmatprep.mubr.msk.bf16.mxu1 %vm6877_vm0, %v6876_v26 }
 0xdc3   : > { %6127 = vmatpush3.bf16.xpose.msra.mxu1 %v7632_v12  ;;  %v4124_v12 = vsel %vm7560_vm14, %v7660_v60, 0  ;;  %v4332_v60 = vsel %vm7560_vm14, %v7715_v49, 0 }
 0xdc4   : > { %v3934_v50 = vpack.c.bf16 %v3926_v36, %v3926_v36  ;;  %6138 = vmatprep.subr.bf16.mxu1 %v6876_v26  ;;  %v4389_v45 = vsel %vm1733_vm7, %v4332_v60, 0  ;;  %v4529_v36 = vld [vmem:[#allocation8 + $0x18] sm:$0xf] }
 0xdc6   : > { %6123 = vmatmul.mubr.msk.bf16.vlgmr.msra.gmra.mrb[72].mxu0 %vm1455_vm8, %v3934_v50  ;;  %v4530_v50 = vld [vmem:[#allocation8 + $0x38] sm:$0xf] }
 0xdc7   : > { %6134 = vmatprep.mubr.msk.bf16.mxu0 %vm6877_vm0, %v6876_v26 }
 0xdc8   : > { %6133 = vmatpush3.bf16.xpose.msra.mxu0 %v7644_v59  ;;  %v4331_v59 = vsel %vm7560_vm14, %v7701_v21, 0 }
 0xdc9   : > { %6144 = vmatprep.subr.bf16.mxu0 %v6876_v26 }
 0xdca   : > { %6129 = vmatmul.mubr.bf16.vlgmr.msra.gmra.mrb[92].mxu1 %v4123_v5 }
 0xdcb   : > { %6139 = vmatpush3.bf16.xpose.msra.mxu1 %v7653_v56  ;;  %6140 = vmatprep.mubr.msk.bf16.mxu1 %vm6877_vm0, %v6876_v26  ;;  %v4343_v56 = vsel %vm1733_vm7, %v4331_v59, 0  ;;  %v4333_v59 = vsel %vm7560_vm14, %v7793_v33, 0 }
 0xdcc   : > { %6150 = vmatprep.subr.bf16.mxu1 %v6876_v26 }
 0xdcf   : > { %6135 = vmatmul.mubr.bf16.vlgmr.msra.gmra.mrb[84].mxu0 %v4124_v12 }
 0xdd0   : > { %6145 = vmatpush3.bf16.xpose.msra.mxu0 %v7670_v3  ;;  %6146 = vmatprep.mubr.msk.bf16.mxu0 %vm6877_vm0, %v6876_v26  ;;  %v4126_v3 = vsel %vm7560_vm14, %v7683_v51, 0 }
 0xdd1   : > { %6156 = vmatprep.subr.bf16.mxu0 %v6876_v26 }
 0xdd2   : > { %6141 = vmatmul.mubr.bf16.vlgmr.msra.gmra.mrb[96].mxu1 %v4125_v54 }
 0xdd3   : > { %6151 = vmatpush3.bf16.msra.mxu1 %v4343_v56  ;;  %6152 = vmatprep.mubr.msk.bf16.mxu1 %vm6877_vm0, %v6876_v26  ;;  %v5449_v56 = vcombine.low %v4529_v36, %v4530_v50  ;;  %v4664_v50 = vld [vmem:[#allocation8 + $0x1dc] sm:$0xf] }
 0xdd4   : > { %6162 = vmatprep.subr.bf16.mxu1 %v6876_v26 }
 0xdd7   : > { %6147 = vmatmul.mubr.bf16.vlgmr.msra.gmra.mrb[88].mxu0 %v4126_v3  ;;  %v4435_v3 = vsel %vm1733_vm7, %v4333_v59, 0 }
 0xdd8   : > { %6157 = vmatpush3.bf16.msra.mxu0 %v4389_v45  ;;  %6158 = vmatprep.mubr.msk.bf16.mxu0 %vm6877_vm0, %v6876_v26  ;;  %v4650_v45 = vld [vmem:[#allocation8 + $0x1c] sm:$0xf] }
 0xdd9   : > { %6168 = vmatprep.subr.bf16.mxu0 %v6876_v26 }
 0xe9d   : > { %v4161_v21 = vpop.f32.mrb[92].mxu1 }
 0xe9e   : > { %v6130_v30 = vpop.f32.mrb[93].mxu1  ;;  %v4287_v8 = vsel %vm1455_vm8, %v4161_v21, -inf }
 0xe9f   : > { %4288 = vmax.xlane.f32.xlu0 %v4287_v8  ;;  %v4164_v49 = vpop.f32.mrb[94].mxu1  ;;  %v4334_v8 = vsel %vm7560_vm14, %v7800_v52, 0 }
 0xea0   : > { %v6131_v55 = vpop.f32.mrb[95].mxu1 }
 0xea1   : > { %v4531_v55 = vld [vmem:[#allocation8 + $0x58] sm:$0xf] }
 0xea2   : > { %v4201_v58 = vpop.f32.mrb[84].mxu0 }
 0xea3   : > { %v6136_v63 = vpop.f32.mrb[85].mxu0  ;;  %v4290_v51 = vsel %vm1455_vm8, %v4201_v58, -inf }
 0xea4   : > { %4291 = vmax.xlane.f32.xlu1 %v4290_v51  ;;  %v4204_v9 = vpop.f32.mrb[86].mxu0 }
 0xea5   : > { %v6137_v14 = vpop.f32.mrb[87].mxu0  ;;  %v4241_v34 = vpop.f32.mrb[96].mxu1  ;;  %v4481_v9 = vsel %vm1733_vm7, %v4334_v8, 0 }
 0xea6   : > { %v6142_v40 = vpop.f32.mrb[97].mxu1  ;;  %v4293_v2 = vsel %vm1455_vm8, %v4241_v34, -inf }
 0xea7   : > { %4294 = vmax.xlane.f32.xlu0 %v4293_v2  ;;  %v4244_v35 = vpop.f32.mrb[98].mxu1  ;;  %v4533_v40 = vld [vmem:[#allocation8 + $0x98] sm:$0xf]  ;;  %v4652_v2 = vld [vmem:[#allocation8 + $0x5c] sm:$0xf] }
 0xea8   : > { %v6143_v18 = vpop.f32.mrb[99].mxu1  ;;  %v4653_v35 = vld [vmem:[#allocation8 + $0x7c] sm:$0xf] }
 0xeaa   : > { %v4281_v10 = vpop.f32.mrb[88].mxu0 }
 0xeab   : > { %v6148_v11 = vpop.f32.mrb[89].mxu0  ;;  %v4296_v15 = vsel %vm1455_vm8, %v4281_v10, -inf }
 0xeac   : > { %4297 = vmax.xlane.f32.xlu1 %v4296_v15  ;;  %v4284_v17 = vpop.f32.mrb[90].mxu0  ;;  %v4535_v15 = vld [vmem:[#allocation8 + $0xd8] sm:$0xf] }
 0xead   : > { %v6149_v29 = vpop.f32.mrb[91].mxu0  ;;  %v4536_v17 = vld [vmem:[#allocation8 + $0xf8] sm:$0xf] }
 0xeae   : > { %v5459_v29 = vcombine.low %v4652_v2, %v4653_v35  ;;  %v6457_v2 = vld [vmem:[#allocation10 + $0x48] sm:$0xff]  }
 0xeaf   : > { %v6458_v35 = vld [vmem:[#allocation10 + $0x8] sm:$0xff]  }
 0xf2c   : > { %v4289_v4 = vpop.xlane.xlu0 %4288 }
 0xf2d   : > { %v4299_v20 = vsub.f32 %v4161_v21, %v4289_v4  ;;  %v4651_v21 = vld [vmem:[#allocation8 + $0x3c] sm:$0xf] }
 0xf2e   : > { %v5458_v63 = vcombine.low %v4650_v45, %v4651_v21  ;;  %v4654_v4 = vld [vmem:[#allocation8 + $0x9c] sm:$0xf] }
 0xf2f   : > { %v4303_v46 = vmul.f32 1.442695, %v4299_v20  ;;  %v4655_v20 = vld [vmem:[#allocation8 + $0xbc] sm:$0xf] }
 0xf31   : > { %6591 = vpow2.f32 %v4303_v46  ;;  %v4292_v37 = vpop.xlane.xlu1 %4291  ;;  %v5452_v46 = vcombine.low %v4535_v15, %v4536_v17  ;;  %v6462_v15 = vld [vmem:[#allocation10 + $0x18] sm:$0xff]   ;;  %v6463_v17 = vld [vmem:[#allocation10 + $0x60] sm:$0xff]  }
 0xf32   : > { %v4300_v41 = vsub.f32 %v4201_v58, %v4292_v37  ;;  %v4532_v58 = vld [vmem:[#allocation8 + $0x78] sm:$0xf] }
 0xf33   : > { %v4537_v37 = vld [vmem:[#allocation8 + $0x118] sm:$0xf] }
 0xf34   : > { %v4305_v62 = vmul.f32 1.442695, %v4300_v41  ;;  %v4295_v47 = vpop.xlane.xlu0 %4294  ;;  %v4538_v41 = vld [vmem:[#allocation8 + $0x138] sm:$0xf] }
 0xf35   : > { %v4301_v28 = vsub.f32 %v4241_v34, %v4295_v47  ;;  %v5450_v34 = vcombine.low %v4531_v55, %v4532_v58  ;;  %v4539_v47 = vld [vmem:[#allocation8 + $0x158] sm:$0xf] }
 0xf36   : > { %6593 = vpow2.f32 %v4305_v62  ;;  %v5460_v62 = vcombine.low %v4654_v4, %v4655_v20  ;;  %v6465_v4 = vld [vmem:[#allocation10 + $0x68] sm:$0xff]  }
 0xf37   : > { %v4307_v53 = vmul.f32 1.442695, %v4301_v28  ;;  %v4540_v28 = vld [vmem:[#allocation8 + $0x178] sm:$0xf]  ;;  %v6466_v20 = vld [vmem:[#allocation10 + $0x28] sm:$0xff]  }
 0xf39   : > { %6595 = vpow2.f32 %v4307_v53  ;;  %v4298_v27 = vpop.xlane.xlu1 %4297  ;;  %v5461_v53 = vcombine.low %v4656_v13, %v4657_v0  ;;  %v6471_v13 = vld [vmem:[#allocation11] sm:$0xff]   ;;  %v6472_v0 = vld [vmem:[#allocation11 + $0x8] sm:$0xff]  }
 0xf3a   : > { %v4302_v42 = vsub.f32 %v4281_v10, %v4298_v27  ;;  %v5451_v10 = vcombine.low %v4533_v40, %v4534_v31  ;;  %v4658_v27 = vld [vmem:[#allocation8 + $0x11c] sm:$0xf]  ;;  %v6455_v31 = vld [vmem:[#allocation10 + $0x40] sm:$0xff]  }
 0xf3b   : > { %v6592_v38 = vpop.eup %6591 }
 0xf3c   : > { %v4309_v61 = vmul.f32 1.442695, %v4302_v42  ;;  %v4311_v23 = vsel %vm1455_vm8, %v6592_v38, 0.0  ;;  %v4659_v42 = vld [vmem:[#allocation8 + $0x13c] sm:$0xf] }
 0xf3d   : > { %4312 = vadd.xlane.f32.xlu0 %v4311_v23  ;;  %v4542_v23 = vld [vmem:[#allocation8 + $0x1b8] sm:$0xf] }
 0xf3e   : > { %6597 = vpow2.f32 %v4309_v61  ;;  %v4541_v61 = vld [vmem:[#allocation8 + $0x198] sm:$0xf] }
 0xf40   : > { %v6594_v48 = vpop.eup %6593 }
 0xf41   : > { %v4314_v6 = vsel %vm1455_vm8, %v6594_v48, 0.0 }
 0xf42   : > { %4315 = vadd.xlane.f32.xlu1 %v4314_v6  ;;  %v5455_v6 = vcombine.low %v4541_v61, %v4542_v23 }
 0xf43   : > { %v6596_v32 = vpop.eup %6595 }
 0xf44   : > { %v4317_v1 = vsel %vm1455_vm8, %v6596_v32, 0.0 }
 0xf45   : > { %4318 = vadd.xlane.f32.xlu0 %v4317_v1  ;;  %v4544_v1 = vld [vmem:[#allocation8 + $0x1f8] sm:$0xf] }
 0xf48   : > { %v6598_v19 = vpop.eup %6597 }
 0xf49   : > { %v4320_v57 = vsel %vm1455_vm8, %v6598_v19, 0.0 }
 0xf4a   : > { %4321 = vadd.xlane.f32.xlu1 %v4320_v57  ;;  %v4660_v57 = vld [vmem:[#allocation8 + $0x15c] sm:$0xf] }
 0xfca   : > { %v4313_v44 = vpop.xlane.xlu0 %4312 }
 0xfcb   : > { %6599 = vrcp.f32 %v4313_v44  ;;  %v4661_v44 = vld [vmem:[#allocation8 + $0x17c] sm:$0xf] }
 0xfcf   : > { %v4316_v22 = vpop.xlane.xlu1 %4315 }
 0xfd0   : > { %6601 = vrcp.f32 %v4316_v22  ;;  %v5463_v22 = vcombine.low %v4660_v57, %v4661_v44 }
 0xfd2   : > { %v4319_v25 = vpop.xlane.xlu0 %4318 }
 0xfd3   : > { %6603 = vrcp.f32 %v4319_v25  ;;  %v4662_v25 = vld [vmem:[#allocation8 + $0x19c] sm:$0xf] }
 0xfd5   : > { %v6600_v39 = vpop.eup %6599 }
 0xfd6   : > { %v4327_v5 = vmul.f32 %v6600_v39, %v6592_v38  ;;  %v5454_v38 = vcombine.low %v4539_v47, %v4540_v28  ;;  %v4663_v39 = vld [vmem:[#allocation8 + $0x1bc] sm:$0xf]  ;;  %v6475_v28 = vld [vmem:[#allocation11 + $0x20] sm:$0xff]  }
 0xfd7   : > { %v4322_v12 = vpop.xlane.xlu1 %4321  ;;  %v5464_v36 = vcombine.low %v4662_v25, %v4663_v39  ;;  %v6474_v47 = vld [vmem:[#allocation11 + $0x18] sm:$0xff]   ;;  %v5457_v25 = vld [vmem:[%s8071_s6 + $0x8] ss:$0 sm:$0xff] }
 0xfd8   : > { %6605 = vrcp.f32 %v4322_v12  ;;  %v4335_v54 = vpack.c.bf16 %v4327_v5, %v4327_v5  ;;  %v4665_v5 = vld [vmem:[#allocation8 + $0x1fc] sm:$0xf] }
 0xfd9   : > { %v5465_v12 = vcombine.low %v4664_v50, %v4665_v5 }
 0xfda   : > { %v6602_v60 = vpop.eup %6601  ;;  %6153 = vmatmul.mubr.msk.bf16.vlgmr.msra.gmra.mrb[76].mxu1 %vm1455_vm8, %v4335_v54 }
 0xfdb   : > { %v4328_v30 = vmul.f32 %v6602_v60, %v6594_v48  ;;  %6163 = vmatpush3.bf16.msra.mxu1 %v4435_v3  ;;  %6164 = vmatprep.mubr.msk.bf16.mxu1 %vm6877_vm0, %v6876_v26  ;;  %v5462_v48 = vcombine.low %v4658_v27, %v4659_v42  ;;  %v5448_v27 = vld [vmem:[%s8071_s6 + $0x7] ss:$0 sm:$0xff] }
 0xfdc   : > { %6174 = vmatprep.subr.bf16.mxu1 %v5449_v56 }
 0xfdd   : > { %v6604_v33 = vpop.eup %6603  ;;  %v4336_v49 = vpack.c.bf16 %v4328_v30, %v4328_v30 }
 0xfde   : > { %v4329_v51 = vmul.f32 %v6604_v33, %v6596_v32  ;;  %v4543_v32 = vld [vmem:[#allocation8 + $0x1d8] sm:$0xf] }
 0xfdf   : > { %6159 = vmatmul.mubr.msk.bf16.vlgmr.msra.gmra.mrb[68].mxu0 %vm1455_vm8, %v4336_v49 }
 0xfe0   : > { %v4337_v14 = vpack.c.bf16 %v4329_v51, %v4329_v51  ;;  %6169 = vmatpush3.bf16.msra.mxu0 %v4481_v9  ;;  %6170 = vmatprep.mubr.msk.bf16.mxu0 %vm6877_vm0, %v6876_v26 }
 0xfe1   : > { %6194 = vmatprep.subr.bf16.mxu0 %v5458_v63 }
 0xfe2   : > { %v6606_v52 = vpop.eup %6605  ;;  %6165 = vmatmul.mubr.msk.bf16.vlgmr.msra.gmra.mrb[80].mxu1 %vm1455_vm8, %v4337_v14 }
 0xfe3   : > { %v4330_v18 = vmul.f32 %v6606_v52, %v6598_v19  ;;  %6175 = vmatpush3.bf16.msra.mxu1 %v5449_v56  ;;  %6190 = vmatprep.mubr.bf16.mxu1 %v4527_v16  ;;  %v5453_v16 = vcombine.low %v4537_v37, %v4538_v41  ;;  %v5456_v19 = vcombine.low %v4543_v32, %v4544_v1  ;;  %v6456_v52 = vld [vmem:[#allocation10] sm:$0xff]   ;;  %v6468_v37 = vld [vmem:[#allocation10 + $0x30] sm:$0xff]   ;;  %v6469_v41 = vld [vmem:[#allocation10 + $0x78] sm:$0xff]  }
 0xfe4   : > { %6176 = vmatprep.subr.bf16.mxu1 %v5450_v34 }
 0xfe5   : > { %v4338_v11 = vpack.c.bf16 %v4330_v18, %v4330_v18  ;;  %v6459_v18 = vld [vmem:[#allocation10 + $0x50] sm:$0xff]  }
 0xfe7   : > { %6171 = vmatmul.mubr.msk.bf16.vlgmr.msra.gmra.mrb[72].mxu0 %vm1455_vm8, %v4338_v11  ;;  %6177 = vmatpush3.bf16.msra.mxu1 %v5450_v34  ;;  %v6461_v11 = vld [vmem:[#allocation10 + $0x58] sm:$0xff]  }
 0xfe8   : > { %6178 = vmatprep.subr.bf16.mxu1 %v5451_v10  ;;  %6195 = vmatpush3.bf16.msra.mxu0 %v5458_v63 }
 0xfe9   : > { %6196 = vmatprep.subr.bf16.mxu0 %v5459_v29 }
 0xfeb   : > { %6179 = vmatpush3.bf16.msra.mxu1 %v5451_v10  ;;  %v6460_v10 = vld [vmem:[#allocation10 + $0x10] sm:$0xff]  }
 0xfec   : > { %6180 = vmatprep.subr.bf16.mxu1 %v5452_v46  ;;  %6197 = vmatpush3.bf16.msra.mxu0 %v5459_v29  ;;  %v6464_v29 = vld [vmem:[#allocation10 + $0x20] sm:$0xff]  }
 0xfed   : > { %6198 = vmatprep.subr.bf16.mxu0 %v5460_v62 }
 0xfef   : > { %6181 = vmatpush3.bf16.msra.mxu1 %v5452_v46  ;;  %v6467_v46 = vld [vmem:[#allocation10 + $0x70] sm:$0xff]  }
 0xff0   : > { %6182 = vmatprep.subr.bf16.mxu1 %v5453_v16  ;;  %6199 = vmatpush3.bf16.msra.mxu0 %v5460_v62  ;;  %v6470_v62 = vld [vmem:[#allocation10 + $0x38] sm:$0xff]  }
 0xff1   : > { %6200 = vmatprep.subr.bf16.mxu0 %v5461_v53 }
 0xff3   : > { %6183 = vmatpush3.bf16.msra.mxu1 %v5453_v16  ;;  %v6473_v16 = vld [vmem:[#allocation11 + $0x10] sm:$0xff]  }
 0xff4   : > { %6184 = vmatprep.subr.bf16.mxu1 %v5454_v38  ;;  %6201 = vmatpush3.bf16.msra.mxu0 %v5461_v53  ;;  %v6476_v53 = vld [vmem:[#allocation11 + $0x28] sm:$0xff]  }
 0xff5   : > { %6202 = vmatprep.subr.bf16.mxu0 %v5462_v48 }
 0xff7   : > { %6185 = vmatpush3.bf16.msra.mxu1 %v5454_v38 }
 0xff8   : > { %6186 = vmatprep.subr.bf16.mxu1 %v5455_v6  ;;  %6203 = vmatpush3.bf16.msra.mxu0 %v5462_v48 }
 0xff9   : > { %6204 = vmatprep.subr.bf16.mxu0 %v5463_v22 }
 0xffb   : > { %6187 = vmatpush3.bf16.msra.mxu1 %v5455_v6 }
 0xffc   : > { %6188 = vmatprep.subr.bf16.mxu1 %v5456_v19  ;;  %6205 = vmatpush3.bf16.msra.mxu0 %v5463_v22 }
 0xffd   : > { %6206 = vmatprep.subr.bf16.mxu0 %v5464_v36 }
 0xfff   : > { %6189 = vmatpush3.bf16.msra.mxu1 %v5456_v19 }
0x1000   : > { %6207 = vmatpush3.bf16.msra.mxu0 %v5464_v36  ;;  %5719 = vmatprep.subr.bf16.mxu1 %v6455_v31 }
0x1001   : > { %6208 = vmatprep.subr.bf16.mxu0 %v5465_v12 }
0x1002   : > { %6191 = vmatmul.mubr.bf16.vlgmr.msra.gmra.mrb[100].mxu1 %v4528_v24 }
0x1003   : > { %5720 = vmatpush3.bf16.msra.mxu1 %v6456_v52 }
0x1004   : > { %6209 = vmatpush3.bf16.msra.mxu0 %v5465_v12  ;;  %5721 = vmatprep.subr.bf16.mxu1 %v6457_v2 }
0x1005   : > { %6214 = vmatprep.subr.bf16.mxu0 %v6876_v26 }
0x1007   : > { %5722 = vmatpush3.bf16.msra.mxu1 %v6458_v35 }
0x1008   : > { %5723 = vmatprep.subr.bf16.mxu1 %v6459_v18 }
0x100b   : > { %5724 = vmatpush3.bf16.msra.mxu1 %v6460_v10 }
0x100c   : > { %5725 = vmatprep.subr.bf16.mxu1 %v6461_v11 }
0x100f   : > { %5726 = vmatpush3.bf16.msra.mxu1 %v6462_v15 }
0x1010   : > { %5727 = vmatprep.subr.bf16.mxu1 %v6463_v17 }
0x1013   : > { %5728 = vmatpush3.bf16.msra.mxu1 %v6464_v29 }
0x1014   : > { %5729 = vmatprep.subr.bf16.mxu1 %v6465_v4 }
0x1017   : > { %5730 = vmatpush3.bf16.msra.mxu1 %v6466_v20 }
0x1018   : > { %5731 = vmatprep.subr.bf16.mxu1 %v6467_v46 }
0x101b   : > { %5732 = vmatpush3.bf16.msra.mxu1 %v6468_v37 }
0x101c   : > { %5733 = vmatprep.subr.bf16.mxu1 %v6469_v41 }
0x101f   : > { %5734 = vmatpush3.bf16.msra.mxu1 %v6470_v62 }
0x10ad   : > { %v4379_v59 = vpop.f32.mrb[76].mxu1 }
0x10ae   : > { %v6154_v43 = vpop.f32.mrb[77].mxu1 }
0x10af   : > { %v4382_v7 = vpop.f32.mrb[78].mxu1 }
0x10b0   : > { %v6155_v24 = vpop.f32.mrb[79].mxu1 }
0x10b2   : > { %v4425_v54 = vpop.f32.mrb[68].mxu0 }
0x10b3   : > { %v4648_v56 = vpack.c.bf16 %v4425_v54, %v4379_v59  ;;  %v6160_v60 = vpop.f32.mrb[69].mxu0 }
0x10b4   : > { %v4428_v3 = vpop.f32.mrb[70].mxu0 }
0x10b5   : > { %v6161_v45 = vpop.f32.mrb[71].mxu0  ;;  %6210 = vmatprep.mubr.bf16.mxu0 %v4648_v56  ;;  %v4471_v21 = vpop.f32.mrb[80].mxu1 }
0x10b6   : > { %v6166_v30 = vpop.f32.mrb[81].mxu1 }
0x10b7   : > { %v4474_v8 = vpop.f32.mrb[82].mxu1 }
0x10b8   : > { %v6167_v33 = vpop.f32.mrb[83].mxu1 }
0x10ba   : > { %v4517_v49 = vpop.f32.mrb[72].mxu0 }
0x10bb   : > { %v4649_v55 = vpack.c.bf16 %v4517_v49, %v4471_v21  ;;  %v6172_v58 = vpop.f32.mrb[73].mxu0 }
0x10bc   : > { %v4520_v63 = vpop.f32.mrb[74].mxu0 }
0x10bd   : > { %v6173_v51 = vpop.f32.mrb[75].mxu0  ;;  %6211 = vmatmul.mubr.bf16.vlgmr.msra.gmra.mrb[92].mxu0 %v4649_v55 }
0x10be   : > { %6230 = vmatprep.mubr.msk.bf16.mxu0 %vm6877_vm0, %v6876_v26  ;;  %6215 = vmatpush3.bf16.msra.mxu0 %v6471_v13  ;;  %vm4852_vm0 = vcmask 1042434  }
0x10bf   : > { %6216 = vmatprep.subr.bf16.mxu0 %v6876_v26 }
0x10c2   : > { %6217 = vmatpush3.bf16.msra.mxu0 %v6472_v0 }
0x10c3   : > { %6218 = vmatprep.subr.bf16.mxu0 %v6876_v26 }
0x10c6   : > { %6219 = vmatpush3.bf16.msra.mxu0 %v6473_v16 }
0x10c7   : > { %6220 = vmatprep.subr.bf16.mxu0 %v6876_v26 }
0x10ca   : > { %6221 = vmatpush3.bf16.msra.mxu0 %v6474_v47 }
0x10cb   : > { %6222 = vmatprep.subr.bf16.mxu0 %v6876_v26 }
0x10ce   : > { %6223 = vmatpush3.bf16.msra.mxu0 %v6475_v28 }
0x10cf   : > { %6224 = vmatprep.subr.bf16.mxu0 %v6876_v26 }
0x10d2   : > { %6225 = vmatpush3.bf16.msra.mxu0 %v6476_v53 }
0x10d3   : > { %6226 = vmatprep.subr.bf16.mxu0 %v6876_v26 }
0x10d5   : > { %v6192_v9 = vpop.f32.mrb[100].mxu1 }
0x10d6   : > { %v4633_v14 = vpop.f32.mrb[101].mxu1  ;;  %v4642_v42 = vadd.f32 %v6192_v9, %v5448_v27 }
0x10d7   : > { %v6193_v34 = vpop.f32.mrb[102].mxu1  ;;  %v4634_v38 = vadd.f32 %v5448_v27, %v4633_v14 }
0x10d8   : > { %v4636_v40 = vpop.f32.mrb[103].mxu1  ;;  %v4645_v61 = vadd.f32 %v6193_v34, %v5448_v27  ;;  %v4781_v48 = vrot.slane %v4642_v42, 4 }
0x10d9   : > { %v4637_v23 = vadd.f32 %v5448_v27, %v4636_v40  ;;  %v4769_v6 = vrot.slane %v4634_v38, 4 }
0x10da   : > { %v4787_v32 = vrot.slane %v4645_v61, 4  ;;  %v4782_v19 = vadd.f32 %v4781_v48, %v4642_v42 }
0x10db   : > { %v4775_v1 = vrot.slane %v4637_v23, 4  ;;  %v4770_v57 = vadd.f32 %v4769_v6, %v4634_v38 }
0x10dc   : > { %v4788_v44 = vadd.f32 %v4787_v32, %v4645_v61  ;;  %v4783_v39 = vrot.slane %v4782_v19, 2 }
0x10dd   : > { %v4776_v22 = vadd.f32 %v4775_v1, %v4637_v23  ;;  %v4771_v36 = vrot.slane %v4770_v57, 2 }
0x10de   : > { %v4789_v5 = vrot.slane %v4788_v44, 2  ;;  %v4784_v54 = vadd.f32 %v4783_v39, %v4782_v19 }
0x10df   : > { %v4777_v43 = vrot.slane %v4776_v22, 2  ;;  %v4772_v45 = vadd.f32 %v4771_v36, %v4770_v57 }
0x10e0   : > { %v4790_v8 = vadd.f32 %v4789_v5, %v4788_v44  ;;  %v4785_v51 = vrot.slane %v4784_v54, 1 }
0x10e1   : > { %v4778_v55 = vadd.f32 %v4777_v43, %v4776_v22  ;;  %v4773_v34 = vrot.slane %v4772_v45, 1 }
0x10e2   : > { %v4791_v52 = vrot.slane %v4790_v8, 1  ;;  %v4786_v15 = vadd.f32 %v4785_v51, %v4784_v54  ;;  %v6478_v51 = vld [vmem:[#allocation11 + $0x38] sm:$0xff]  }
0x10e3   : > { %v4779_v18 = vrot.slane %v4778_v55, 1  ;;  %v4774_v4 = vadd.f32 %v4773_v34, %v4772_v45 }
0x10e4   : > { %v4792_v37 = vadd.f32 %v4791_v52, %v4790_v8  ;;  %v4796_v47 = vmul.f32 0.125, %v4786_v15 }
0x10e5   : > { %v4780_v13 = vadd.f32 %v4779_v18, %v4778_v55  ;;  %v4794_v27 = vmul.f32 0.125, %v4774_v4 }
0x10e6   : > { %v4797_v61 = vmul.f32 0.125, %v4792_v37 }
0x10e7   : > { %v4795_v32 = vmul.f32 0.125, %v4780_v13 }
0x1190   : > { %v6212_v50 = vpop.f32.mrb[92].mxu0 }
0x1191   : > { %v4763_v12 = vadd.f32 %v6212_v50, %v5457_v25  ;;  %v4754_v59 = vpop.f32.mrb[93].mxu0 }
0x1192   : > { %v4755_v7 = vadd.f32 %v5457_v25, %v4754_v59  ;;  %v6213_v24 = vpop.f32.mrb[94].mxu0 }
0x1193   : > { %v4810_v56 = vrot.slane %v4763_v12, 4  ;;  %v4766_v60 = vadd.f32 %v6213_v24, %v5457_v25  ;;  %v4757_v3 = vpop.f32.mrb[95].mxu0 }
0x1194   : > { %v4798_v21 = vrot.slane %v4755_v7, 4  ;;  %v4758_v30 = vadd.f32 %v5457_v25, %v4757_v3 }
0x1195   : > { %v4811_v33 = vadd.f32 %v4810_v56, %v4763_v12  ;;  %v4816_v49 = vrot.slane %v4766_v60, 4 }
0x1196   : > { %v4799_v58 = vadd.f32 %v4798_v21, %v4755_v7  ;;  %v4804_v63 = vrot.slane %v4758_v30, 4 }
0x1197   : > { %v4812_v9 = vrot.slane %v4811_v33, 2  ;;  %v4817_v14 = vadd.f32 %v4816_v49, %v4766_v60 }
0x1198   : > { %v4800_v40 = vrot.slane %v4799_v58, 2  ;;  %v4805_v31 = vadd.f32 %v4804_v63, %v4758_v30  ;;  %v6477_v63 = vld [vmem:[#allocation11 + $0x30] sm:$0xff]  }
0x1199   : > { %v4813_v2 = vadd.f32 %v4812_v9, %v4811_v33  ;;  %v4818_v35 = vrot.slane %v4817_v14, 2  ;;  %6227 = vmatpush3.bf16.msra.mxu0 %v6477_v63 }
0x119a   : > { %v4801_v10 = vadd.f32 %v4800_v40, %v4799_v58  ;;  %v4806_v11 = vrot.slane %v4805_v31, 2  ;;  %6228 = vmatprep.subr.bf16.mxu0 %v6876_v26  ;;  %v5483_v26 = vld [vmem:[%s8071_s6 + $0xa] ss:$0 sm:$0xff] }
0x119b   : > { %v4814_v17 = vrot.slane %v4813_v2, 1  ;;  %v4819_v29 = vadd.f32 %v4818_v35, %v4817_v14  ;;  %v5466_v14 = vld [vmem:[%s8071_s6 + $0x9] ss:$0 sm:$0xff] }
0x119c   : > { %v4802_v20 = vrot.slane %v4801_v10, 1  ;;  %v4807_v46 = vadd.f32 %v4806_v11, %v4805_v31 }
0x119d   : > { %v4815_v41 = vadd.f32 %v4814_v17, %v4813_v2  ;;  %v4820_v62 = vrot.slane %v4819_v29, 1  ;;  %6229 = vmatpush3.bf16.msra.mxu0 %v6478_v51 }
0x119e   : > { %v4803_v0 = vadd.f32 %v4802_v20, %v4801_v10  ;;  %v4808_v16 = vrot.slane %v4807_v46, 1 }
0x119f   : > { %v4824_v28 = vmul.f32 0.125, %v4815_v41  ;;  %v4821_v53 = vadd.f32 %v4820_v62, %v4819_v29 }
0x11a0   : > { %v4822_v42 = vmul.f32 0.125, %v4803_v0  ;;  %v4809_v38 = vadd.f32 %v4808_v16, %v4807_v46 }
0x11a1   : > { %v4828_v23 = vadd.f32 %v4824_v28, %v4796_v47  ;;  %v4836_v48 = vsub.f32 %v4796_v47, %v4824_v28  ;;  %v4825_v6 = vmul.f32 0.125, %v4821_v53 }
0x11a2   : > { %v4826_v1 = vadd.f32 %v4822_v42, %v4794_v27  ;;  %v4834_v19 = vsub.f32 %v4794_v27, %v4822_v42  ;;  %v4823_v57 = vmul.f32 0.125, %v4809_v38 }
0x11a3   : > { %v4829_v44 = vadd.f32 %v4825_v6, %v4797_v61  ;;  %v4837_v22 = vsub.f32 %v4797_v61, %v4825_v6  ;;  %v4840_v50 = vand.u32 2147483647, %v4836_v48  ;;  %v4832_v7 = vmul.f32 0.5, %v4828_v23 }
0x11a4   : > { %v4838_v25 = vand.u32 2147483647, %v4834_v19  ;;  %v4827_v39 = vadd.f32 %v4823_v57, %v4795_v32  ;;  %v4835_v36 = vsub.f32 %v4795_v32, %v4823_v57  ;;  %v4830_v5 = vmul.f32 0.5, %v4826_v1 }
0x11a5   : > { %v4841_v43 = vand.u32 2147483647, %v4837_v22  ;;  %v4833_v54 = vmul.f32 0.5, %v4829_v44  ;;  %v4844_v3 = vmul.f32 0.70710677, %v4840_v50 }
0x11a6   : > { %v4831_v12 = vmul.f32 0.5, %v4827_v39  ;;  %v4839_v59 = vand.u32 2147483647, %v4835_v36  ;;  %v4842_v24 = vmul.f32 0.70710677, %v4838_v25 }
0x11a7   : > { %v4845_v21 = vmul.f32 0.70710677, %v4841_v43 }
0x11a8   : > { %v4843_v56 = vmul.f32 0.70710677, %v4839_v59  ;;  %v4851_v60 = vsel %vm4850_vm15, %v4831_v12, %v4830_v5 }
0x11a9   : > { %v4853_v45 = vsel %vm4852_vm0, %v4832_v7, %v4851_v60 }
0x11aa   : > { %v4861_v30 = vsel %vm4850_vm15, %v4843_v56, %v4842_v24  ;;  %v4855_v8 = vsel %vm4854_vm1, %v4833_v54, %v4853_v45 }
0x11ab   : > { %v4862_v33 = vsel %vm4852_vm0, %v4844_v3, %v4861_v30  ;;  %v4865_v58 = vpack.c.bf16 %v4855_v8, %v4855_v8 }
0x11ac   : > { %v4863_v49 = vsel %vm4854_vm1, %v4845_v21, %v4862_v33 }
0x11ad   : > { %v4866_v55 = vpack.c.bf16 %v4863_v49, %v4863_v49 }
0x11af   : > { %5033 = vmatprep.mubr.bf16.mxu1 %v4866_v55 }
0x11b0   : > { %5034 = vmatmul.mubr.bf16.vlgmr.msra.gmra.mrb[104].mxu1 %v4865_v58 }
0x1283   : > { %v5735_v9 = vpop.f32.mrb[104].mxu1 }
0x1284   : > { %v5736_v34 = vpop.f32.mrb[105].mxu1 }
0x1285   : > { %v5737_v40 = vadd.f32 %v5736_v34, %v5735_v9  ;;  %v5738_v31 = vpop.f32.mrb[106].mxu1 }
0x1286   : > { %v5739_v52 = vpop.f32.mrb[107].mxu1 }
0x1287   : > { %v5036_v2 = vadd.f32 %v5737_v40, %v5466_v14 }
0x1289   : > { %v5041_v35 = vpack.c.bf16 %v5036_v2, %v5036_v2 }
0x128b   : > { %6231 = vmatmul.mubr.bf16.vlgmr.msra.gmra.mrb[96].mxu0 %v5041_v35 }
0x135e   : > { %v5146_v18 = vpop.f32.mrb[96].mxu0 }
0x135f   : > { %v5147_v10 = vadd.f32 %v5483_v26, %v5146_v18  ;;  %v6232_v11 = vpop.f32.mrb[97].mxu0 }
0x1360   : > { %v5149_v15 = vpop.f32.mrb[98].mxu0 }
0x1361   : > { %v5152_v17 = vadd.f32 %v5147_v10, %v5036_v2  ;;  %v6233_v29 = vpop.f32.mrb[99].mxu0 }
0x1363   : > { %5153 = vst [vmem:[%s395_s4] sm:$0xf] %v5152_v17 }
0x1364   : > { %6792 = shalt.err (!%p6789_p4)
}
0x1365   : > { %s6793_s26 = scalar_lea.hbm %s8021_s30, 64  ;;  %s6797_s29 = scalar_lea.hbm %s8072_s7, 128 }
0x1366   : > { %p6794_p11 = scmp.ne.s32.totalorder %s8021_s30, %s6793_s26  ;;  %p6798_p1 = scmp.lt.u32.totalorder %s8021_s30, %s8072_s7 }
0x1367   : > { %p6799_p2 = scmp.lt.u32.totalorder %s6797_s29, %s6793_s26  ;;  %p6801_p0 = scmp.lt.u32.totalorder %s6793_s26, %s8021_s30 }
0x1368   : > { %p6795_p7 = pnand %p6794_p11, %p7094_p3 }
0x1369   : > { %p6800_p13 = por %p6799_p2, %p6798_p1 }
0x136a   : > { %p6796_p12 = pneg %p6795_p7 }
0x136b   : > { %p6802_p6 = por %p6801_p0, %p6800_p13 }
0x136d   : > { %p6803_p8 = pnand %p6802_p6, %p6796_p12 }
0x136f   : > { %6806 = shalt.err (!%p6803_p8)
}
0x1370   : > { %6350 = dma.vmem_to_hbm [thread:$0]  (%p7094_p3), %s8023_s9, 64, %s8021_s30, %s5155_s17  }
0x1371 PF: > { %s5180_s5 = sand.u32 1, %s6849_s24   ;;  %p8120_p10 = scmp.ne.s32.totalorder %s8088_s8, 0 }
0x1372   : > { %p8121_p5 = scmp.ge.s32.totalorder %s6861_s27, 2  ;;  %s5181_s11 = scalar_lea.sflag [#allocation4], %s5180_s5 }
0x1374   : > { %p6373_p9 = pnand %p8121_p5, %p8120_p10 }
0x1376   : > { %6844 = dma.done.wait (!%p6373_p9), %s5181_s11, 64  }
0x1377   : > { %6846 = vsyncadd (!%p6373_p9), %s5181_s11, 4294967232  ;;  %s8122_s19 = sld [smem:[#allocation20_spill]]  ;;  %s8123_s26 = sld [smem:[#allocation21_spill]] }
0x1378   : > { %p25_p4 = scmp.ge.s32.totalorder %s7081_s12, 4   ;;  %s8124_s24 = smov %s6853_s25 }
0x1379   : > { %s8126_s27 = smov %s7081_s12 }
0x137a   :  { %27 = sbr.rel (!%p25_p4) target bundleno = 15 (0xf), region = 122 }
0x137d   : > { %s8125_s25 = smov %s8122_s19 }
0x1381   :  { %5186 = vsyncpa [#allocation3], 1 }
0x1382   :  { %5188 = vsyncpa [#allocation3 + $0x1], 1 }
0x1383   :  { %5189 = vsyncpa [#allocation6], 1 }
0x1384   :  { %5191 = vsyncpa [#allocation6 + $0x1], 1 }
0x1385   :  { %5192 = vsyncpa [#allocation9], 1 }
0x1386   :  { %5193 = vsyncpa [#allocation12], 1 }
0x1387   :  { %5194 = vsyncpa [#allocation4], 1 }
0x1388   :  { %5196 = vsyncpa [#allocation4 + $0x1], 1 }

</bundles_post_ra>
